<compile_context>
chip_gen: v5e
topology: v5e:2x2
jax: 0.10.0
libtpu: 0.0.40
codegen_flags: <defaults>
</compile_context>

<pallas_src>
import math
from functools import partial

import jax
import jax.numpy as jnp
from jax import lax
from jax.experimental import pallas as pl
from jax.experimental.pallas import tpu as pltpu


def _round_up(x, m):
    return (x + m - 1) // m * m


# ----------------------------------------------------------------------------
# Fused ResBlock kernel (one grid step == one batch element)
# ----------------------------------------------------------------------------
def _make_resblock_kernel(hp, wp, cp, coutp, cdtype):
    """hp/wp = output spatial dims (H/2, W/2); cp/coutp = padded cin / cout."""
    inv_sqrt2 = 1.0 / math.sqrt(2.0)

    def kernel(xp00_ref, xp01_ref, xp10_ref, xp11_ref,
               w1_ref, b1_ref, w2_ref, b2_ref, ws_ref, bs_ref,
               out_ref, q00, q01, q10, q11):
        # xp[a][b][u, v, :] == xpad[2u + a, 2v + b, :]   (xpad = x zero-padded by 1)
        xp = ((xp00_ref[...], xp01_ref[...]),
              (xp10_ref[...], xp11_ref[...]))            # each (hp+1, wp+1, cp), bf16
        # q[a][b][i, j, :] will hold y1pad[2i + a, 2j + b, :]  (y1pad = pad(y1, 1))
        q = ((q00, q01), (q10, q11))
        w1 = w1_ref[...]                                  # (9, cp, cp)
        w2 = w2_ref[...]                                  # (9, cp, coutp)

        # Zero the y1-phase scratches: their untouched row/col 0 provides conv2's
        # zero padding.
        for a in (0, 1):
            for b in (0, 1):
                q[a][b][...] = jnp.zeros_like(q[a][b])

        # ---- conv1: 3x3, stride 1, pad 1, + LeakyReLU(0.2) -------------------
        # Computed per output-parity phase so that all reads are contiguous
        # slices of the polyphase inputs (no strides, no im2col).
        for pr in (0, 1):
            for pc in (0, 1):
                acc = jnp.zeros((hp * wp, cp), jnp.float32)
                for kh in range(3):
                    for kw in range(3):
                        a, ro = (pr + kh) % 2, (pr + kh) // 2
                        b, co = (pc + kw) % 2, (pc + kw) // 2
                        slab = xp[a][b][ro:ro + hp, co:co + wp, :]
                        slab = slab.reshape(hp * wp, cp)
                        acc = acc + jnp.dot(slab, w1[3 * kh + kw],
                                            preferred_element_type=jnp.float32)
                acc = acc + b1_ref[...]                       # f32 epilogue
                y = jnp.where(acc > 0, acc, 0.2 * acc).astype(cdtype)
                # y1 phase (pr, pc) lands in q[1-pr][1-pc] at offset (pr, pc)
                q[1 - pr][1 - pc][pr:pr + hp, pc:pc + wp, :] = y.reshape(hp, wp, cp)

        # ---- conv2: 3x3, stride 2, pad 1, + LeakyReLU(0.2) -------------------
        acc2 = jnp.zeros((hp * wp, coutp), jnp.float32)
        for kh in range(3):
            for kw in range(3):
                a, ro = kh % 2, kh // 2
                b, co = kw % 2, kw // 2
                slab = q[a][b][ro:ro + hp, co:co + wp, :].reshape(hp * wp, cp)
                acc2 = acc2 + jnp.dot(slab, w2[3 * kh + kw],
                                      preferred_element_type=jnp.float32)
        acc2 = acc2 + b2_ref[...]
        acc2 = jnp.where(acc2 > 0, acc2, 0.2 * acc2)

        # ---- skip: 1x1, stride 2, pad 0, + LeakyReLU(0.2) --------------------
        # x[2io, 2jo] == xpad[2io+1, 2jo+1] == phase (1, 1)
        xs = xp[1][1][0:hp, 0:wp, :].reshape(hp * wp, cp)
        sk = jnp.dot(xs, ws_ref[...], preferred_element_type=jnp.float32) + bs_ref[...]
        sk = jnp.where(sk > 0, sk, 0.2 * sk)

        # ---- residual combine, lane-dense (coutp = multiple of 128) store ----
        out = (acc2 + sk) * inv_sqrt2
        out_ref[...] = out.reshape(hp, wp, coutp).astype(out_ref.dtype)

    return kernel


# ----------------------------------------------------------------------------
# ResBlock forward (public interface NCHW, to mirror the PyTorch module)
# ----------------------------------------------------------------------------
def resblock_forward(x_nchw, params, compute_dtype=jnp.bfloat16):
    w1, b1, w2, b2, ws, bs = params
    n, cin, h, w = x_nchw.shape
    cout = w2.shape[3]
    assert h % 2 == 0 and w % 2 == 0, "even spatial dims required"

    cp = _round_up(max(cin, 8), 8)          # padded in-channels (sublane friendly)
    coutp = _round_up(max(cout, 128), 128)  # padded out-channels (lane-dense output)
    hp, wp = h // 2, w // 2
    hp1, wp1 = hp + 1, wp + 1

    # NCHW -> NHWC, channel pad, spatial zero-pad of 1 (this IS conv1's padding),
    # cast matmul operands to bf16.
    x = jnp.transpose(x_nchw, (0, 2, 3, 1)).astype(jnp.float32)
    x = jnp.pad(x, ((0, 0), (1, 1), (1, 1), (0, cp - cin)))
    x = x.astype(compute_dtype)
    # 2x2 polyphase split (cheap XLA strided slices): xph[2a+b][:, u, v, :] = xpad[:, 2u+a, 2v+b, :]
    xph = [x[:, a::2, b::2, :] for a in (0, 1) for b in (0, 1)]

    def pad_conv_w(wk, ci, co, cop):
        kh, kw = wk.shape[0], wk.shape[1]
        out = jnp.zeros((kh * kw, cp, cop), jnp.float32)
        out = out.at[:, :ci, :co].set(wk.reshape(kh * kw, ci, co))
        return out.astype(compute_dtype)

    w1p = pad_conv_w(w1, cin, cin, cp)          # (9, cp, cp)
    w2p = pad_conv_w(w2, cin, cout, coutp)      # (9, cp, coutp)
    wsp = pad_conv_w(ws, cin, cout, coutp)[0]   # (cp, coutp)
    b1p = jnp.zeros((1, cp), jnp.float32).at[0, :cin].set(b1)
    b2p = jnp.zeros((1, coutp), jnp.float32).at[0, :cout].set(b2)
    bsp = jnp.zeros((1, coutp), jnp.float32).at[0, :cout].set(bs)

    kernel = _make_resblock_kernel(hp, wp, cp, coutp, compute_dtype)

    phase_spec = pl.BlockSpec((None, hp1, wp1, cp), lambda i: (i, 0, 0, 0))
    out_padded = pl.pallas_call(
        kernel,
        out_shape=jax.ShapeDtypeStruct((n, hp, wp, coutp), jnp.float32),
        grid=(n,),
        in_specs=[
            phase_spec, phase_spec, phase_spec, phase_spec,
            pl.BlockSpec((9, cp, cp), lambda i: (0, 0, 0)),
            pl.BlockSpec((1, cp), lambda i: (0, 0)),
            pl.BlockSpec((9, cp, coutp), lambda i: (0, 0, 0)),
            pl.BlockSpec((1, coutp), lambda i: (0, 0)),
            pl.BlockSpec((cp, coutp), lambda i: (0, 0)),
            pl.BlockSpec((1, coutp), lambda i: (0, 0)),
        ],
        out_specs=pl.BlockSpec((None, hp, wp, coutp), lambda i: (i, 0, 0, 0)),
        scratch_shapes=[pltpu.VMEM((hp1, wp1, cp), compute_dtype) for _ in range(4)],
        compiler_params=pltpu.CompilerParams(
            dimension_semantics=("parallel",),      # >=2 steps feeds both v7x TCs
            vmem_limit_bytes=32 * 1024 * 1024,      # explicit, safe on v7x's 64 MiB
        ),
    )(xph[0], xph[1], xph[2], xph[3], w1p, b1p, w2p, b2p, wsp, bsp)

    out = out_padded[..., :cout]
    return jnp.transpose(out, (0, 3, 1, 2))          # NHWC -> NCHW


# ----------------------------------------------------------------------------
# Pure-JAX reference (lax.conv).  quant_dtype mirrors the kernel's bf16
# operand quantisation so the tight comparison only sees accumulation-order noise.
# ----------------------------------------------------------------------------
def _leaky(x):
    return jnp.where(x > 0, x, 0.2 * x)


def resblock_reference(x_nchw, params, quant_dtype=None):
    w1, b1, w2, b2, ws, bs = params
    dn = ("NCHW", "HWIO", "NCHW")
    if quant_dtype is None:
        q = lambda a: a
    else:
        q = lambda a: a.astype(quant_dtype).astype(jnp.float32)

    def conv(x, wk, b, stride, pad):
        y = lax.conv_general_dilated(q(x), q(wk), (stride, stride),
                                     [(pad, pad), (pad, pad)],
                                     dimension_numbers=dn)
        return _leaky(y + b.reshape(1, -1, 1, 1))

    out = conv(x_nchw, w1, b1, 1, 1)
    out = conv(out, w2, b2, 2, 1)
    skip = conv(x_nchw, ws, bs, 2, 0)
    return (out + skip) * (1.0 / math.sqrt(2.0))


# ----------------------------------------------------------------------------
# Main
# ----------------------------------------------------------------------------
if __name__ == "__main__":
    N, CIN, COUT, H, W = 2, 4, 8, 16, 16

    key = jax.random.PRNGKey(0)
    k_x, k_w1, k_b1, k_w2, k_b2, k_ws, k_bs = jax.random.split(key, 7)

    s1 = 1.0 / math.sqrt(9 * CIN)
    ss = 1.0 / math.sqrt(1 * CIN)
    w1 = jax.random.normal(k_w1, (3, 3, CIN, CIN), jnp.float32) * s1
    b1 = jax.random.normal(k_b1, (CIN,), jnp.float32) * s1
    w2 = jax.random.normal(k_w2, (3, 3, CIN, COUT), jnp.float32) * s1
    b2 = jax.random.normal(k_b2, (COUT,), jnp.float32) * s1
    ws = jax.random.normal(k_ws, (1, 1, CIN, COUT), jnp.float32) * ss
    bs = jax.random.normal(k_bs, (COUT,), jnp.float32) * ss
    params = (w1, b1, w2, b2, ws, bs)

    x = jax.random.normal(k_x, (N, CIN, H, W), jnp.float32)

    fwd = jax.jit(resblock_forward)
    out = jax.block_until_ready(fwd(x, params))

    ref_q = resblock_reference(x, params, quant_dtype=jnp.bfloat16)   # same quantisation
    ref_f = resblock_reference(x, params)                             # full f32

    assert out.shape == (N, COUT, H // 2, W // 2), out.shape
    assert jnp.allclose(out, ref_q, atol=5e-3, rtol=5e-3), \
        f"max abs err vs quantized ref = {jnp.max(jnp.abs(out - ref_q))}"
    assert jnp.allclose(out, ref_f, atol=1e-1, rtol=1e-1), \
        f"max abs err vs f32 ref = {jnp.max(jnp.abs(out - ref_f))}"

    print("KERNEL_OK")
</pallas_src>

<mosaic_0001>
module attributes {stable_mosaic.version = 11 : i64} {
  func.func @kernel(%arg0: i32, %arg1: memref<1x9x9x8xbf16, #tpu.memory_space<vmem>>, %arg2: memref<1x9x9x8xbf16, #tpu.memory_space<vmem>>, %arg3: memref<1x9x9x8xbf16, #tpu.memory_space<vmem>>, %arg4: memref<1x9x9x8xbf16, #tpu.memory_space<vmem>>, %arg5: memref<9x8x8xbf16, #tpu.memory_space<vmem>>, %arg6: memref<1x8xf32, #tpu.memory_space<vmem>>, %arg7: memref<9x8x128xbf16, #tpu.memory_space<vmem>>, %arg8: memref<1x128xf32, #tpu.memory_space<vmem>>, %arg9: memref<8x128xbf16, #tpu.memory_space<vmem>>, %arg10: memref<1x128xf32, #tpu.memory_space<vmem>>, %arg11: memref<1x8x8x128xf32, #tpu.memory_space<vmem>>, %arg12: memref<9x9x8xbf16, #tpu.memory_space<vmem>>, %arg13: memref<9x9x8xbf16, #tpu.memory_space<vmem>>, %arg14: memref<9x9x8xbf16, #tpu.memory_space<vmem>>, %arg15: memref<9x9x8xbf16, #tpu.memory_space<vmem>>) attributes {dimension_semantics = [#tpu.dimension_semantics<parallel>], iteration_bounds = array<i64: 2>, scalar_prefetch = 0 : i64, scratch_operands = 4 : i64, tpu.core_type = #tpu.core_type<tc>, window_params = [{transform_indices = @transform_0, window_bounds = array<i64: 1, 9, 9, 8>}, {transform_indices = @transform_1, window_bounds = array<i64: 1, 9, 9, 8>}, {transform_indices = @transform_2, window_bounds = array<i64: 1, 9, 9, 8>}, {transform_indices = @transform_3, window_bounds = array<i64: 1, 9, 9, 8>}, {pipeline_mode = #tpu.pipeline_mode<synchronous>, transform_indices = @transform_4, window_bounds = array<i64: 9, 8, 8>}, {pipeline_mode = #tpu.pipeline_mode<synchronous>, transform_indices = @transform_5, window_bounds = array<i64: 1, 8>}, {pipeline_mode = #tpu.pipeline_mode<synchronous>, transform_indices = @transform_6, window_bounds = array<i64: 9, 8, 128>}, {pipeline_mode = #tpu.pipeline_mode<synchronous>, transform_indices = @transform_7, window_bounds = array<i64: 1, 128>}, {pipeline_mode = #tpu.pipeline_mode<synchronous>, transform_indices = @transform_8, window_bounds = array<i64: 8, 128>}, {pipeline_mode = #tpu.pipeline_mode<synchronous>, transform_indices = @transform_9, window_bounds = array<i64: 1, 128>}, {transform_indices = @transform_10, window_bounds = array<i64: 1, 8, 8, 128>}]} {
    %c0 = arith.constant 0 : index
    %c0_0 = arith.constant 0 : index
    %c0_1 = arith.constant 0 : index
    %c0_2 = arith.constant 0 : index
    %0 = vector.load %arg1[%c0, %c0_0, %c0_1, %c0_2] : memref<1x9x9x8xbf16, #tpu.memory_space<vmem>>, vector<1x9x9x8xbf16>
    %1 = vector.shape_cast %0 : vector<1x9x9x8xbf16> to vector<9x9x8xbf16>
    %c0_3 = arith.constant 0 : index
    %c0_4 = arith.constant 0 : index
    %c0_5 = arith.constant 0 : index
    %c0_6 = arith.constant 0 : index
    %2 = vector.load %arg2[%c0_3, %c0_4, %c0_5, %c0_6] : memref<1x9x9x8xbf16, #tpu.memory_space<vmem>>, vector<1x9x9x8xbf16>
    %3 = vector.shape_cast %2 : vector<1x9x9x8xbf16> to vector<9x9x8xbf16>
    %c0_7 = arith.constant 0 : index
    %c0_8 = arith.constant 0 : index
    %c0_9 = arith.constant 0 : index
    %c0_10 = arith.constant 0 : index
    %4 = vector.load %arg3[%c0_7, %c0_8, %c0_9, %c0_10] : memref<1x9x9x8xbf16, #tpu.memory_space<vmem>>, vector<1x9x9x8xbf16>
    %5 = vector.shape_cast %4 : vector<1x9x9x8xbf16> to vector<9x9x8xbf16>
    %c0_11 = arith.constant 0 : index
    %c0_12 = arith.constant 0 : index
    %c0_13 = arith.constant 0 : index
    %c0_14 = arith.constant 0 : index
    %6 = vector.load %arg4[%c0_11, %c0_12, %c0_13, %c0_14] : memref<1x9x9x8xbf16, #tpu.memory_space<vmem>>, vector<1x9x9x8xbf16>
    %7 = vector.shape_cast %6 : vector<1x9x9x8xbf16> to vector<9x9x8xbf16>
    %c0_15 = arith.constant 0 : index
    %c0_16 = arith.constant 0 : index
    %c0_17 = arith.constant 0 : index
    %8 = vector.load %arg5[%c0_15, %c0_16, %c0_17] : memref<9x8x8xbf16, #tpu.memory_space<vmem>>, vector<9x8x8xbf16>
    %c0_18 = arith.constant 0 : index
    %c0_19 = arith.constant 0 : index
    %c0_20 = arith.constant 0 : index
    %9 = vector.load %arg7[%c0_18, %c0_19, %c0_20] : memref<9x8x128xbf16, #tpu.memory_space<vmem>>, vector<9x8x128xbf16>
    %cst = arith.constant 0.000000e+00 : bf16
    %10 = vector.broadcast %cst : bf16 to vector<9x9x8xbf16>
    %c0_21 = arith.constant 0 : index
    %c0_22 = arith.constant 0 : index
    %c0_23 = arith.constant 0 : index
    %11 = vector.load %arg12[%c0_21, %c0_22, %c0_23] : memref<9x9x8xbf16, #tpu.memory_space<vmem>>, vector<9x9x8xbf16>
    tpu.vector_store %arg12[%c0_21, %c0_22, %c0_23], %10 {strides = array<i32>} : memref<9x9x8xbf16, #tpu.memory_space<vmem>>, vector<9x9x8xbf16>,
    %cst_24 = arith.constant 0.000000e+00 : bf16
    %12 = vector.broadcast %cst_24 : bf16 to vector<9x9x8xbf16>
    %c0_25 = arith.constant 0 : index
    %c0_26 = arith.constant 0 : index
    %c0_27 = arith.constant 0 : index
    %13 = vector.load %arg13[%c0_25, %c0_26, %c0_27] : memref<9x9x8xbf16, #tpu.memory_space<vmem>>, vector<9x9x8xbf16>
    tpu.vector_store %arg13[%c0_25, %c0_26, %c0_27], %12 {strides = array<i32>} : memref<9x9x8xbf16, #tpu.memory_space<vmem>>, vector<9x9x8xbf16>,
    %cst_28 = arith.constant 0.000000e+00 : bf16
    %14 = vector.broadcast %cst_28 : bf16 to vector<9x9x8xbf16>
    %c0_29 = arith.constant 0 : index
    %c0_30 = arith.constant 0 : index
    %c0_31 = arith.constant 0 : index
    %15 = vector.load %arg14[%c0_29, %c0_30, %c0_31] : memref<9x9x8xbf16, #tpu.memory_space<vmem>>, vector<9x9x8xbf16>
    tpu.vector_store %arg14[%c0_29, %c0_30, %c0_31], %14 {strides = array<i32>} : memref<9x9x8xbf16, #tpu.memory_space<vmem>>, vector<9x9x8xbf16>,
    %cst_32 = arith.constant 0.000000e+00 : bf16
    %16 = vector.broadcast %cst_32 : bf16 to vector<9x9x8xbf16>
    %c0_33 = arith.constant 0 : index
    %c0_34 = arith.constant 0 : index
    %c0_35 = arith.constant 0 : index
    %17 = vector.load %arg15[%c0_33, %c0_34, %c0_35] : memref<9x9x8xbf16, #tpu.memory_space<vmem>>, vector<9x9x8xbf16>
    tpu.vector_store %arg15[%c0_33, %c0_34, %c0_35], %16 {strides = array<i32>} : memref<9x9x8xbf16, #tpu.memory_space<vmem>>, vector<9x9x8xbf16>,
    %cst_36 = arith.constant 0.000000e+00 : f32
    %18 = vector.broadcast %cst_36 : f32 to vector<64x8xf32>
    %19 = vector.extract_strided_slice %1 {offsets = [0, 0, 0], sizes = [8, 8, 8], strides = [1, 1, 1]} : vector<9x9x8xbf16> to vector<8x8x8xbf16>
    %20 = vector.shape_cast %19 : vector<8x8x8xbf16> to vector<64x8xbf16>
    %21 = vector.extract_strided_slice %8 {offsets = [0, 0, 0], sizes = [1, 8, 8], strides = [1, 1, 1]} : vector<9x8x8xbf16> to vector<1x8x8xbf16>
    %22 = vector.shape_cast %21 : vector<1x8x8xbf16> to vector<8x8xbf16>
    %cst_37 = arith.constant dense<0.000000e+00> : vector<64x8xf32>
    %23 = tpu.matmul %20, %22, %cst_37 {dimension_numbers = #tpu.dot_dimension_numbers<[1], [0], [0], [1], [0, 0, 1, 1], [], []>} : vector<64x8xbf16>, vector<8x8xbf16>, vector<64x8xf32> -> vector<64x8xf32>
    %24 = arith.addf %18, %23 : vector<64x8xf32>
    %25 = vector.extract_strided_slice %3 {offsets = [0, 0, 0], sizes = [8, 8, 8], strides = [1, 1, 1]} : vector<9x9x8xbf16> to vector<8x8x8xbf16>
    %26 = vector.shape_cast %25 : vector<8x8x8xbf16> to vector<64x8xbf16>
    %27 = vector.extract_strided_slice %8 {offsets = [1, 0, 0], sizes = [1, 8, 8], strides = [1, 1, 1]} : vector<9x8x8xbf16> to vector<1x8x8xbf16>
    %28 = vector.shape_cast %27 : vector<1x8x8xbf16> to vector<8x8xbf16>
    %cst_38 = arith.constant dense<0.000000e+00> : vector<64x8xf32>
    %29 = tpu.matmul %26, %28, %cst_38 {dimension_numbers = #tpu.dot_dimension_numbers<[1], [0], [0], [1], [0, 0, 1, 1], [], []>} : vector<64x8xbf16>, vector<8x8xbf16>, vector<64x8xf32> -> vector<64x8xf32>
    %30 = arith.addf %24, %29 : vector<64x8xf32>
    %31 = vector.extract_strided_slice %1 {offsets = [0, 1, 0], sizes = [8, 8, 8], strides = [1, 1, 1]} : vector<9x9x8xbf16> to vector<8x8x8xbf16>
    %32 = vector.shape_cast %31 : vector<8x8x8xbf16> to vector<64x8xbf16>
    %33 = vector.extract_strided_slice %8 {offsets = [2, 0, 0], sizes = [1, 8, 8], strides = [1, 1, 1]} : vector<9x8x8xbf16> to vector<1x8x8xbf16>
    %34 = vector.shape_cast %33 : vector<1x8x8xbf16> to vector<8x8xbf16>
    %cst_39 = arith.constant dense<0.000000e+00> : vector<64x8xf32>
    %35 = tpu.matmul %32, %34, %cst_39 {dimension_numbers = #tpu.dot_dimension_numbers<[1], [0], [0], [1], [0, 0, 1, 1], [], []>} : vector<64x8xbf16>, vector<8x8xbf16>, vector<64x8xf32> -> vector<64x8xf32>
    %36 = arith.addf %30, %35 : vector<64x8xf32>
    %37 = vector.extract_strided_slice %5 {offsets = [0, 0, 0], sizes = [8, 8, 8], strides = [1, 1, 1]} : vector<9x9x8xbf16> to vector<8x8x8xbf16>
    %38 = vector.shape_cast %37 : vector<8x8x8xbf16> to vector<64x8xbf16>
    %39 = vector.extract_strided_slice %8 {offsets = [3, 0, 0], sizes = [1, 8, 8], strides = [1, 1, 1]} : vector<9x8x8xbf16> to vector<1x8x8xbf16>
    %40 = vector.shape_cast %39 : vector<1x8x8xbf16> to vector<8x8xbf16>
    %cst_40 = arith.constant dense<0.000000e+00> : vector<64x8xf32>
    %41 = tpu.matmul %38, %40, %cst_40 {dimension_numbers = #tpu.dot_dimension_numbers<[1], [0], [0], [1], [0, 0, 1, 1], [], []>} : vector<64x8xbf16>, vector<8x8xbf16>, vector<64x8xf32> -> vector<64x8xf32>
    %42 = arith.addf %36, %41 : vector<64x8xf32>
    %43 = vector.extract_strided_slice %7 {offsets = [0, 0, 0], sizes = [8, 8, 8], strides = [1, 1, 1]} : vector<9x9x8xbf16> to vector<8x8x8xbf16>
    %44 = vector.shape_cast %43 : vector<8x8x8xbf16> to vector<64x8xbf16>
    %45 = vector.extract_strided_slice %8 {offsets = [4, 0, 0], sizes = [1, 8, 8], strides = [1, 1, 1]} : vector<9x8x8xbf16> to vector<1x8x8xbf16>
    %46 = vector.shape_cast %45 : vector<1x8x8xbf16> to vector<8x8xbf16>
    %cst_41 = arith.constant dense<0.000000e+00> : vector<64x8xf32>
    %47 = tpu.matmul %44, %46, %cst_41 {dimension_numbers = #tpu.dot_dimension_numbers<[1], [0], [0], [1], [0, 0, 1, 1], [], []>} : vector<64x8xbf16>, vector<8x8xbf16>, vector<64x8xf32> -> vector<64x8xf32>
    %48 = arith.addf %42, %47 : vector<64x8xf32>
    %49 = vector.extract_strided_slice %5 {offsets = [0, 1, 0], sizes = [8, 8, 8], strides = [1, 1, 1]} : vector<9x9x8xbf16> to vector<8x8x8xbf16>
    %50 = vector.shape_cast %49 : vector<8x8x8xbf16> to vector<64x8xbf16>
    %51 = vector.extract_strided_slice %8 {offsets = [5, 0, 0], sizes = [1, 8, 8], strides = [1, 1, 1]} : vector<9x8x8xbf16> to vector<1x8x8xbf16>
    %52 = vector.shape_cast %51 : vector<1x8x8xbf16> to vector<8x8xbf16>
    %cst_42 = arith.constant dense<0.000000e+00> : vector<64x8xf32>
    %53 = tpu.matmul %50, %52, %cst_42 {dimension_numbers = #tpu.dot_dimension_numbers<[1], [0], [0], [1], [0, 0, 1, 1], [], []>} : vector<64x8xbf16>, vector<8x8xbf16>, vector<64x8xf32> -> vector<64x8xf32>
    %54 = arith.addf %48, %53 : vector<64x8xf32>
    %55 = vector.extract_strided_slice %1 {offsets = [1, 0, 0], sizes = [8, 8, 8], strides = [1, 1, 1]} : vector<9x9x8xbf16> to vector<8x8x8xbf16>
    %56 = vector.shape_cast %55 : vector<8x8x8xbf16> to vector<64x8xbf16>
    %57 = vector.extract_strided_slice %8 {offsets = [6, 0, 0], sizes = [1, 8, 8], strides = [1, 1, 1]} : vector<9x8x8xbf16> to vector<1x8x8xbf16>
    %58 = vector.shape_cast %57 : vector<1x8x8xbf16> to vector<8x8xbf16>
    %cst_43 = arith.constant dense<0.000000e+00> : vector<64x8xf32>
    %59 = tpu.matmul %56, %58, %cst_43 {dimension_numbers = #tpu.dot_dimension_numbers<[1], [0], [0], [1], [0, 0, 1, 1], [], []>} : vector<64x8xbf16>, vector<8x8xbf16>, vector<64x8xf32> -> vector<64x8xf32>
    %60 = arith.addf %54, %59 : vector<64x8xf32>
    %61 = vector.extract_strided_slice %3 {offsets = [1, 0, 0], sizes = [8, 8, 8], strides = [1, 1, 1]} : vector<9x9x8xbf16> to vector<8x8x8xbf16>
    %62 = vector.shape_cast %61 : vector<8x8x8xbf16> to vector<64x8xbf16>
    %63 = vector.extract_strided_slice %8 {offsets = [7, 0, 0], sizes = [1, 8, 8], strides = [1, 1, 1]} : vector<9x8x8xbf16> to vector<1x8x8xbf16>
    %64 = vector.shape_cast %63 : vector<1x8x8xbf16> to vector<8x8xbf16>
    %cst_44 = arith.constant dense<0.000000e+00> : vector<64x8xf32>
    %65 = tpu.matmul %62, %64, %cst_44 {dimension_numbers = #tpu.dot_dimension_numbers<[1], [0], [0], [1], [0, 0, 1, 1], [], []>} : vector<64x8xbf16>, vector<8x8xbf16>, vector<64x8xf32> -> vector<64x8xf32>
    %66 = arith.addf %60, %65 : vector<64x8xf32>
    %67 = vector.extract_strided_slice %1 {offsets = [1, 1, 0], sizes = [8, 8, 8], strides = [1, 1, 1]} : vector<9x9x8xbf16> to vector<8x8x8xbf16>
    %68 = vector.shape_cast %67 : vector<8x8x8xbf16> to vector<64x8xbf16>
    %69 = vector.extract_strided_slice %8 {offsets = [8, 0, 0], sizes = [1, 8, 8], strides = [1, 1, 1]} : vector<9x8x8xbf16> to vector<1x8x8xbf16>
    %70 = vector.shape_cast %69 : vector<1x8x8xbf16> to vector<8x8xbf16>
    %cst_45 = arith.constant dense<0.000000e+00> : vector<64x8xf32>
    %71 = tpu.matmul %68, %70, %cst_45 {dimension_numbers = #tpu.dot_dimension_numbers<[1], [0], [0], [1], [0, 0, 1, 1], [], []>} : vector<64x8xbf16>, vector<8x8xbf16>, vector<64x8xf32> -> vector<64x8xf32>
    %72 = arith.addf %66, %71 : vector<64x8xf32>
    %c0_46 = arith.constant 0 : index
    %c0_47 = arith.constant 0 : index
    %73 = vector.load %arg6[%c0_46, %c0_47] : memref<1x8xf32, #tpu.memory_space<vmem>>, vector<1x8xf32>
    %74 = vector.broadcast %73 : vector<1x8xf32> to vector<64x8xf32>
    %75 = arith.addf %72, %74 : vector<64x8xf32>
    %cst_48 = arith.constant 0.000000e+00 : f32
    %76 = vector.broadcast %cst_48 : f32 to vector<64x8xf32>
    %77 = arith.cmpf ogt, %75, %76 : vector<64x8xf32>
    %cst_49 = arith.constant 2.000000e-01 : f32
    %78 = vector.broadcast %cst_49 : f32 to vector<64x8xf32>
    %79 = arith.mulf %78, %75 : vector<64x8xf32>
    %80 = arith.select %77, %75, %79 : vector<64x8xi1>, vector<64x8xf32>
    %81 = arith.truncf %80 : vector<64x8xf32> to vector<64x8xbf16>
    %82 = vector.shape_cast %81 : vector<64x8xbf16> to vector<8x8x8xbf16>
    %c0_50 = arith.constant 0 : index
    %c0_51 = arith.constant 0 : index
    %c0_52 = arith.constant 0 : index
    %83 = vector.load %arg15[%c0_50, %c0_51, %c0_52] : memref<9x9x8xbf16, #tpu.memory_space<vmem>>, vector<8x8x8xbf16>
    tpu.vector_store %arg15[%c0_50, %c0_51, %c0_52], %82 {strides = array<i32>} : memref<9x9x8xbf16, #tpu.memory_space<vmem>>, vector<8x8x8xbf16>,
    %cst_53 = arith.constant 0.000000e+00 : f32
    %84 = vector.broadcast %cst_53 : f32 to vector<64x8xf32>
    %85 = vector.extract_strided_slice %3 {offsets = [0, 0, 0], sizes = [8, 8, 8], strides = [1, 1, 1]} : vector<9x9x8xbf16> to vector<8x8x8xbf16>
    %86 = vector.shape_cast %85 : vector<8x8x8xbf16> to vector<64x8xbf16>
    %87 = vector.extract_strided_slice %8 {offsets = [0, 0, 0], sizes = [1, 8, 8], strides = [1, 1, 1]} : vector<9x8x8xbf16> to vector<1x8x8xbf16>
    %88 = vector.shape_cast %87 : vector<1x8x8xbf16> to vector<8x8xbf16>
    %cst_54 = arith.constant dense<0.000000e+00> : vector<64x8xf32>
    %89 = tpu.matmul %86, %88, %cst_54 {dimension_numbers = #tpu.dot_dimension_numbers<[1], [0], [0], [1], [0, 0, 1, 1], [], []>} : vector<64x8xbf16>, vector<8x8xbf16>, vector<64x8xf32> -> vector<64x8xf32>
    %90 = arith.addf %84, %89 : vector<64x8xf32>
    %91 = vector.extract_strided_slice %1 {offsets = [0, 1, 0], sizes = [8, 8, 8], strides = [1, 1, 1]} : vector<9x9x8xbf16> to vector<8x8x8xbf16>
    %92 = vector.shape_cast %91 : vector<8x8x8xbf16> to vector<64x8xbf16>
    %93 = vector.extract_strided_slice %8 {offsets = [1, 0, 0], sizes = [1, 8, 8], strides = [1, 1, 1]} : vector<9x8x8xbf16> to vector<1x8x8xbf16>
    %94 = vector.shape_cast %93 : vector<1x8x8xbf16> to vector<8x8xbf16>
    %cst_55 = arith.constant dense<0.000000e+00> : vector<64x8xf32>
    %95 = tpu.matmul %92, %94, %cst_55 {dimension_numbers = #tpu.dot_dimension_numbers<[1], [0], [0], [1], [0, 0, 1, 1], [], []>} : vector<64x8xbf16>, vector<8x8xbf16>, vector<64x8xf32> -> vector<64x8xf32>
    %96 = arith.addf %90, %95 : vector<64x8xf32>
    %97 = vector.extract_strided_slice %3 {offsets = [0, 1, 0], sizes = [8, 8, 8], strides = [1, 1, 1]} : vector<9x9x8xbf16> to vector<8x8x8xbf16>
    %98 = vector.shape_cast %97 : vector<8x8x8xbf16> to vector<64x8xbf16>
    %99 = vector.extract_strided_slice %8 {offsets = [2, 0, 0], sizes = [1, 8, 8], strides = [1, 1, 1]} : vector<9x8x8xbf16> to vector<1x8x8xbf16>
    %100 = vector.shape_cast %99 : vector<1x8x8xbf16> to vector<8x8xbf16>
    %cst_56 = arith.constant dense<0.000000e+00> : vector<64x8xf32>
    %101 = tpu.matmul %98, %100, %cst_56 {dimension_numbers = #tpu.dot_dimension_numbers<[1], [0], [0], [1], [0, 0, 1, 1], [], []>} : vector<64x8xbf16>, vector<8x8xbf16>, vector<64x8xf32> -> vector<64x8xf32>
    %102 = arith.addf %96, %101 : vector<64x8xf32>
    %103 = vector.extract_strided_slice %7 {offsets = [0, 0, 0], sizes = [8, 8, 8], strides = [1, 1, 1]} : vector<9x9x8xbf16> to vector<8x8x8xbf16>
    %104 = vector.shape_cast %103 : vector<8x8x8xbf16> to vector<64x8xbf16>
    %105 = vector.extract_strided_slice %8 {offsets = [3, 0, 0], sizes = [1, 8, 8], strides = [1, 1, 1]} : vector<9x8x8xbf16> to vector<1x8x8xbf16>
    %106 = vector.shape_cast %105 : vector<1x8x8xbf16> to vector<8x8xbf16>
    %cst_57 = arith.constant dense<0.000000e+00> : vector<64x8xf32>
    %107 = tpu.matmul %104, %106, %cst_57 {dimension_numbers = #tpu.dot_dimension_numbers<[1], [0], [0], [1], [0, 0, 1, 1], [], []>} : vector<64x8xbf16>, vector<8x8xbf16>, vector<64x8xf32> -> vector<64x8xf32>
    %108 = arith.addf %102, %107 : vector<64x8xf32>
    %109 = vector.extract_strided_slice %5 {offsets = [0, 1, 0], sizes = [8, 8, 8], strides = [1, 1, 1]} : vector<9x9x8xbf16> to vector<8x8x8xbf16>
    %110 = vector.shape_cast %109 : vector<8x8x8xbf16> to vector<64x8xbf16>
    %111 = vector.extract_strided_slice %8 {offsets = [4, 0, 0], sizes = [1, 8, 8], strides = [1, 1, 1]} : vector<9x8x8xbf16> to vector<1x8x8xbf16>
    %112 = vector.shape_cast %111 : vector<1x8x8xbf16> to vector<8x8xbf16>
    %cst_58 = arith.constant dense<0.000000e+00> : vector<64x8xf32>
    %113 = tpu.matmul %110, %112, %cst_58 {dimension_numbers = #tpu.dot_dimension_numbers<[1], [0], [0], [1], [0, 0, 1, 1], [], []>} : vector<64x8xbf16>, vector<8x8xbf16>, vector<64x8xf32> -> vector<64x8xf32>
    %114 = arith.addf %108, %113 : vector<64x8xf32>
    %115 = vector.extract_strided_slice %7 {offsets = [0, 1, 0], sizes = [8, 8, 8], strides = [1, 1, 1]} : vector<9x9x8xbf16> to vector<8x8x8xbf16>
    %116 = vector.shape_cast %115 : vector<8x8x8xbf16> to vector<64x8xbf16>
    %117 = vector.extract_strided_slice %8 {offsets = [5, 0, 0], sizes = [1, 8, 8], strides = [1, 1, 1]} : vector<9x8x8xbf16> to vector<1x8x8xbf16>
    %118 = vector.shape_cast %117 : vector<1x8x8xbf16> to vector<8x8xbf16>
    %cst_59 = arith.constant dense<0.000000e+00> : vector<64x8xf32>
    %119 = tpu.matmul %116, %118, %cst_59 {dimension_numbers = #tpu.dot_dimension_numbers<[1], [0], [0], [1], [0, 0, 1, 1], [], []>} : vector<64x8xbf16>, vector<8x8xbf16>, vector<64x8xf32> -> vector<64x8xf32>
    %120 = arith.addf %114, %119 : vector<64x8xf32>
    %121 = vector.extract_strided_slice %3 {offsets = [1, 0, 0], sizes = [8, 8, 8], strides = [1, 1, 1]} : vector<9x9x8xbf16> to vector<8x8x8xbf16>
    %122 = vector.shape_cast %121 : vector<8x8x8xbf16> to vector<64x8xbf16>
    %123 = vector.extract_strided_slice %8 {offsets = [6, 0, 0], sizes = [1, 8, 8], strides = [1, 1, 1]} : vector<9x8x8xbf16> to vector<1x8x8xbf16>
    %124 = vector.shape_cast %123 : vector<1x8x8xbf16> to vector<8x8xbf16>
    %cst_60 = arith.constant dense<0.000000e+00> : vector<64x8xf32>
    %125 = tpu.matmul %122, %124, %cst_60 {dimension_numbers = #tpu.dot_dimension_numbers<[1], [0], [0], [1], [0, 0, 1, 1], [], []>} : vector<64x8xbf16>, vector<8x8xbf16>, vector<64x8xf32> -> vector<64x8xf32>
    %126 = arith.addf %120, %125 : vector<64x8xf32>
    %127 = vector.extract_strided_slice %1 {offsets = [1, 1, 0], sizes = [8, 8, 8], strides = [1, 1, 1]} : vector<9x9x8xbf16> to vector<8x8x8xbf16>
    %128 = vector.shape_cast %127 : vector<8x8x8xbf16> to vector<64x8xbf16>
    %129 = vector.extract_strided_slice %8 {offsets = [7, 0, 0], sizes = [1, 8, 8], strides = [1, 1, 1]} : vector<9x8x8xbf16> to vector<1x8x8xbf16>
    %130 = vector.shape_cast %129 : vector<1x8x8xbf16> to vector<8x8xbf16>
    %cst_61 = arith.constant dense<0.000000e+00> : vector<64x8xf32>
    %131 = tpu.matmul %128, %130, %cst_61 {dimension_numbers = #tpu.dot_dimension_numbers<[1], [0], [0], [1], [0, 0, 1, 1], [], []>} : vector<64x8xbf16>, vector<8x8xbf16>, vector<64x8xf32> -> vector<64x8xf32>
    %132 = arith.addf %126, %131 : vector<64x8xf32>
    %133 = vector.extract_strided_slice %3 {offsets = [1, 1, 0], sizes = [8, 8, 8], strides = [1, 1, 1]} : vector<9x9x8xbf16> to vector<8x8x8xbf16>
    %134 = vector.shape_cast %133 : vector<8x8x8xbf16> to vector<64x8xbf16>
    %135 = vector.extract_strided_slice %8 {offsets = [8, 0, 0], sizes = [1, 8, 8], strides = [1, 1, 1]} : vector<9x8x8xbf16> to vector<1x8x8xbf16>
    %136 = vector.shape_cast %135 : vector<1x8x8xbf16> to vector<8x8xbf16>
    %cst_62 = arith.constant dense<0.000000e+00> : vector<64x8xf32>
    %137 = tpu.matmul %134, %136, %cst_62 {dimension_numbers = #tpu.dot_dimension_numbers<[1], [0], [0], [1], [0, 0, 1, 1], [], []>} : vector<64x8xbf16>, vector<8x8xbf16>, vector<64x8xf32> -> vector<64x8xf32>
    %138 = arith.addf %132, %137 : vector<64x8xf32>
    %c0_63 = arith.constant 0 : index
    %c0_64 = arith.constant 0 : index
    %139 = vector.load %arg6[%c0_63, %c0_64] : memref<1x8xf32, #tpu.memory_space<vmem>>, vector<1x8xf32>
    %140 = vector.broadcast %139 : vector<1x8xf32> to vector<64x8xf32>
    %141 = arith.addf %138, %140 : vector<64x8xf32>
    %cst_65 = arith.constant 0.000000e+00 : f32
    %142 = vector.broadcast %cst_65 : f32 to vector<64x8xf32>
    %143 = arith.cmpf ogt, %141, %142 : vector<64x8xf32>
    %cst_66 = arith.constant 2.000000e-01 : f32
    %144 = vector.broadcast %cst_66 : f32 to vector<64x8xf32>
    %145 = arith.mulf %144, %141 : vector<64x8xf32>
    %146 = arith.select %143, %141, %145 : vector<64x8xi1>, vector<64x8xf32>
    %147 = arith.truncf %146 : vector<64x8xf32> to vector<64x8xbf16>
    %148 = vector.shape_cast %147 : vector<64x8xbf16> to vector<8x8x8xbf16>
    %c0_67 = arith.constant 0 : index
    %c1 = arith.constant 1 : index
    %c0_68 = arith.constant 0 : index
    %149 = vector.load %arg14[%c0_67, %c1, %c0_68] : memref<9x9x8xbf16, #tpu.memory_space<vmem>>, vector<8x8x8xbf16>
    tpu.vector_store %arg14[%c0_67, %c1, %c0_68], %148 {strides = array<i32>} : memref<9x9x8xbf16, #tpu.memory_space<vmem>>, vector<8x8x8xbf16>,
    %cst_69 = arith.constant 0.000000e+00 : f32
    %150 = vector.broadcast %cst_69 : f32 to vector<64x8xf32>
    %151 = vector.extract_strided_slice %5 {offsets = [0, 0, 0], sizes = [8, 8, 8], strides = [1, 1, 1]} : vector<9x9x8xbf16> to vector<8x8x8xbf16>
    %152 = vector.shape_cast %151 : vector<8x8x8xbf16> to vector<64x8xbf16>
    %153 = vector.extract_strided_slice %8 {offsets = [0, 0, 0], sizes = [1, 8, 8], strides = [1, 1, 1]} : vector<9x8x8xbf16> to vector<1x8x8xbf16>
    %154 = vector.shape_cast %153 : vector<1x8x8xbf16> to vector<8x8xbf16>
    %cst_70 = arith.constant dense<0.000000e+00> : vector<64x8xf32>
    %155 = tpu.matmul %152, %154, %cst_70 {dimension_numbers = #tpu.dot_dimension_numbers<[1], [0], [0], [1], [0, 0, 1, 1], [], []>} : vector<64x8xbf16>, vector<8x8xbf16>, vector<64x8xf32> -> vector<64x8xf32>
    %156 = arith.addf %150, %155 : vector<64x8xf32>
    %157 = vector.extract_strided_slice %7 {offsets = [0, 0, 0], sizes = [8, 8, 8], strides = [1, 1, 1]} : vector<9x9x8xbf16> to vector<8x8x8xbf16>
    %158 = vector.shape_cast %157 : vector<8x8x8xbf16> to vector<64x8xbf16>
    %159 = vector.extract_strided_slice %8 {offsets = [1, 0, 0], sizes = [1, 8, 8], strides = [1, 1, 1]} : vector<9x8x8xbf16> to vector<1x8x8xbf16>
    %160 = vector.shape_cast %159 : vector<1x8x8xbf16> to vector<8x8xbf16>
    %cst_71 = arith.constant dense<0.000000e+00> : vector<64x8xf32>
    %161 = tpu.matmul %158, %160, %cst_71 {dimension_numbers = #tpu.dot_dimension_numbers<[1], [0], [0], [1], [0, 0, 1, 1], [], []>} : vector<64x8xbf16>, vector<8x8xbf16>, vector<64x8xf32> -> vector<64x8xf32>
    %162 = arith.addf %156, %161 : vector<64x8xf32>
    %163 = vector.extract_strided_slice %5 {offsets = [0, 1, 0], sizes = [8, 8, 8], strides = [1, 1, 1]} : vector<9x9x8xbf16> to vector<8x8x8xbf16>
    %164 = vector.shape_cast %163 : vector<8x8x8xbf16> to vector<64x8xbf16>
    %165 = vector.extract_strided_slice %8 {offsets = [2, 0, 0], sizes = [1, 8, 8], strides = [1, 1, 1]} : vector<9x8x8xbf16> to vector<1x8x8xbf16>
    %166 = vector.shape_cast %165 : vector<1x8x8xbf16> to vector<8x8xbf16>
    %cst_72 = arith.constant dense<0.000000e+00> : vector<64x8xf32>
    %167 = tpu.matmul %164, %166, %cst_72 {dimension_numbers = #tpu.dot_dimension_numbers<[1], [0], [0], [1], [0, 0, 1, 1], [], []>} : vector<64x8xbf16>, vector<8x8xbf16>, vector<64x8xf32> -> vector<64x8xf32>
    %168 = arith.addf %162, %167 : vector<64x8xf32>
    %169 = vector.extract_strided_slice %1 {offsets = [1, 0, 0], sizes = [8, 8, 8], strides = [1, 1, 1]} : vector<9x9x8xbf16> to vector<8x8x8xbf16>
    %170 = vector.shape_cast %169 : vector<8x8x8xbf16> to vector<64x8xbf16>
    %171 = vector.extract_strided_slice %8 {offsets = [3, 0, 0], sizes = [1, 8, 8], strides = [1, 1, 1]} : vector<9x8x8xbf16> to vector<1x8x8xbf16>
    %172 = vector.shape_cast %171 : vector<1x8x8xbf16> to vector<8x8xbf16>
    %cst_73 = arith.constant dense<0.000000e+00> : vector<64x8xf32>
    %173 = tpu.matmul %170, %172, %cst_73 {dimension_numbers = #tpu.dot_dimension_numbers<[1], [0], [0], [1], [0, 0, 1, 1], [], []>} : vector<64x8xbf16>, vector<8x8xbf16>, vector<64x8xf32> -> vector<64x8xf32>
    %174 = arith.addf %168, %173 : vector<64x8xf32>
    %175 = vector.extract_strided_slice %3 {offsets = [1, 0, 0], sizes = [8, 8, 8], strides = [1, 1, 1]} : vector<9x9x8xbf16> to vector<8x8x8xbf16>
    %176 = vector.shape_cast %175 : vector<8x8x8xbf16> to vector<64x8xbf16>
    %177 = vector.extract_strided_slice %8 {offsets = [4, 0, 0], sizes = [1, 8, 8], strides = [1, 1, 1]} : vector<9x8x8xbf16> to vector<1x8x8xbf16>
    %178 = vector.shape_cast %177 : vector<1x8x8xbf16> to vector<8x8xbf16>
    %cst_74 = arith.constant dense<0.000000e+00> : vector<64x8xf32>
    %179 = tpu.matmul %176, %178, %cst_74 {dimension_numbers = #tpu.dot_dimension_numbers<[1], [0], [0], [1], [0, 0, 1, 1], [], []>} : vector<64x8xbf16>, vector<8x8xbf16>, vector<64x8xf32> -> vector<64x8xf32>
    %180 = arith.addf %174, %179 : vector<64x8xf32>
    %181 = vector.extract_strided_slice %1 {offsets = [1, 1, 0], sizes = [8, 8, 8], strides = [1, 1, 1]} : vector<9x9x8xbf16> to vector<8x8x8xbf16>
    %182 = vector.shape_cast %181 : vector<8x8x8xbf16> to vector<64x8xbf16>
    %183 = vector.extract_strided_slice %8 {offsets = [5, 0, 0], sizes = [1, 8, 8], strides = [1, 1, 1]} : vector<9x8x8xbf16> to vector<1x8x8xbf16>
    %184 = vector.shape_cast %183 : vector<1x8x8xbf16> to vector<8x8xbf16>
    %cst_75 = arith.constant dense<0.000000e+00> : vector<64x8xf32>
    %185 = tpu.matmul %182, %184, %cst_75 {dimension_numbers = #tpu.dot_dimension_numbers<[1], [0], [0], [1], [0, 0, 1, 1], [], []>} : vector<64x8xbf16>, vector<8x8xbf16>, vector<64x8xf32> -> vector<64x8xf32>
    %186 = arith.addf %180, %185 : vector<64x8xf32>
    %187 = vector.extract_strided_slice %5 {offsets = [1, 0, 0], sizes = [8, 8, 8], strides = [1, 1, 1]} : vector<9x9x8xbf16> to vector<8x8x8xbf16>
    %188 = vector.shape_cast %187 : vector<8x8x8xbf16> to vector<64x8xbf16>
    %189 = vector.extract_strided_slice %8 {offsets = [6, 0, 0], sizes = [1, 8, 8], strides = [1, 1, 1]} : vector<9x8x8xbf16> to vector<1x8x8xbf16>
    %190 = vector.shape_cast %189 : vector<1x8x8xbf16> to vector<8x8xbf16>
    %cst_76 = arith.constant dense<0.000000e+00> : vector<64x8xf32>
    %191 = tpu.matmul %188, %190, %cst_76 {dimension_numbers = #tpu.dot_dimension_numbers<[1], [0], [0], [1], [0, 0, 1, 1], [], []>} : vector<64x8xbf16>, vector<8x8xbf16>, vector<64x8xf32> -> vector<64x8xf32>
    %192 = arith.addf %186, %191 : vector<64x8xf32>
    %193 = vector.extract_strided_slice %7 {offsets = [1, 0, 0], sizes = [8, 8, 8], strides = [1, 1, 1]} : vector<9x9x8xbf16> to vector<8x8x8xbf16>
    %194 = vector.shape_cast %193 : vector<8x8x8xbf16> to vector<64x8xbf16>
    %195 = vector.extract_strided_slice %8 {offsets = [7, 0, 0], sizes = [1, 8, 8], strides = [1, 1, 1]} : vector<9x8x8xbf16> to vector<1x8x8xbf16>
    %196 = vector.shape_cast %195 : vector<1x8x8xbf16> to vector<8x8xbf16>
    %cst_77 = arith.constant dense<0.000000e+00> : vector<64x8xf32>
    %197 = tpu.matmul %194, %196, %cst_77 {dimension_numbers = #tpu.dot_dimension_numbers<[1], [0], [0], [1], [0, 0, 1, 1], [], []>} : vector<64x8xbf16>, vector<8x8xbf16>, vector<64x8xf32> -> vector<64x8xf32>
    %198 = arith.addf %192, %197 : vector<64x8xf32>
    %199 = vector.extract_strided_slice %5 {offsets = [1, 1, 0], sizes = [8, 8, 8], strides = [1, 1, 1]} : vector<9x9x8xbf16> to vector<8x8x8xbf16>
    %200 = vector.shape_cast %199 : vector<8x8x8xbf16> to vector<64x8xbf16>
    %201 = vector.extract_strided_slice %8 {offsets = [8, 0, 0], sizes = [1, 8, 8], strides = [1, 1, 1]} : vector<9x8x8xbf16> to vector<1x8x8xbf16>
    %202 = vector.shape_cast %201 : vector<1x8x8xbf16> to vector<8x8xbf16>
    %cst_78 = arith.constant dense<0.000000e+00> : vector<64x8xf32>
    %203 = tpu.matmul %200, %202, %cst_78 {dimension_numbers = #tpu.dot_dimension_numbers<[1], [0], [0], [1], [0, 0, 1, 1], [], []>} : vector<64x8xbf16>, vector<8x8xbf16>, vector<64x8xf32> -> vector<64x8xf32>
    %204 = arith.addf %198, %203 : vector<64x8xf32>
    %c0_79 = arith.constant 0 : index
    %c0_80 = arith.constant 0 : index
    %205 = vector.load %arg6[%c0_79, %c0_80] : memref<1x8xf32, #tpu.memory_space<vmem>>, vector<1x8xf32>
    %206 = vector.broadcast %205 : vector<1x8xf32> to vector<64x8xf32>
    %207 = arith.addf %204, %206 : vector<64x8xf32>
    %cst_81 = arith.constant 0.000000e+00 : f32
    %208 = vector.broadcast %cst_81 : f32 to vector<64x8xf32>
    %209 = arith.cmpf ogt, %207, %208 : vector<64x8xf32>
    %cst_82 = arith.constant 2.000000e-01 : f32
    %210 = vector.broadcast %cst_82 : f32 to vector<64x8xf32>
    %211 = arith.mulf %210, %207 : vector<64x8xf32>
    %212 = arith.select %209, %207, %211 : vector<64x8xi1>, vector<64x8xf32>
    %213 = arith.truncf %212 : vector<64x8xf32> to vector<64x8xbf16>
    %214 = vector.shape_cast %213 : vector<64x8xbf16> to vector<8x8x8xbf16>
    %c1_83 = arith.constant 1 : index
    %c0_84 = arith.constant 0 : index
    %c0_85 = arith.constant 0 : index
    %215 = vector.load %arg13[%c1_83, %c0_84, %c0_85] : memref<9x9x8xbf16, #tpu.memory_space<vmem>>, vector<8x8x8xbf16>
    tpu.vector_store %arg13[%c1_83, %c0_84, %c0_85], %214 {strides = array<i32>} : memref<9x9x8xbf16, #tpu.memory_space<vmem>>, vector<8x8x8xbf16>,
    %cst_86 = arith.constant 0.000000e+00 : f32
    %216 = vector.broadcast %cst_86 : f32 to vector<64x8xf32>
    %217 = vector.extract_strided_slice %7 {offsets = [0, 0, 0], sizes = [8, 8, 8], strides = [1, 1, 1]} : vector<9x9x8xbf16> to vector<8x8x8xbf16>
    %218 = vector.shape_cast %217 : vector<8x8x8xbf16> to vector<64x8xbf16>
    %219 = vector.extract_strided_slice %8 {offsets = [0, 0, 0], sizes = [1, 8, 8], strides = [1, 1, 1]} : vector<9x8x8xbf16> to vector<1x8x8xbf16>
    %220 = vector.shape_cast %219 : vector<1x8x8xbf16> to vector<8x8xbf16>
    %cst_87 = arith.constant dense<0.000000e+00> : vector<64x8xf32>
    %221 = tpu.matmul %218, %220, %cst_87 {dimension_numbers = #tpu.dot_dimension_numbers<[1], [0], [0], [1], [0, 0, 1, 1], [], []>} : vector<64x8xbf16>, vector<8x8xbf16>, vector<64x8xf32> -> vector<64x8xf32>
    %222 = arith.addf %216, %221 : vector<64x8xf32>
    %223 = vector.extract_strided_slice %5 {offsets = [0, 1, 0], sizes = [8, 8, 8], strides = [1, 1, 1]} : vector<9x9x8xbf16> to vector<8x8x8xbf16>
    %224 = vector.shape_cast %223 : vector<8x8x8xbf16> to vector<64x8xbf16>
    %225 = vector.extract_strided_slice %8 {offsets = [1, 0, 0], sizes = [1, 8, 8], strides = [1, 1, 1]} : vector<9x8x8xbf16> to vector<1x8x8xbf16>
    %226 = vector.shape_cast %225 : vector<1x8x8xbf16> to vector<8x8xbf16>
    %cst_88 = arith.constant dense<0.000000e+00> : vector<64x8xf32>
    %227 = tpu.matmul %224, %226, %cst_88 {dimension_numbers = #tpu.dot_dimension_numbers<[1], [0], [0], [1], [0, 0, 1, 1], [], []>} : vector<64x8xbf16>, vector<8x8xbf16>, vector<64x8xf32> -> vector<64x8xf32>
    %228 = arith.addf %222, %227 : vector<64x8xf32>
    %229 = vector.extract_strided_slice %7 {offsets = [0, 1, 0], sizes = [8, 8, 8], strides = [1, 1, 1]} : vector<9x9x8xbf16> to vector<8x8x8xbf16>
    %230 = vector.shape_cast %229 : vector<8x8x8xbf16> to vector<64x8xbf16>
    %231 = vector.extract_strided_slice %8 {offsets = [2, 0, 0], sizes = [1, 8, 8], strides = [1, 1, 1]} : vector<9x8x8xbf16> to vector<1x8x8xbf16>
    %232 = vector.shape_cast %231 : vector<1x8x8xbf16> to vector<8x8xbf16>
    %cst_89 = arith.constant dense<0.000000e+00> : vector<64x8xf32>
    %233 = tpu.matmul %230, %232, %cst_89 {dimension_numbers = #tpu.dot_dimension_numbers<[1], [0], [0], [1], [0, 0, 1, 1], [], []>} : vector<64x8xbf16>, vector<8x8xbf16>, vector<64x8xf32> -> vector<64x8xf32>
    %234 = arith.addf %228, %233 : vector<64x8xf32>
    %235 = vector.extract_strided_slice %3 {offsets = [1, 0, 0], sizes = [8, 8, 8], strides = [1, 1, 1]} : vector<9x9x8xbf16> to vector<8x8x8xbf16>
    %236 = vector.shape_cast %235 : vector<8x8x8xbf16> to vector<64x8xbf16>
    %237 = vector.extract_strided_slice %8 {offsets = [3, 0, 0], sizes = [1, 8, 8], strides = [1, 1, 1]} : vector<9x8x8xbf16> to vector<1x8x8xbf16>
    %238 = vector.shape_cast %237 : vector<1x8x8xbf16> to vector<8x8xbf16>
    %cst_90 = arith.constant dense<0.000000e+00> : vector<64x8xf32>
    %239 = tpu.matmul %236, %238, %cst_90 {dimension_numbers = #tpu.dot_dimension_numbers<[1], [0], [0], [1], [0, 0, 1, 1], [], []>} : vector<64x8xbf16>, vector<8x8xbf16>, vector<64x8xf32> -> vector<64x8xf32>
    %240 = arith.addf %234, %239 : vector<64x8xf32>
    %241 = vector.extract_strided_slice %1 {offsets = [1, 1, 0], sizes = [8, 8, 8], strides = [1, 1, 1]} : vector<9x9x8xbf16> to vector<8x8x8xbf16>
    %242 = vector.shape_cast %241 : vector<8x8x8xbf16> to vector<64x8xbf16>
    %243 = vector.extract_strided_slice %8 {offsets = [4, 0, 0], sizes = [1, 8, 8], strides = [1, 1, 1]} : vector<9x8x8xbf16> to vector<1x8x8xbf16>
    %244 = vector.shape_cast %243 : vector<1x8x8xbf16> to vector<8x8xbf16>
    %cst_91 = arith.constant dense<0.000000e+00> : vector<64x8xf32>
    %245 = tpu.matmul %242, %244, %cst_91 {dimension_numbers = #tpu.dot_dimension_numbers<[1], [0], [0], [1], [0, 0, 1, 1], [], []>} : vector<64x8xbf16>, vector<8x8xbf16>, vector<64x8xf32> -> vector<64x8xf32>
    %246 = arith.addf %240, %245 : vector<64x8xf32>
    %247 = vector.extract_strided_slice %3 {offsets = [1, 1, 0], sizes = [8, 8, 8], strides = [1, 1, 1]} : vector<9x9x8xbf16> to vector<8x8x8xbf16>
    %248 = vector.shape_cast %247 : vector<8x8x8xbf16> to vector<64x8xbf16>
    %249 = vector.extract_strided_slice %8 {offsets = [5, 0, 0], sizes = [1, 8, 8], strides = [1, 1, 1]} : vector<9x8x8xbf16> to vector<1x8x8xbf16>
    %250 = vector.shape_cast %249 : vector<1x8x8xbf16> to vector<8x8xbf16>
    %cst_92 = arith.constant dense<0.000000e+00> : vector<64x8xf32>
    %251 = tpu.matmul %248, %250, %cst_92 {dimension_numbers = #tpu.dot_dimension_numbers<[1], [0], [0], [1], [0, 0, 1, 1], [], []>} : vector<64x8xbf16>, vector<8x8xbf16>, vector<64x8xf32> -> vector<64x8xf32>
    %252 = arith.addf %246, %251 : vector<64x8xf32>
    %253 = vector.extract_strided_slice %7 {offsets = [1, 0, 0], sizes = [8, 8, 8], strides = [1, 1, 1]} : vector<9x9x8xbf16> to vector<8x8x8xbf16>
    %254 = vector.shape_cast %253 : vector<8x8x8xbf16> to vector<64x8xbf16>
    %255 = vector.extract_strided_slice %8 {offsets = [6, 0, 0], sizes = [1, 8, 8], strides = [1, 1, 1]} : vector<9x8x8xbf16> to vector<1x8x8xbf16>
    %256 = vector.shape_cast %255 : vector<1x8x8xbf16> to vector<8x8xbf16>
    %cst_93 = arith.constant dense<0.000000e+00> : vector<64x8xf32>
    %257 = tpu.matmul %254, %256, %cst_93 {dimension_numbers = #tpu.dot_dimension_numbers<[1], [0], [0], [1], [0, 0, 1, 1], [], []>} : vector<64x8xbf16>, vector<8x8xbf16>, vector<64x8xf32> -> vector<64x8xf32>
    %258 = arith.addf %252, %257 : vector<64x8xf32>
    %259 = vector.extract_strided_slice %5 {offsets = [1, 1, 0], sizes = [8, 8, 8], strides = [1, 1, 1]} : vector<9x9x8xbf16> to vector<8x8x8xbf16>
    %260 = vector.shape_cast %259 : vector<8x8x8xbf16> to vector<64x8xbf16>
    %261 = vector.extract_strided_slice %8 {offsets = [7, 0, 0], sizes = [1, 8, 8], strides = [1, 1, 1]} : vector<9x8x8xbf16> to vector<1x8x8xbf16>
    %262 = vector.shape_cast %261 : vector<1x8x8xbf16> to vector<8x8xbf16>
    %cst_94 = arith.constant dense<0.000000e+00> : vector<64x8xf32>
    %263 = tpu.matmul %260, %262, %cst_94 {dimension_numbers = #tpu.dot_dimension_numbers<[1], [0], [0], [1], [0, 0, 1, 1], [], []>} : vector<64x8xbf16>, vector<8x8xbf16>, vector<64x8xf32> -> vector<64x8xf32>
    %264 = arith.addf %258, %263 : vector<64x8xf32>
    %265 = vector.extract_strided_slice %7 {offsets = [1, 1, 0], sizes = [8, 8, 8], strides = [1, 1, 1]} : vector<9x9x8xbf16> to vector<8x8x8xbf16>
    %266 = vector.shape_cast %265 : vector<8x8x8xbf16> to vector<64x8xbf16>
    %267 = vector.extract_strided_slice %8 {offsets = [8, 0, 0], sizes = [1, 8, 8], strides = [1, 1, 1]} : vector<9x8x8xbf16> to vector<1x8x8xbf16>
    %268 = vector.shape_cast %267 : vector<1x8x8xbf16> to vector<8x8xbf16>
    %cst_95 = arith.constant dense<0.000000e+00> : vector<64x8xf32>
    %269 = tpu.matmul %266, %268, %cst_95 {dimension_numbers = #tpu.dot_dimension_numbers<[1], [0], [0], [1], [0, 0, 1, 1], [], []>} : vector<64x8xbf16>, vector<8x8xbf16>, vector<64x8xf32> -> vector<64x8xf32>
    %270 = arith.addf %264, %269 : vector<64x8xf32>
    %c0_96 = arith.constant 0 : index
    %c0_97 = arith.constant 0 : index
    %271 = vector.load %arg6[%c0_96, %c0_97] : memref<1x8xf32, #tpu.memory_space<vmem>>, vector<1x8xf32>
    %272 = vector.broadcast %271 : vector<1x8xf32> to vector<64x8xf32>
    %273 = arith.addf %270, %272 : vector<64x8xf32>
    %cst_98 = arith.constant 0.000000e+00 : f32
    %274 = vector.broadcast %cst_98 : f32 to vector<64x8xf32>
    %275 = arith.cmpf ogt, %273, %274 : vector<64x8xf32>
    %cst_99 = arith.constant 2.000000e-01 : f32
    %276 = vector.broadcast %cst_99 : f32 to vector<64x8xf32>
    %277 = arith.mulf %276, %273 : vector<64x8xf32>
    %278 = arith.select %275, %273, %277 : vector<64x8xi1>, vector<64x8xf32>
    %279 = arith.truncf %278 : vector<64x8xf32> to vector<64x8xbf16>
    %280 = vector.shape_cast %279 : vector<64x8xbf16> to vector<8x8x8xbf16>
    %c1_100 = arith.constant 1 : index
    %c1_101 = arith.constant 1 : index
    %c0_102 = arith.constant 0 : index
    %281 = vector.load %arg12[%c1_100, %c1_101, %c0_102] : memref<9x9x8xbf16, #tpu.memory_space<vmem>>, vector<8x8x8xbf16>
    tpu.vector_store %arg12[%c1_100, %c1_101, %c0_102], %280 {strides = array<i32>} : memref<9x9x8xbf16, #tpu.memory_space<vmem>>, vector<8x8x8xbf16>,
    %cst_103 = arith.constant 0.000000e+00 : f32
    %282 = vector.broadcast %cst_103 : f32 to vector<64x128xf32>
    %c0_104 = arith.constant 0 : index
    %c0_105 = arith.constant 0 : index
    %c0_106 = arith.constant 0 : index
    %283 = vector.load %arg12[%c0_104, %c0_105, %c0_106] : memref<9x9x8xbf16, #tpu.memory_space<vmem>>, vector<8x8x8xbf16>
    %284 = vector.shape_cast %283 : vector<8x8x8xbf16> to vector<64x8xbf16>
    %285 = vector.extract_strided_slice %9 {offsets = [0, 0, 0], sizes = [1, 8, 128], strides = [1, 1, 1]} : vector<9x8x128xbf16> to vector<1x8x128xbf16>
    %286 = vector.shape_cast %285 : vector<1x8x128xbf16> to vector<8x128xbf16>
    %cst_107 = arith.constant dense<0.000000e+00> : vector<64x128xf32>
    %287 = tpu.matmul %284, %286, %cst_107 {dimension_numbers = #tpu.dot_dimension_numbers<[1], [0], [0], [1], [0, 0, 1, 1], [], []>} : vector<64x8xbf16>, vector<8x128xbf16>, vector<64x128xf32> -> vector<64x128xf32>
    %288 = arith.addf %282, %287 : vector<64x128xf32>
    %c0_108 = arith.constant 0 : index
    %c0_109 = arith.constant 0 : index
    %c0_110 = arith.constant 0 : index
    %289 = vector.load %arg13[%c0_108, %c0_109, %c0_110] : memref<9x9x8xbf16, #tpu.memory_space<vmem>>, vector<8x8x8xbf16>
    %290 = vector.shape_cast %289 : vector<8x8x8xbf16> to vector<64x8xbf16>
    %291 = vector.extract_strided_slice %9 {offsets = [1, 0, 0], sizes = [1, 8, 128], strides = [1, 1, 1]} : vector<9x8x128xbf16> to vector<1x8x128xbf16>
    %292 = vector.shape_cast %291 : vector<1x8x128xbf16> to vector<8x128xbf16>
    %cst_111 = arith.constant dense<0.000000e+00> : vector<64x128xf32>
    %293 = tpu.matmul %290, %292, %cst_111 {dimension_numbers = #tpu.dot_dimension_numbers<[1], [0], [0], [1], [0, 0, 1, 1], [], []>} : vector<64x8xbf16>, vector<8x128xbf16>, vector<64x128xf32> -> vector<64x128xf32>
    %294 = arith.addf %288, %293 : vector<64x128xf32>
    %c0_112 = arith.constant 0 : index
    %c1_113 = arith.constant 1 : index
    %c0_114 = arith.constant 0 : index
    %295 = vector.load %arg12[%c0_112, %c1_113, %c0_114] : memref<9x9x8xbf16, #tpu.memory_space<vmem>>, vector<8x8x8xbf16>
    %296 = vector.shape_cast %295 : vector<8x8x8xbf16> to vector<64x8xbf16>
    %297 = vector.extract_strided_slice %9 {offsets = [2, 0, 0], sizes = [1, 8, 128], strides = [1, 1, 1]} : vector<9x8x128xbf16> to vector<1x8x128xbf16>
    %298 = vector.shape_cast %297 : vector<1x8x128xbf16> to vector<8x128xbf16>
    %cst_115 = arith.constant dense<0.000000e+00> : vector<64x128xf32>
    %299 = tpu.matmul %296, %298, %cst_115 {dimension_numbers = #tpu.dot_dimension_numbers<[1], [0], [0], [1], [0, 0, 1, 1], [], []>} : vector<64x8xbf16>, vector<8x128xbf16>, vector<64x128xf32> -> vector<64x128xf32>
    %300 = arith.addf %294, %299 : vector<64x128xf32>
    %c0_116 = arith.constant 0 : index
    %c0_117 = arith.constant 0 : index
    %c0_118 = arith.constant 0 : index
    %301 = vector.load %arg14[%c0_116, %c0_117, %c0_118] : memref<9x9x8xbf16, #tpu.memory_space<vmem>>, vector<8x8x8xbf16>
    %302 = vector.shape_cast %301 : vector<8x8x8xbf16> to vector<64x8xbf16>
    %303 = vector.extract_strided_slice %9 {offsets = [3, 0, 0], sizes = [1, 8, 128], strides = [1, 1, 1]} : vector<9x8x128xbf16> to vector<1x8x128xbf16>
    %304 = vector.shape_cast %303 : vector<1x8x128xbf16> to vector<8x128xbf16>
    %cst_119 = arith.constant dense<0.000000e+00> : vector<64x128xf32>
    %305 = tpu.matmul %302, %304, %cst_119 {dimension_numbers = #tpu.dot_dimension_numbers<[1], [0], [0], [1], [0, 0, 1, 1], [], []>} : vector<64x8xbf16>, vector<8x128xbf16>, vector<64x128xf32> -> vector<64x128xf32>
    %306 = arith.addf %300, %305 : vector<64x128xf32>
    %c0_120 = arith.constant 0 : index
    %c0_121 = arith.constant 0 : index
    %c0_122 = arith.constant 0 : index
    %307 = vector.load %arg15[%c0_120, %c0_121, %c0_122] : memref<9x9x8xbf16, #tpu.memory_space<vmem>>, vector<8x8x8xbf16>
    %308 = vector.shape_cast %307 : vector<8x8x8xbf16> to vector<64x8xbf16>
    %309 = vector.extract_strided_slice %9 {offsets = [4, 0, 0], sizes = [1, 8, 128], strides = [1, 1, 1]} : vector<9x8x128xbf16> to vector<1x8x128xbf16>
    %310 = vector.shape_cast %309 : vector<1x8x128xbf16> to vector<8x128xbf16>
    %cst_123 = arith.constant dense<0.000000e+00> : vector<64x128xf32>
    %311 = tpu.matmul %308, %310, %cst_123 {dimension_numbers = #tpu.dot_dimension_numbers<[1], [0], [0], [1], [0, 0, 1, 1], [], []>} : vector<64x8xbf16>, vector<8x128xbf16>, vector<64x128xf32> -> vector<64x128xf32>
    %312 = arith.addf %306, %311 : vector<64x128xf32>
    %c0_124 = arith.constant 0 : index
    %c1_125 = arith.constant 1 : index
    %c0_126 = arith.constant 0 : index
    %313 = vector.load %arg14[%c0_124, %c1_125, %c0_126] : memref<9x9x8xbf16, #tpu.memory_space<vmem>>, vector<8x8x8xbf16>
    %314 = vector.shape_cast %313 : vector<8x8x8xbf16> to vector<64x8xbf16>
    %315 = vector.extract_strided_slice %9 {offsets = [5, 0, 0], sizes = [1, 8, 128], strides = [1, 1, 1]} : vector<9x8x128xbf16> to vector<1x8x128xbf16>
    %316 = vector.shape_cast %315 : vector<1x8x128xbf16> to vector<8x128xbf16>
    %cst_127 = arith.constant dense<0.000000e+00> : vector<64x128xf32>
    %317 = tpu.matmul %314, %316, %cst_127 {dimension_numbers = #tpu.dot_dimension_numbers<[1], [0], [0], [1], [0, 0, 1, 1], [], []>} : vector<64x8xbf16>, vector<8x128xbf16>, vector<64x128xf32> -> vector<64x128xf32>
    %318 = arith.addf %312, %317 : vector<64x128xf32>
    %c1_128 = arith.constant 1 : index
    %c0_129 = arith.constant 0 : index
    %c0_130 = arith.constant 0 : index
    %319 = vector.load %arg12[%c1_128, %c0_129, %c0_130] : memref<9x9x8xbf16, #tpu.memory_space<vmem>>, vector<8x8x8xbf16>
    %320 = vector.shape_cast %319 : vector<8x8x8xbf16> to vector<64x8xbf16>
    %321 = vector.extract_strided_slice %9 {offsets = [6, 0, 0], sizes = [1, 8, 128], strides = [1, 1, 1]} : vector<9x8x128xbf16> to vector<1x8x128xbf16>
    %322 = vector.shape_cast %321 : vector<1x8x128xbf16> to vector<8x128xbf16>
    %cst_131 = arith.constant dense<0.000000e+00> : vector<64x128xf32>
    %323 = tpu.matmul %320, %322, %cst_131 {dimension_numbers = #tpu.dot_dimension_numbers<[1], [0], [0], [1], [0, 0, 1, 1], [], []>} : vector<64x8xbf16>, vector<8x128xbf16>, vector<64x128xf32> -> vector<64x128xf32>
    %324 = arith.addf %318, %323 : vector<64x128xf32>
    %c1_132 = arith.constant 1 : index
    %c0_133 = arith.constant 0 : index
    %c0_134 = arith.constant 0 : index
    %325 = vector.load %arg13[%c1_132, %c0_133, %c0_134] : memref<9x9x8xbf16, #tpu.memory_space<vmem>>, vector<8x8x8xbf16>
    %326 = vector.shape_cast %325 : vector<8x8x8xbf16> to vector<64x8xbf16>
    %327 = vector.extract_strided_slice %9 {offsets = [7, 0, 0], sizes = [1, 8, 128], strides = [1, 1, 1]} : vector<9x8x128xbf16> to vector<1x8x128xbf16>
    %328 = vector.shape_cast %327 : vector<1x8x128xbf16> to vector<8x128xbf16>
    %cst_135 = arith.constant dense<0.000000e+00> : vector<64x128xf32>
    %329 = tpu.matmul %326, %328, %cst_135 {dimension_numbers = #tpu.dot_dimension_numbers<[1], [0], [0], [1], [0, 0, 1, 1], [], []>} : vector<64x8xbf16>, vector<8x128xbf16>, vector<64x128xf32> -> vector<64x128xf32>
    %330 = arith.addf %324, %329 : vector<64x128xf32>
    %c1_136 = arith.constant 1 : index
    %c1_137 = arith.constant 1 : index
    %c0_138 = arith.constant 0 : index
    %331 = vector.load %arg12[%c1_136, %c1_137, %c0_138] : memref<9x9x8xbf16, #tpu.memory_space<vmem>>, vector<8x8x8xbf16>
    %332 = vector.shape_cast %331 : vector<8x8x8xbf16> to vector<64x8xbf16>
    %333 = vector.extract_strided_slice %9 {offsets = [8, 0, 0], sizes = [1, 8, 128], strides = [1, 1, 1]} : vector<9x8x128xbf16> to vector<1x8x128xbf16>
    %334 = vector.shape_cast %333 : vector<1x8x128xbf16> to vector<8x128xbf16>
    %cst_139 = arith.constant dense<0.000000e+00> : vector<64x128xf32>
    %335 = tpu.matmul %332, %334, %cst_139 {dimension_numbers = #tpu.dot_dimension_numbers<[1], [0], [0], [1], [0, 0, 1, 1], [], []>} : vector<64x8xbf16>, vector<8x128xbf16>, vector<64x128xf32> -> vector<64x128xf32>
    %336 = arith.addf %330, %335 : vector<64x128xf32>
    %c0_140 = arith.constant 0 : index
    %c0_141 = arith.constant 0 : index
    %337 = vector.load %arg8[%c0_140, %c0_141] : memref<1x128xf32, #tpu.memory_space<vmem>>, vector<1x128xf32>
    %338 = vector.broadcast %337 : vector<1x128xf32> to vector<64x128xf32>
    %339 = arith.addf %336, %338 : vector<64x128xf32>
    %cst_142 = arith.constant 0.000000e+00 : f32
    %340 = vector.broadcast %cst_142 : f32 to vector<64x128xf32>
    %341 = arith.cmpf ogt, %339, %340 : vector<64x128xf32>
    %cst_143 = arith.constant 2.000000e-01 : f32
    %342 = vector.broadcast %cst_143 : f32 to vector<64x128xf32>
    %343 = arith.mulf %342, %339 : vector<64x128xf32>
    %344 = arith.select %341, %339, %343 : vector<64x128xi1>, vector<64x128xf32>
    %345 = vector.extract_strided_slice %7 {offsets = [0, 0, 0], sizes = [8, 8, 8], strides = [1, 1, 1]} : vector<9x9x8xbf16> to vector<8x8x8xbf16>
    %346 = vector.shape_cast %345 : vector<8x8x8xbf16> to vector<64x8xbf16>
    %c0_144 = arith.constant 0 : index
    %c0_145 = arith.constant 0 : index
    %347 = vector.load %arg9[%c0_144, %c0_145] : memref<8x128xbf16, #tpu.memory_space<vmem>>, vector<8x128xbf16>
    %cst_146 = arith.constant dense<0.000000e+00> : vector<64x128xf32>
    %348 = tpu.matmul %346, %347, %cst_146 {dimension_numbers = #tpu.dot_dimension_numbers<[1], [0], [0], [1], [0, 0, 1, 1], [], []>} : vector<64x8xbf16>, vector<8x128xbf16>, vector<64x128xf32> -> vector<64x128xf32>
    %c0_147 = arith.constant 0 : index
    %c0_148 = arith.constant 0 : index
    %349 = vector.load %arg10[%c0_147, %c0_148] : memref<1x128xf32, #tpu.memory_space<vmem>>, vector<1x128xf32>
    %350 = vector.broadcast %349 : vector<1x128xf32> to vector<64x128xf32>
    %351 = arith.addf %348, %350 : vector<64x128xf32>
    %cst_149 = arith.constant 0.000000e+00 : f32
    %352 = vector.broadcast %cst_149 : f32 to vector<64x128xf32>
    %353 = arith.cmpf ogt, %351, %352 : vector<64x128xf32>
    %cst_150 = arith.constant 2.000000e-01 : f32
    %354 = vector.broadcast %cst_150 : f32 to vector<64x128xf32>
    %355 = arith.mulf %354, %351 : vector<64x128xf32>
    %356 = arith.select %353, %351, %355 : vector<64x128xi1>, vector<64x128xf32>
    %357 = arith.addf %344, %356 : vector<64x128xf32>
    %cst_151 = arith.constant 0.707106769 : f32
    %358 = vector.broadcast %cst_151 : f32 to vector<64x128xf32>
    %359 = arith.mulf %357, %358 : vector<64x128xf32>
    %360 = vector.shape_cast %359 : vector<64x128xf32> to vector<8x8x128xf32>
    %c0_152 = arith.constant 0 : index
    %c0_153 = arith.constant 0 : index
    %c0_154 = arith.constant 0 : index
    %c0_155 = arith.constant 0 : index
    %361 = vector.load %arg11[%c0_152, %c0_153, %c0_154, %c0_155] : memref<1x8x8x128xf32, #tpu.memory_space<vmem>>, vector<1x8x8x128xf32>
    %362 = vector.shape_cast %361 : vector<1x8x8x128xf32> to vector<8x8x128xf32>
    %363 = vector.shape_cast %360 : vector<8x8x128xf32> to vector<1x8x8x128xf32>
    tpu.vector_store %arg11[%c0_152, %c0_153, %c0_154, %c0_155], %363 {strides = array<i32>} : memref<1x8x8x128xf32, #tpu.memory_space<vmem>>, vector<1x8x8x128xf32>,
    return
  }
  func.func @transform_0(%arg0: i32) -> (i32, i32, i32, i32) {
    %c0_i32 = arith.constant 0 : i32
    %c0_i32_0 = arith.constant 0 : i32
    %c0_i32_1 = arith.constant 0 : i32
    %c0_i32_2 = arith.constant 0 : i32
    return %arg0, %c0_i32, %c0_i32_0, %c0_i32_1 : i32, i32, i32, i32
  }
  func.func @transform_1(%arg0: i32) -> (i32, i32, i32, i32) {
    %c0_i32 = arith.constant 0 : i32
    %c0_i32_0 = arith.constant 0 : i32
    %c0_i32_1 = arith.constant 0 : i32
    %c0_i32_2 = arith.constant 0 : i32
    return %arg0, %c0_i32, %c0_i32_0, %c0_i32_1 : i32, i32, i32, i32
  }
  func.func @transform_2(%arg0: i32) -> (i32, i32, i32, i32) {
    %c0_i32 = arith.constant 0 : i32
    %c0_i32_0 = arith.constant 0 : i32
    %c0_i32_1 = arith.constant 0 : i32
    %c0_i32_2 = arith.constant 0 : i32
    return %arg0, %c0_i32, %c0_i32_0, %c0_i32_1 : i32, i32, i32, i32
  }
  func.func @transform_3(%arg0: i32) -> (i32, i32, i32, i32) {
    %c0_i32 = arith.constant 0 : i32
    %c0_i32_0 = arith.constant 0 : i32
    %c0_i32_1 = arith.constant 0 : i32
    %c0_i32_2 = arith.constant 0 : i32
    return %arg0, %c0_i32, %c0_i32_0, %c0_i32_1 : i32, i32, i32, i32
  }
  func.func @transform_4(%arg0: i32) -> (i32, i32, i32) {
    %c0_i32 = arith.constant 0 : i32
    %c0_i32_0 = arith.constant 0 : i32
    %c0_i32_1 = arith.constant 0 : i32
    %c0_i32_2 = arith.constant 0 : i32
    return %c0_i32, %c0_i32_0, %c0_i32_1 : i32, i32, i32
  }
  func.func @transform_5(%arg0: i32) -> (i32, i32) {
    %c0_i32 = arith.constant 0 : i32
    %c0_i32_0 = arith.constant 0 : i32
    %c0_i32_1 = arith.constant 0 : i32
    return %c0_i32, %c0_i32_0 : i32, i32
  }
  func.func @transform_6(%arg0: i32) -> (i32, i32, i32) {
    %c0_i32 = arith.constant 0 : i32
    %c0_i32_0 = arith.constant 0 : i32
    %c0_i32_1 = arith.constant 0 : i32
    %c0_i32_2 = arith.constant 0 : i32
    return %c0_i32, %c0_i32_0, %c0_i32_1 : i32, i32, i32
  }
  func.func @transform_7(%arg0: i32) -> (i32, i32) {
    %c0_i32 = arith.constant 0 : i32
    %c0_i32_0 = arith.constant 0 : i32
    %c0_i32_1 = arith.constant 0 : i32
    return %c0_i32, %c0_i32_0 : i32, i32
  }
  func.func @transform_8(%arg0: i32) -> (i32, i32) {
    %c0_i32 = arith.constant 0 : i32
    %c0_i32_0 = arith.constant 0 : i32
    %c0_i32_1 = arith.constant 0 : i32
    return %c0_i32, %c0_i32_0 : i32, i32
  }
  func.func @transform_9(%arg0: i32) -> (i32, i32) {
    %c0_i32 = arith.constant 0 : i32
    %c0_i32_0 = arith.constant 0 : i32
    %c0_i32_1 = arith.constant 0 : i32
    return %c0_i32, %c0_i32_0 : i32, i32
  }
  func.func @transform_10(%arg0: i32) -> (i32, i32, i32, i32) {
    %c0_i32 = arith.constant 0 : i32
    %c0_i32_0 = arith.constant 0 : i32
    %c0_i32_1 = arith.constant 0 : i32
    %c0_i32_2 = arith.constant 0 : i32
    return %arg0, %c0_i32, %c0_i32_0, %c0_i32_1 : i32, i32, i32, i32
  }
}

</mosaic_0001>

<bundles_post_ra>
// kernel: resblock_forward.1
= control target key start
LH: loop header
LB: loop body
LE: loop exit
PB: predicated region body
PF: predicated region fallthrough
CT: control target
= control target key end

     0   :  { %s4932_s13 = smov 0   ;;  %s7068_s0 = inlined_call_operand.vmem [shape: bf16[2,9,9,8], index: 0, kind: input, shape index: {}]   ;;  %s7069_s1 = inlined_call_operand.vmem [shape: bf16[2,9,9,8], index: 1, kind: input, shape index: {}]   ;;  %s7070_s2 = inlined_call_operand.vmem [shape: bf16[2,9,9,8], index: 2, kind: input, shape index: {}]   ;;  %s7071_s3 = inlined_call_operand.vmem [shape: bf16[2,9,9,8], index: 3, kind: input, shape index: {}]   ;;  %s7072_s4 = inlined_call_operand.vmem [shape: bf16[9,8,8], index: 4, kind: input, shape index: {}]   ;;  %s7073_s5 = inlined_call_operand.vmem [shape: f32[1,8], index: 5, kind: input, shape index: {}]   ;;  %s7074_s6 = inlined_call_operand.vmem [shape: bf16[9,8,128], index: 6, kind: input, shape index: {}]   ;;  %s7075_s7 = inlined_call_operand.vmem [shape: f32[1,128], index: 7, kind: input, shape index: {}]   ;;  %s7076_s8 = inlined_call_operand.vmem [shape: bf16[8,128], index: 8, kind: input, shape index: {}]   ;;  %s7077_s9 = inlined_call_operand.vmem [shape: f32[1,128], index: 9, kind: input, shape index: {}]   ;;  %s7078_s10 = inlined_call_operand.vmem [shape: f32[2,8,8,128], index: 10, kind: output, shape index: {}]  }
   0x1 LB: > { %s4532_s14 = sadd.s32 4294967295, %s4874_s13   ;;  %p4536_p0 = scmp.ge.s32.totalorder %s4874_s13, 1  ;;  %s4874_s13 = sphi %s4932_s13, %s20_s13  }
   0x2   : > { %p342_p1 = scmp.lt.s32.totalorder %s4874_s13, 3 }
   0x4   : > { %p343_p2 = pnand %p4536_p0, %p342_p1 }
   0x6   : > { %346 = sbr.rel (%p343_p2) target bundleno = 1046 (0x416), region = 60 }
   0xb   : > { %v494_v0 = vld [vmem:[%s7072_s4 + $0x4] sm:$0xf]  ;;  %vm692_vm0 = vcmask 1043456   ;;  %v493_v1 = vld [vmem:[%s7072_s4] sm:$0xf]  ;;  %p395_p3 = scmp.lt.s32.totalorder %s4532_s14, 1 }
   0xc   : > { %v4947_v2 = vsel %vm692_vm0, %v494_v0, 0  ;;  %v4950_v3 = vsel %vm692_vm0, %v493_v1, 0  ;;  %v495_v4 = vld [vmem:[%s7072_s4 + $0x8] sm:$0xf]  ;;  %v496_v6 = vld [vmem:[%s7072_s4 + $0xc] sm:$0xf] }
   0xd   : > { %7186 = vst [vmem:[#allocation6_spill] sm:$0xff] %v4947_v2  ;;  %4850 = vmatpush.bf16.msra.mxu2 %v4947_v2  ;;  %4851 = vmatpush.bf16.msra.mxu3 %v4950_v3  ;;  %s7382_s14 = smov (!%p395_p3, %s4532_s14), 1  ;;  %v4960_v5 = vsel %vm692_vm0, %v495_v4, 0  ;;  %v4967_v7 = vsel %vm692_vm0, %v496_v6, 0  ;;  %vm679_vm1 = vcmask 64512   ;;  %vm511_vm5 = vcmask 60416  }
   0xe   : > { %7187 = vst [vmem:[#allocation7_spill] sm:$0xff] %v4950_v3  ;;  %703 = vmatpush.bf16.msra.mxu0 %v4947_v2  ;;  %s4971_s23 = smul.u32 72, %s7382_s14  ;;  %767 = vmatpush.bf16.msra.mxu1 %v4950_v3  ;;  %vm789_vm2 = vsmask.f32 3328  ;;  %v499_v4 = vld [vmem:[%s7072_s4 + $0x18] sm:$0xf] }
   0xf   : > { %7188 = vst [vmem:[#allocation8_spill] sm:$0xff] %v4960_v5  ;;  %vm790_vm3 = vsmask.f32 7440  ;;  %vm513_vm14 = vcmask 57344   ;;  %vm514_vm15 = vsmask.f32 256 }
  0x10   : > { %7189 = vst [vmem:[#allocation9_spill] sm:$0xff] %v4967_v7  ;;  %s4979_s26 = scalar_lea.vmem %s7069_s1, %s4971_s23  ;;  %s4985_s29 = scalar_lea.vmem %s7068_s0, %s4971_s23  ;;  %vm5106_vm4 = vmor %vm789_vm2, %vm790_vm3 }
  0x11   : > { %938 = vmatpush.bf16.msrb.mxu2 %v4960_v5  ;;  %1010 = vmatpush.bf16.msrb.mxu3 %v4967_v7  ;;  %v4988_v8 = vld [vmem:[%s4979_s26 + $0x20] sm:$0xf]  ;;  %v4991_v9 = vld [vmem:[%s4979_s26 + $0x28] sm:$0xf]  ;;  %v5027_v26 = vld [vmem:[%s4979_s26 + $0x30] sm:$0xf]  ;;  %s5080_s12 = scalar_lea.vmem %s7070_s2, %s4971_s23  ;;  %s5118_s21 = scalar_lea.vmem %s7071_s3, %s4971_s23 }
  0x12   : > { %v4994_v10 = vld [vmem:[%s4985_s29 + $0x20] sm:$0xf]  ;;  %v7085_v11 = vunpack.c.l.b16 %v4988_v8  ;;  %v7082_v12 = vunpack.c.l.b16 %v4991_v9  ;;  %v4999_v13 = vld [vmem:[%s4985_s29 + $0x28] sm:$0xf]  ;;  %v5032_v28 = vld [vmem:[%s4979_s26 + $0x38] sm:$0xf]  ;;  %v7081_v30 = vunpack.c.l.b16 %v5027_v26 }
  0x13   : > { %v7087_v14 = vunpack.c.l.b16 %v4994_v10  ;;  %v7084_v15 = vunpack.c.l.b16 %v4999_v13  ;;  %v5017_v18 = vld [vmem:[%s4979_s26] sm:$0xf]  ;;  %v5020_v19 = vld [vmem:[%s4979_s26 + $0x8] sm:$0xf]  ;;  %v7079_v31 = vunpack.c.l.b16 %v5032_v28  ;;  %v5040_v32 = vld [vmem:[%s4985_s29 + $0x30] sm:$0xf] }
  0x14   : > { %v5007_v16 = vpack.c.b16 %v7082_v12, %v7085_v11  ;;  %v667_v20 = vunpack.c.l.b16 %v5017_v18  ;;  %v668_v21 = vunpack.c.l.b16 %v5020_v19  ;;  %v421_v22 = vld [vmem:[%s4985_s29] sm:$0xf]  ;;  %v423_v23 = vld [vmem:[%s4985_s29 + $0x8] sm:$0xf]  ;;  %v5043_v37 = vld [vmem:[%s4985_s29 + $0x38] sm:$0xf]  ;;  %v7083_v39 = vunpack.c.l.b16 %v5040_v32 }
  0x15   : > { %v743_v17 = vpack.c.b16 %v7084_v15, %v7087_v14  ;;  %v733_v24 = vunpack.c.l.b16 %v421_v22  ;;  %v734_v25 = vunpack.c.l.b16 %v423_v23  ;;  %v793_v33 = vshrl.u32 %v421_v22, 16  ;;  %v5054_v41 = vld [vmem:[%s4979_s26 + $0x10] sm:$0xf]  ;;  %v5057_v46 = vld [vmem:[%s4979_s26 + $0x18] sm:$0xf]  ;;  %vm6016_vm2 = vmand %vm513_vm14, %vm514_vm15  ;;  %s4825_s23 = sshll.u32 %s7382_s14, 6 }
  0x16   : > { %7190 = vst [vmem:[#allocation10_spill] sm:$0xff] %v5007_v16  ;;  %4545 = vmatmul.msk.bf16.vlgmr.msra.gmra.mxu2 %vm679_vm1, %v5007_v16  ;;  %v5029_v27 = vpack.c.b16 %v668_v21, %v667_v20  ;;  %v796_v34 = vshll.u32 %v421_v22, 16  ;;  %v807_v35 = vshrl.u32 %v423_v23, 16  ;;  %v810_v36 = vshll.u32 %v423_v23, 16  ;;  %v5067_v49 = vld [vmem:[%s4985_s29 + $0x10] sm:$0xf]  ;;  %s7021_s28 = scalar_lea.vmem %s7078_s10, %s4825_s23 }
  0x17   : > { %4549 = vmatmul.msk.bf16.vlgmr.msra.gmra.mxu3 %vm679_vm1, %v743_v17  ;;  %v741_v29 = vpack.c.b16 %v734_v25, %v733_v24  ;;  %v5049_v38 = vpack.c.b16 %v7079_v31, %v7081_v30  ;;  %v7080_v40 = vunpack.c.l.b16 %v5043_v37  ;;  %v795_v42 = vrot.slane %v793_v33, 4  ;;  %v5070_v50 = vld [vmem:[%s4985_s29 + $0x18] sm:$0xf]  ;;  %v422_v58 = vld [vmem:[%s4985_s29 + $0x4] sm:$0x1] }
  0x18   : > { %4543 = vmatmul.msk.bf16.vlgmr.msra.gmra.mxu0 %vm679_vm1, %v5029_v27  ;;  %v798_v43 = vrot.slane %v796_v34, 5  ;;  %v809_v44 = vrot.slane %v807_v35, 4  ;;  %v812_v45 = vrot.slane %v810_v36, 5  ;;  %v669_v48 = vunpack.c.l.b16 %v5054_v41  ;;  %v424_v60 = vld [vmem:[%s4985_s29 + $0xc] sm:$0x1] }
  0x19   : > { %4547 = vmatmul.msk.bf16.vlgmr.msra.gmra.mxu1 %vm679_vm1, %v741_v29  ;;  %7191 = vst [vmem:[#allocation11_spill] sm:$0xff] %v5049_v38  ;;  %v744_v47 = vpack.c.b16 %v7080_v40, %v7083_v39  ;;  %v7086_v51 = vunpack.c.l.b16 %v5057_v46  ;;  %v735_v55 = vunpack.c.l.b16 %v5067_v49  ;;  %v7088_v56 = vunpack.c.l.b16 %v5070_v50  ;;  %v457_v61 = vld [vmem:[%s5080_s12] sm:$0xf]  ;;  %v5094_v62 = vld [vmem:[%s5080_s12 + $0x8] sm:$0xf] }
  0x1a   : > { %v799_v52 = vor.u32 %v798_v43, %v795_v42  ;;  %v813_v53 = vor.u32 %v812_v45, %v809_v44  ;;  %v5074_v54 = vpack.c.b16 %v669_v48, %v668_v21  ;;  %v821_v6 = vshrl.u32 %v5067_v49, 16  ;;  %v500_v29 = vld [vmem:[%s7072_s4 + $0x1c] sm:$0xf]  ;;  %v497_v42 = vld [vmem:[%s7072_s4 + $0x10] sm:$0xf] }
  0x1b   : > { %v5086_v57 = vpack.c.b16 %v7086_v51, %v669_v48  ;;  %v742_v59 = vpack.c.b16 %v7088_v56, %v735_v55  ;;  %v5096_v1 = vpack.c.b16 %v735_v55, %v734_v25  ;;  %v824_v17 = vshll.u32 %v5067_v49, 16  ;;  %v498_v48 = vld [vmem:[%s7072_s4 + $0x14] sm:$0xf]  ;;  %v5192_v51 = vld [vmem:[%s5080_s12 + $0x18] sm:$0xf] }
  0x1c   : > { %7192 = vst [vmem:[#allocation12_spill] sm:$0xff] %v5074_v54  ;;  %v800_v63 = vrot.slane %v799_v52, 4  ;;  %v814_v0 = vrot.slane %v813_v53, 4  ;;  %v802_v20 = vshll.u32 %v422_v58, 16  ;;  %v835_v21 = vshrl.u32 %v5070_v50, 16 }
  0x1d   : > { %7193 = vst [vmem:[#allocation13_spill] sm:$0xff] %v5096_v1  ;;  %v7194_v22 = vmov 0  ;;  %v816_v23 = vshll.u32 %v424_v60, 16  ;;  %v976_v24 = vunpack.c.l.b16 %v457_v61  ;;  %v977_v25 = vunpack.c.l.b16 %v5094_v62  ;;  %v5141_v58 = vld [vmem:[%s5118_s21] sm:$0xf] }
  0x1e   : > { %v7195_v22 = vsel %vm5106_vm4, 4294967295, %v7194_v22  ;;  %v804_v33 = vrot.slane %v802_v20, 5  ;;  %v1113_v34 = vshrl.u32 %v457_v61, 16  ;;  %v1116_v35 = vshll.u32 %v457_v61, 16  ;;  %v458_v60 = vld [vmem:[%s5080_s12 + $0x4] sm:$0x1] }
  0x1f   : > { %7196 = vst [vmem:[#allocation14_spill] sm:$0xff] %v7195_v22  ;;  %v1127_v36 = vshrl.u32 %v5094_v62, 16  ;;  %v838_v43 = vshll.u32 %v5070_v50, 16  ;;  %v818_v44 = vrot.slane %v816_v23, 5  ;;  %v1130_v45 = vshll.u32 %v5094_v62, 16 }
  0x20   : > { %v805_v49 = vsel %vm5106_vm4, %v800_v63, %v804_v33  ;;  %v5137_v52 = vpack.c.b16 %v977_v25, %v976_v24  ;;  %v1115_v53 = vrot.slane %v1113_v34, 4  ;;  %v1118_v55 = vrot.slane %v1116_v35, 5  ;;  %v460_v35 = vld [vmem:[%s5080_s12 + $0xc] sm:$0x1]  ;;  %v426_v31 = vld [vmem:[%s4985_s29 + $0x14] sm:$0x1] }
  0x21   : > { %v819_v61 = vsel %vm5106_vm4, %v814_v0, %v818_v44  ;;  %v1129_v63 = vrot.slane %v1127_v36, 4  ;;  %v5150_v20 = vsel %vm692_vm0, %v500_v29, 0  ;;  %v1132_v24 = vrot.slane %v1130_v45, 5  ;;  %7203 = vst [vmem:[#allocation21_spill] sm:$0xff] %v5192_v51  ;;  %v430_v56 = vld [vmem:[%s4985_s29 + $0x24] sm:$0x1] }
  0x22   : > { %7198 = vst [vmem:[#allocation16_spill] sm:$0xff] %v5137_v52  ;;  %v5152_v23 = vunpack.c.l.b16 %v819_v61  ;;  %1374 = vmatpush.bf16.msra.mxu3 %v5150_v20  ;;  %v5156_v33 = vsel %vm692_vm0, %v497_v42, 0  ;;  %v5159_v34 = vsel %vm692_vm0, %v498_v48, 0  ;;  %v849_v0 = vshrl.u32 %v4994_v10, 16  ;;  %v432_v62 = vld [vmem:[%s4985_s29 + $0x2c] sm:$0x1] }
  0x23   : > { %7199 = vst [vmem:[#allocation17_spill] sm:$0xff] %v5150_v20  ;;  %v823_v44 = vrot.slane %v821_v6, 4  ;;  %v826_v36 = vrot.slane %v824_v17, 5  ;;  %1082 = vmatpush.bf16.msrb.mxu0 %v5156_v33  ;;  %1258 = vmatpush.bf16.msrb.mxu1 %v5159_v34  ;;  %v840_v29 = vrot.slane %v838_v43, 5  ;;  %v1119_v42 = vor.u32 %v1118_v55, %v1115_v53  ;;  %v576_v22 = vld [vmem:[#allocation3 + $0x34] sm:$0x1] }
  0x24   : > { %7200 = vst [vmem:[#allocation18_spill] sm:$0xff] %v5156_v33  ;;  %v1122_v61 = vshll.u32 %v458_v60, 16  ;;  %v1048_v48 = vunpack.c.l.b16 %v5141_v58  ;;  %v852_v6 = vshll.u32 %v4994_v10, 16  ;;  %v1133_v43 = vor.u32 %v1132_v24, %v1129_v63  ;;  %v428_v60 = vld [vmem:[%s4985_s29 + $0x1c] sm:$0x1] }
  0x25   : > { %7201 = vst [vmem:[#allocation19_spill] sm:$0xff] %v5159_v34  ;;  %v1120_v17 = vrot.slane %v1119_v42, 4  ;;  %v5177_v53 = vrot.slane %v849_v0, 4  ;;  %v1136_v55 = vshll.u32 %v460_v35, 16  ;;  %v830_v30 = vshll.u32 %v426_v31, 16 }
  0x26   : > { %4546 = vmatmul.msk.bf16.gmra.mxu2 %vm679_vm1, %v5049_v38  ;;  %v863_v12 = vshrl.u32 %v4999_v13, 16  ;;  %v1134_v15 = vrot.slane %v1133_v43, 4  ;;  %v866_v63 = vshll.u32 %v4999_v13, 16  ;;  %v844_v11 = vshll.u32 %v428_v60, 16  ;;  %v5205_v60 = vld [vmem:[%s5118_s21 + $0x10] sm:$0xf] }
  0x27   : > { %4550 = vmatmul.msk.bf16.gmra.mxu3 %vm679_vm1, %v744_v47  ;;  %v5128_v47 = vsel %vm692_vm0, %v499_v4, 0  ;;  %v904_v4 = vunpack.c.l.b16 %v805_v49  ;;  %v837_v49 = vrot.slane %v835_v21, 4  ;;  %1534 = vmatpush.bf16.msra.mxu1 %v4947_v2  ;;  %v1124_v21 = vrot.slane %v1122_v61, 5  ;;  %v461_v61 = vld [vmem:[%s5080_s12 + $0x10] sm:$0xf]  ;;  %7204 = vst [vmem:[#allocation22_spill] sm:$0xff] %v5205_v60 }
  0x28   : > { %4544 = vmatmul.msk.bf16.gmra.mxu0 %vm679_vm1, %v5086_v57  ;;  %7197 = vst [vmem:[#allocation15_spill] sm:$0xff] %v5128_v47  ;;  %1316 = vmatpush.bf16.msra.mxu2 %v5128_v47  ;;  %v1138_v31 = vrot.slane %v1136_v55, 5  ;;  %v854_v14 = vrot.slane %v852_v6, 5  ;;  %v846_v43 = vrot.slane %v844_v11, 5  ;;  %v7091_v6 = vunpack.c.l.b16 %v5192_v51 }
  0x29   : > { %4548 = vmatmul.msk.bf16.gmra.mxu1 %vm679_vm1, %v742_v59  ;;  %v5144_v59 = vld [vmem:[%s5118_s21 + $0x8] sm:$0xf]  ;;  %v5167_v45 = vpack.c.b16 %v5152_v23, %v904_v4  ;;  %v827_v4 = vor.u32 %v826_v36, %v823_v44  ;;  %v1125_v39 = vsel %vm5106_vm4, %v1120_v17, %v1124_v21  ;;  %v841_v42 = vor.u32 %v840_v29, %v837_v49 }
  0x2a   : > { %v7089_v40 = vunpack.c.l.b16 %v5144_v59  ;;  %v1224_v0 = vunpack.c.l.b16 %v1125_v39  ;;  %v832_v44 = vrot.slane %v830_v30, 5  ;;  %v1139_v49 = vsel %vm5106_vm4, %v1134_v15, %v1138_v31  ;;  %v462_v31 = vld [vmem:[%s5080_s12 + $0x14] sm:$0x1] }
  0x2b   : > { %v828_v35 = vrot.slane %v827_v4, 4  ;;  %v842_v36 = vrot.slane %v841_v42, 4  ;;  %v978_v29 = vunpack.c.l.b16 %v461_v61  ;;  %v1141_v17 = vshrl.u32 %v461_v61, 16 }
  0x2c   : > { %v5189_v24 = vpack.c.b16 %v7089_v40, %v1048_v48  ;;  %v1225_v21 = vunpack.c.l.b16 %v1139_v49  ;;  %v1144_v39 = vshll.u32 %v461_v61, 16  ;;  %v1155_v15 = vshrl.u32 %v5192_v51, 16 }
  0x2d   : > { %v833_v48 = vsel %vm5106_vm4, %v828_v35, %v832_v44  ;;  %v1143_v55 = vrot.slane %v1141_v17, 4  ;;  %v847_v42 = vsel %vm5106_vm4, %v842_v36, %v846_v43  ;;  %v1158_v61 = vshll.u32 %v5192_v51, 16  ;;  %v464_v35 = vld [vmem:[%s5080_s12 + $0x1c] sm:$0x1]  ;;  %v5242_v51 = vld [vmem:[%s5080_s12 + $0x20] sm:$0xf] }
  0x2e   : > { %7202 = vst [vmem:[#allocation20_spill] sm:$0xff] %v5189_v24  ;;  %v5200_v30 = vunpack.c.l.b16 %v833_v48  ;;  %v5207_v4 = vpack.c.b16 %v1225_v21, %v1224_v0  ;;  %v1146_v11 = vrot.slane %v1144_v39, 5  ;;  %v865_v44 = vrot.slane %v863_v12, 4 }
  0x2f   : > { %v5214_v49 = vunpack.c.l.b16 %v847_v42  ;;  %v1157_v17 = vrot.slane %v1155_v15, 4  ;;  %v5218_v48 = vpack.c.b16 %v978_v29, %v977_v25  ;;  %v868_v0 = vrot.slane %v866_v63, 5  ;;  %7211 = vst [vmem:[#allocation28_spill] sm:$0xff] %v5242_v51 }
  0x30   : > { %7205 = vst [vmem:[#allocation23_spill] sm:$0xff] %v5207_v4  ;;  %v1147_v36 = vor.u32 %v1146_v11, %v1143_v55  ;;  %v1160_v43 = vrot.slane %v1158_v61, 5  ;;  %v1050_v39 = vunpack.c.l.b16 %v5205_v60  ;;  %v5226_v12 = vpack.c.b16 %v7091_v6, %v978_v29  ;;  %v5235_v55 = vld [vmem:[%s5118_s21 + $0x18] sm:$0xf] }
  0x31   : > { %7206 = vst [vmem:[#allocation24_spill] sm:$0xff] %v5218_v48  ;;  %v1150_v15 = vshll.u32 %v462_v31, 16  ;;  %v1164_v42 = vshll.u32 %v464_v35, 16  ;;  %v5232_v25 = vpack.c.b16 %v5214_v49, %v5200_v30  ;;  %v7209_v11 = vunpack.c.l.b16 %v5144_v59 }
  0x32   : > { %7207 = vst [vmem:[#allocation25_spill] sm:$0xff] %v5226_v12  ;;  %v1148_v63 = vrot.slane %v1147_v36, 4  ;;  %v1161_v40 = vor.u32 %v1160_v43, %v1157_v17  ;;  %v855_v35 = vor.u32 %v854_v14, %v5177_v53  ;;  %v858_v6 = vshll.u32 %v430_v56, 16  ;;  %v5257_v56 = vld [vmem:[%s5080_s12 + $0x28] sm:$0xf] }
  0x33   : > { %7208 = vst [vmem:[#allocation26_spill] sm:$0xff] %v5235_v55  ;;  %v5239_v61 = vpack.c.b16 %v1050_v39, %v7209_v11  ;;  %v1152_v29 = vrot.slane %v1150_v15, 5  ;;  %v1166_v31 = vrot.slane %v1164_v42, 5  ;;  %v1169_v43 = vshrl.u32 %v5242_v51, 16 }
  0x34   : > { %v1162_v48 = vrot.slane %v1161_v40, 4  ;;  %v877_v11 = vshrl.u32 %v5040_v32, 16  ;;  %7212 = vst [vmem:[#allocation29_spill] sm:$0xff] %v5257_v56  ;;  %v856_v53 = vrot.slane %v855_v35, 4  ;;  %v880_v36 = vshll.u32 %v5040_v32, 16 }
  0x35   : > { %7210 = vst [vmem:[#allocation27_spill] sm:$0xff] %v5239_v61  ;;  %v1153_v17 = vsel %vm5106_vm4, %v1148_v63, %v1152_v29  ;;  %v1171_v63 = vrot.slane %v1169_v43, 4  ;;  %v1172_v29 = vshll.u32 %v5242_v51, 16  ;;  %v7215_v61 = vunpack.c.l.b16 %v5235_v55 }
  0x36   : > { %4551 = vmatmul.msk.bf16.vlgmr.msrb.gmra.mxu2 %vm679_vm1, %v5167_v45  ;;  %v1167_v14 = vsel %vm5106_vm4, %v1162_v48, %v1166_v31  ;;  %v1226_v40 = vunpack.c.l.b16 %v1153_v17  ;;  %v1183_v31 = vshrl.u32 %v5257_v56, 16  ;;  %v1186_v35 = vshll.u32 %v5257_v56, 16  ;;  %v468_v17 = vld [vmem:[%s5080_s12 + $0x2c] sm:$0x1] }
  0x37   : > { %4555 = vmatmul.msk.bf16.vlgmr.msrb.gmra.mxu3 %vm679_vm1, %v5137_v52  ;;  %1563 = vmatpush.bf16.msrb.mxu2 %v4950_v3  ;;  %v869_v52 = vor.u32 %v868_v0, %v865_v44  ;;  %v860_v44 = vrot.slane %v858_v6, 5  ;;  %v5259_v42 = vunpack.c.l.b16 %v1167_v14  ;;  %v5267_v48 = vpack.c.b16 %v7215_v61, %v1050_v39  ;;  %v466_v6 = vld [vmem:[%s5080_s12 + $0x24] sm:$0x1] }
  0x38   : > { %1728 = vmatpush.bf16.msrb.mxu3 %v4960_v5  ;;  %4559 = vmatmul.msk.bf16.vlgmr.msrb.gmra.mxu0 %vm679_vm1, %v5189_v24  ;;  %v1188_v39 = vrot.slane %v1186_v35, 5  ;;  %v1178_v55 = vshll.u32 %v466_v6, 16  ;;  %v879_v38 = vrot.slane %v877_v11, 4  ;;  %v882_v60 = vrot.slane %v880_v36, 5  ;;  %v434_v35 = vld [vmem:[%s4985_s29 + $0x34] sm:$0x1] }
  0x39   : > { %4563 = vmatmul.msk.bf16.vlgmr.msrb.gmra.mxu1 %vm679_vm1, %v5207_v4  ;;  %v870_v0 = vrot.slane %v869_v52, 4  ;;  %7213 = vst [vmem:[#allocation30_spill] sm:$0xff] %v5259_v42  ;;  %v891_v52 = vshrl.u32 %v5043_v37, 16  ;;  %v861_v43 = vsel %vm5106_vm4, %v856_v53, %v860_v44  ;;  %v5280_v61 = vpack.c.b16 %v5259_v42, %v1226_v40  ;;  %v436_v6 = vld [vmem:[%s4985_s29 + $0x3c] sm:$0x1] }
  0x3a   : > { %1802 = vmatpush.bf16.msrb.mxu1 %v5156_v33  ;;  %v872_v33 = vshll.u32 %v432_v62, 16  ;;  %v5261_v62 = vpack.c.b16 %v1226_v40, %v1225_v21  ;;  %7216 = vst [vmem:[#allocation32_spill] sm:$0xff] %v5267_v48  ;;  %v1174_v21 = vrot.slane %v1172_v29, 5  ;;  %v1192_v44 = vshll.u32 %v468_v17, 16  ;;  %v5298_v17 = vld [vmem:[%s5118_s21 + $0x28] sm:$0xf] }
  0x3b   : > { %7217 = vst [vmem:[#allocation33_spill] sm:$0xff] %v5280_v61  ;;  %v7111_v40 = vunpack.c.l.b16 %v5242_v51  ;;  %v893_v29 = vrot.slane %v891_v52, 4  ;;  %v900_v42 = vshll.u32 %v436_v6, 16  ;;  %v7114_v16 = vunpack.c.l.b16 %v5298_v17 }
  0x3c   : > { %v874_v15 = vrot.slane %v872_v33, 5  ;;  %7214 = vst [vmem:[#allocation31_spill] sm:$0xff] %v5261_v62  ;;  %v894_v33 = vshll.u32 %v5043_v37, 16  ;;  %v1185_v62 = vrot.slane %v1183_v31, 4  ;;  %v5291_v31 = vld [vmem:[%s5118_s21 + $0x20] sm:$0xf] }
  0x3d   : > { %7218 = vst [vmem:[#allocation34_spill] sm:$0xff] %v5291_v31 }
  0x3e   : > { %v875_v14 = vsel %vm5106_vm4, %v870_v0, %v874_v15  ;;  %v1189_v53 = vor.u32 %v1188_v39, %v1185_v62  ;;  %v5284_v0 = vunpack.c.l.b16 %v861_v43  ;;  %v896_v11 = vrot.slane %v894_v33, 5  ;;  %7219 = vst [vmem:[#allocation35_spill] sm:$0xff] %v5298_v17 }
  0x3f   : > { %v5286_v15 = vunpack.c.l.b16 %v875_v14  ;;  %v1180_v62 = vrot.slane %v1178_v55, 5  ;;  %v1194_v43 = vrot.slane %v1192_v44, 5  ;;  %v5301_v14 = vld [vmem:[%s5080_s12 + $0x30] sm:$0xf]  ;;  %v5314_v55 = vld [vmem:[%s5080_s12 + $0x38] sm:$0xf]  ;;  %v7115_v44 = vunpack.c.l.b16 %v5291_v31 }
  0x40   : > { %7220 = vst [vmem:[#allocation36_spill] sm:$0xff] %v5301_v14  ;;  %v886_v33 = vshll.u32 %v434_v35, 16  ;;  %v902_v35 = vrot.slane %v900_v42, 5  ;;  %v470_v42 = vld [vmem:[%s5080_s12 + $0x34] sm:$0x1] }
  0x41   : > { %v5305_v39 = vpack.c.b16 %v5286_v15, %v5284_v0  ;;  %7222 = vst [vmem:[#allocation38_spill] sm:$0xff] %v5314_v55 }
  0x46   : > { %4552 = vmatmul.msk.bf16.gmra.mxu2 %vm679_vm1, %v5232_v25 }
  0x47   : > { %4556 = vmatmul.msk.bf16.gmra.mxu3 %vm679_vm1, %v5226_v12  ;;  %v1175_v12 = vor.u32 %v1174_v21, %v1171_v63  ;;  %v7110_v63 = vunpack.c.l.b16 %v5257_v56  ;;  %v1190_v21 = vrot.slane %v1189_v53, 4  ;;  %v897_v53 = vor.u32 %v896_v11, %v893_v29  ;;  %v501_v11 = vld [vmem:[%s7072_s4 + $0x20] sm:$0xf] }
  0x48   : > { %4560 = vmatmul.msk.bf16.gmra.mxu0 %vm679_vm1, %v5267_v48  ;;  %v1197_v48 = vshrl.u32 %v5301_v14, 16  ;;  %v5334_v6 = vsel %vm692_vm0, %v501_v11, 0  ;;  %v472_v11 = vld [vmem:[%s5080_s12 + $0x3c] sm:$0x1] }
  0x49   : > { %4564 = vmatmul.msk.bf16.gmra.mxu1 %vm679_vm1, %v5280_v61  ;;  %v1176_v36 = vrot.slane %v1175_v12, 4  ;;  %v5311_v52 = vpack.c.b16 %v7110_v63, %v7111_v40  ;;  %v883_v12 = vor.u32 %v882_v60, %v879_v38  ;;  %v1195_v56 = vsel %vm5106_vm4, %v1190_v21, %v1194_v43  ;;  %7223 = vst [vmem:[#allocation39_spill] sm:$0xff] %v5334_v6 }
  0x4a   : > { %v1200_v63 = vshll.u32 %v5301_v14, 16  ;;  %v1211_v38 = vshrl.u32 %v5314_v55, 16  ;;  %v1214_v60 = vshll.u32 %v5314_v55, 16  ;;  %v5340_v21 = vpack.c.b16 %v7114_v16, %v7115_v44  ;;  %1445 = vmatpush.bf16.msra.mxu0 %v5334_v6 }
  0x4b   : > { %7221 = vst [vmem:[#allocation37_spill] sm:$0xff] %v5311_v52  ;;  %v1181_v61 = vsel %vm5106_vm4, %v1176_v36, %v1180_v62  ;;  %v884_v29 = vrot.slane %v883_v12, 4  ;;  %v888_v36 = vrot.slane %v886_v33, 5  ;;  %v898_v62 = vrot.slane %v897_v53, 4 }
  0x4c   : > { %7224 = vst [vmem:[#allocation40_spill] sm:$0xff] %v5340_v21  ;;  %v5342_v43 = vunpack.c.l.b16 %v1181_v61  ;;  %v5344_v12 = vunpack.c.l.b16 %v1195_v56  ;;  %v1199_v40 = vrot.slane %v1197_v48, 4  ;;  %v1202_v51 = vrot.slane %v1200_v63, 5 }
  0x4d   : > { %v1213_v33 = vrot.slane %v1211_v38, 4  ;;  %v1216_v53 = vrot.slane %v1214_v60, 5  ;;  %v903_v16 = vsel %vm5106_vm4, %v898_v62, %v902_v35  ;;  %v1206_v63 = vshll.u32 %v470_v42, 16 }
  0x4e   : > { %7225 = vst [vmem:[#allocation41_spill] sm:$0xff] %v5342_v43  ;;  %1765 = vmatpush.bf16.msrb.mxu0 %v4967_v7  ;;  %v5356_v56 = vpack.c.b16 %v5344_v12, %v5342_v43  ;;  %v1203_v48 = vor.u32 %v1202_v51, %v1199_v40  ;;  %v1220_v38 = vshll.u32 %v472_v11, 16  ;;  %v5362_v44 = vunpack.c.l.b16 %v903_v16  ;;  %v5379_v40 = vld [vmem:[%s5118_s21 + $0x30] sm:$0xf] }
  0x4f   : > { %7226 = vst [vmem:[#allocation42_spill] sm:$0xff] %v5344_v12  ;;  %v1217_v61 = vor.u32 %v1216_v53, %v1213_v33  ;;  %v1208_v12 = vrot.slane %v1206_v63, 5  ;;  %v7120_v33 = vunpack.c.l.b16 %v5379_v40 }
  0x50   : > { %7227 = vst [vmem:[#allocation43_spill] sm:$0xff] %v5356_v56  ;;  %v1204_v62 = vrot.slane %v1203_v48, 4  ;;  %v1222_v43 = vrot.slane %v1220_v38, 5  ;;  %v7234_v38 = vunpack.c.l.b16 %v5070_v50  ;;  %v1603_v50 = vshll.u32 %v5020_v19, 16 }
  0x51   : > { %v1218_v35 = vrot.slane %v1217_v61, 4 }
  0x52   : > { %v1209_v42 = vsel %vm5106_vm4, %v1204_v62, %v1208_v12  ;;  %v7235_v62 = vunpack.c.l.b16 %v4994_v10 }
  0x53   : > { %v1223_v11 = vsel %vm5106_vm4, %v1218_v35, %v1222_v43  ;;  %v5394_v48 = vunpack.c.l.b16 %v1209_v42  ;;  %v5420_v43 = vpack.c.b16 %v5200_v30, %v5152_v23  ;;  %v7237_v42 = vunpack.c.l.b16 %v5057_v46 }
  0x54   : > { %v5396_v61 = vunpack.c.l.b16 %v1223_v11  ;;  %v5432_v35 = vpack.c.b16 %v7235_v62, %v7234_v38  ;;  %v7238_v23 = vunpack.c.l.b16 %v4988_v8  ;;  %v1586_v11 = vshrl.u32 %v5017_v18, 16 }
  0x55   : > { %7229 = vst [vmem:[#allocation45_spill] sm:$0xff] %v5394_v48 }
  0x56   : > { %4553 = vmatmul.msk.bf16.gmra.mxu2 %vm679_vm1, %v5305_v39  ;;  %7230 = vst [vmem:[#allocation46_spill] sm:$0xff] %v5396_v61  ;;  %v5406_v12 = vpack.c.b16 %v5396_v61, %v5394_v48  ;;  %v5438_v30 = vpack.c.b16 %v7238_v23, %v7237_v42  ;;  %v1588_v10 = vrot.slane %v1586_v11, 4  ;;  %v1605_v42 = vrot.slane %v1603_v50, 5  ;;  %v437_v48 = vld [vmem:[%s4985_s29 + $0x40] sm:$0xf] }
  0x57   : > { %4557 = vmatmul.msk.bf16.gmra.mxu3 %vm679_vm1, %v5311_v52  ;;  %v889_v52 = vsel %vm5106_vm4, %v884_v29, %v888_v36  ;;  %v7121_v29 = vunpack.c.l.b16 %v5301_v14  ;;  %v7119_v36 = vunpack.c.l.b16 %v5314_v55  ;;  %7233 = vst [vmem:[#allocation49_spill] sm:$0xff] %v5420_v43  ;;  %v5450_v23 = vpack.c.b16 %v5284_v0, %v5214_v49 }
  0x58   : > { %4561 = vmatmul.msk.bf16.gmra.mxu0 %vm679_vm1, %v5340_v21  ;;  %v5360_v60 = vunpack.c.l.b16 %v889_v52  ;;  %v5382_v52 = vld [vmem:[%s5118_s21 + $0x38] sm:$0xf]  ;;  %7232 = vst [vmem:[#allocation48_spill] sm:$0xff] %v5406_v12  ;;  %v7239_v49 = vunpack.c.l.b16 %v4999_v13  ;;  %v7240_v0 = vunpack.c.l.b16 %v5040_v32  ;;  %v7242_v50 = vunpack.c.l.b16 %v4991_v9 }
  0x59   : > { %4565 = vmatmul.msk.bf16.gmra.mxu1 %vm679_vm1, %v5356_v56  ;;  %v5376_v16 = vpack.c.b16 %v7119_v36, %v7121_v29  ;;  %v7118_v53 = vunpack.c.l.b16 %v5382_v52  ;;  %7236 = vst [vmem:[#allocation50_spill] sm:$0xff] %v5432_v35 }
  0x5a   : > { %v5370_v51 = vpack.c.b16 %v5362_v44, %v5360_v60 }
  0x5b   : > { %7228 = vst [vmem:[#allocation44_spill] sm:$0xff] %v5376_v16  ;;  %v5402_v63 = vpack.c.b16 %v7118_v53, %v7120_v33  ;;  %v1600_v53 = vshrl.u32 %v5020_v19, 16  ;;  %v440_v19 = vld [vmem:[%s4979_s26 + $0x4] sm:$0x1]  ;;  %v442_v33 = vld [vmem:[%s4979_s26 + $0xc] sm:$0x1] }
  0x5c   : > { %v1595_v55 = vshll.u32 %v440_v19, 16  ;;  %v1609_v14 = vshll.u32 %v442_v33, 16  ;;  %v1408_v33 = vshll.u32 %v437_v48, 16 }
  0x5d   : > { %7231 = vst [vmem:[#allocation47_spill] sm:$0xff] %v5402_v63  ;;  %v1602_v62 = vrot.slane %v1600_v53, 4 }
  0x5e   : > { %v1597_v53 = vrot.slane %v1595_v55, 5  ;;  %v1611_v11 = vrot.slane %v1609_v14, 5 }
  0x5f   : > { %v1606_v36 = vor.u32 %v1605_v42, %v1602_v62  ;;  %v1410_v62 = vrot.slane %v1408_v33, 5 }
  0x61   : > { %v1607_v61 = vrot.slane %v1606_v36, 4 }
  0x63   : > { %v1612_v14 = vsel %vm5106_vm4, %v1607_v61, %v1611_v11  ;;  %v1617_v61 = vshll.u32 %v5054_v41, 16  ;;  %v5490_v11 = vpack.c.b16 %v5360_v60, %v5286_v15 }
  0x64   : > { %v5477_v32 = vunpack.c.l.b16 %v1612_v14  ;;  %v5495_v14 = vld [vmem:[%s4979_s26 + $0x40] sm:$0xf] }
  0x65   : > { %7244 = vst [vmem:[#allocation52_spill] sm:$0xff] %v5490_v11  ;;  %v1619_v33 = vrot.slane %v1617_v61, 5  ;;  %v1347_v15 = vunpack.c.l.b16 %v5495_v14 }
  0x66   : > { %4554 = vmatmul.msk.bf16.gmra.mxu2 %vm679_vm1, %v5370_v51 }
  0x67   : > { %4558 = vmatmul.msk.bf16.gmra.mxu3 %vm679_vm1, %v5376_v16 }
  0x68   : > { %4562 = vmatmul.msk.bf16.gmra.mxu0 %vm679_vm1, %v5402_v63 }
  0x69   : > { %4566 = vmatmul.msk.bf16.gmra.mxu1 %vm679_vm1, %v5406_v12 }
  0x76   : > { %4567 = vmatmul.msk.bf16.vlgmr.msra.gmra.mxu2 %vm679_vm1, %v5096_v1 }
  0x77   : > { %4571 = vmatmul.msk.bf16.vlgmr.msra.gmra.mxu3 %vm679_vm1, %v5074_v54  ;;  %1975 = vmatpush.bf16.msra.mxu2 %v5159_v34 }
  0x78   : > { %2012 = vmatpush.bf16.msra.mxu3 %v5128_v47  ;;  %4575 = vmatmul.msk.bf16.vlgmr.msra.gmra.mxu0 %vm679_vm1, %v5420_v43 }
  0x79   : > { %2049 = vmatpush.bf16.msra.mxu0 %v5150_v20  ;;  %4579 = vmatmul.msk.bf16.vlgmr.msra.gmra.mxu1 %vm679_vm1, %v5167_v45  ;;  %v1589_v45 = vshll.u32 %v5017_v18, 16 }
  0x7a   : > { %2117 = vmatpush.bf16.msra.mxu1 %v5334_v6  ;;  %v1670_v6 = vshrl.u32 %v5027_v26, 16 }
  0x7b   : > { %v1591_v38 = vrot.slane %v1589_v45, 5  ;;  %v5463_v45 = vpack.c.b16 %v7240_v0, %v7239_v49 }
  0x7d   : > { %v1592_v18 = vor.u32 %v1591_v38, %v1588_v10  ;;  %7241 = vst [vmem:[#allocation51_spill] sm:$0xff] %v5463_v45  ;;  %v7243_v10 = vunpack.c.l.b16 %v5027_v26  ;;  %v1405_v38 = vshrl.u32 %v437_v48, 16 }
  0x7f   : > { %v1593_v29 = vrot.slane %v1592_v18, 4  ;;  %v5469_v36 = vpack.c.b16 %v7243_v10, %v7242_v50  ;;  %v1407_v55 = vrot.slane %v1405_v38, 4  ;;  %v438_v18 = vld [vmem:[%s4985_s29 + $0x44] sm:$0x1] }
  0x80   : > { %v1414_v10 = vshll.u32 %v438_v18, 16 }
  0x81   : > { %v1411_v50 = vor.u32 %v1410_v62, %v1407_v55 }
  0x82   : > { %v1416_v60 = vrot.slane %v1414_v10, 5 }
  0x83   : > { %v1412_v16 = vrot.slane %v1411_v50, 4  ;;  %v7247_v50 = vunpack.c.l.b16 %v5032_v28 }
  0x85   : > { %v5513_v10 = vpack.c.b16 %v1347_v15, %v7247_v50 }
  0x86   : > { %4568 = vmatmul.msk.bf16.gmra.mxu2 %vm679_vm1, %v5432_v35  ;;  %v1847_v35 = vshrl.u32 %v5144_v59, 16 }
  0x87   : > { %4572 = vmatmul.msk.bf16.gmra.mxu3 %vm679_vm1, %v5438_v30  ;;  %7248 = vst [vmem:[#allocation54_spill] sm:$0xff] %v5513_v10 }
  0x88   : > { %4576 = vmatmul.msk.bf16.gmra.mxu0 %vm679_vm1, %v5450_v23 }
  0x89   : > { %4580 = vmatmul.msk.bf16.gmra.mxu1 %vm679_vm1, %v5232_v25  ;;  %v1598_v25 = vsel %vm5106_vm4, %v1593_v29, %v1597_v53  ;;  %v1614_v29 = vshrl.u32 %v5054_v41, 16  ;;  %v1289_v41 = vunpack.c.l.b16 %v437_v48 }
  0x8a   : > { %v5475_v13 = vunpack.c.l.b16 %v1598_v25 }
  0x8b   : > { %v1616_v38 = vrot.slane %v1614_v29, 4 }
  0x95   : > { %v705_v49 = vpop.f32.mrf.mxu0 }
  0x96   : > { %4569 = vmatmul.msk.bf16.gmra.mxu2 %vm679_vm1, %v5463_v45  ;;  %v769_v25 = vpop.f32.mrf.mxu1  ;;  %v444_v45 = vld [vmem:[%s4979_s26 + $0x14] sm:$0x1] }
  0x97   : > { %4573 = vmatmul.msk.bf16.gmra.mxu3 %vm679_vm1, %v5469_v36  ;;  %v5497_v42 = vadd.f32 %v769_v25, %v705_v49  ;;  %v7245_v25 = vunpack.c.l.b16 %v5043_v37 }
  0x98   : > { %4577 = vmatmul.msk.bf16.gmra.mxu0 %vm679_vm1, %v5490_v11 }
  0x99   : > { %v715_v19 = vpop.f32.mrf.mxu2  ;;  %4581 = vmatmul.msk.bf16.gmra.mxu1 %vm679_vm1, %v5305_v39  ;;  %v5509_v48 = vpack.c.b16 %v1289_v41, %v7245_v25 }
  0x9a   : > { %v779_v53 = vpop.f32.mrf.mxu3 }
  0x9b   : > { %v5492_v0 = vadd.f32 %v779_v53, %v715_v19  ;;  %v1620_v19 = vor.u32 %v1619_v33, %v1616_v38  ;;  %v1623_v53 = vshll.u32 %v444_v45, 16  ;;  %7246 = vst [vmem:[#allocation53_spill] sm:$0xff] %v5509_v48  ;;  %v1417_v45 = vsel %vm5106_vm4, %v1412_v16, %v1416_v60 }
  0x9d   : > { %v1621_v29 = vrot.slane %v1620_v19, 4  ;;  %v1625_v61 = vrot.slane %v1623_v53, 5  ;;  %v707_v18 = vpop.f32.mrf.mxu0  ;;  %v1418_v19 = vunpack.c.l.b16 %v1417_v45  ;;  %v446_v45 = vld [vmem:[%s4979_s26 + $0x1c] sm:$0x1] }
  0x9e   : > { %v771_v38 = vpop.f32.mrf.mxu1 }
  0x9f   : > { %v1626_v39 = vsel %vm5106_vm4, %v1621_v29, %v1625_v61  ;;  %v5519_v33 = vadd.f32 %v771_v38, %v707_v18  ;;  %v5532_v60 = vpack.c.b16 %v1418_v19, %v5362_v44  ;;  %v1631_v29 = vshll.u32 %v5057_v46, 16 }
  0xa0   : > { %v5525_v37 = vunpack.c.l.b16 %v1626_v39 }
  0xa1   : > { %v717_v55 = vpop.f32.mrf.mxu2  ;;  %7250 = vst [vmem:[#allocation56_spill] sm:$0xff] %v5532_v60  ;;  %v1633_v50 = vrot.slane %v1631_v29, 5  ;;  %v1642_v29 = vshrl.u32 %v4988_v8, 16 }
  0xa2   : > { %v781_v62 = vpop.f32.mrf.mxu3  ;;  %v5529_v16 = vpack.c.b16 %v5525_v37, %v5477_v32 }
  0xa3   : > { %v5505_v49 = vadd.f32 %v781_v62, %v717_v55  ;;  %v1628_v62 = vshrl.u32 %v5057_v46, 16  ;;  %v1637_v46 = vshll.u32 %v446_v45, 16  ;;  %v1644_v45 = vrot.slane %v1642_v29, 4 }
  0xa4   : > { %7249 = vst [vmem:[#allocation55_spill] sm:$0xff] %v5529_v16 }
  0xa5   : > { %v710_v53 = vpop.f32.mrf.mxu0  ;;  %v1630_v25 = vrot.slane %v1628_v62, 4  ;;  %v1639_v62 = vrot.slane %v1637_v46, 5  ;;  %v450_v46 = vld [vmem:[%s4979_s26 + $0x2c] sm:$0x1] }
  0xa6   : > { %4570 = vmatmul.msk.bf16.gmra.mxu2 %vm679_vm1, %v5509_v48  ;;  %v774_v61 = vpop.f32.mrf.mxu1 }
  0xa7   : > { %4574 = vmatmul.msk.bf16.gmra.mxu3 %vm679_vm1, %v5513_v10  ;;  %v5538_v18 = vadd.f32 %v774_v61, %v710_v53  ;;  %v7253_v53 = vpack.c.b16 %v5477_v32, %v5475_v13  ;;  %v1645_v61 = vshll.u32 %v4988_v8, 16  ;;  %v1656_v13 = vshrl.u32 %v4991_v9, 16 }
  0xa8   : > { %4578 = vmatmul.msk.bf16.gmra.mxu0 %vm679_vm1, %v5532_v60  ;;  %v1659_v32 = vshll.u32 %v4991_v9, 16  ;;  %v448_v9 = vld [vmem:[%s4979_s26 + $0x24] sm:$0x1] }
  0xa9   : > { %v720_v41 = vpop.f32.mrf.mxu2  ;;  %4582 = vmatmul.msk.bf16.gmra.mxu1 %vm679_vm1, %v5370_v51  ;;  %v1658_v8 = vrot.slane %v1656_v13, 4  ;;  %v1836_v13 = vshll.u32 %v5141_v58, 16 }
  0xaa   : > { %v784_v15 = vpop.f32.mrf.mxu3 }
  0xab   : > { %v5534_v55 = vadd.f32 %v784_v15, %v720_v41  ;;  %v1634_v15 = vor.u32 %v1633_v50, %v1630_v25 }
  0xad   : > { %7251 = vst [vmem:[#allocation57_spill] sm:$0xff] %v5534_v55  ;;  %v712_v39 = vpop.f32.mrf.mxu0  ;;  %v1635_v51 = vrot.slane %v1634_v15, 4 }
  0xae   : > { %v776_v41 = vpop.f32.mrf.mxu1 }
  0xaf   : > { %v5547_v48 = vadd.f32 %v776_v41, %v712_v39  ;;  %v1661_v41 = vrot.slane %v1659_v32, 5 }
  0xb1   : > { %v722_v44 = vpop.f32.mrf.mxu2  ;;  %v1662_v29 = vor.u32 %v1661_v41, %v1658_v8  ;;  %v1838_v41 = vrot.slane %v1836_v13, 5  ;;  %v1672_v13 = vrot.slane %v1670_v6, 4  ;;  %v7255_v6 = vld [vmem:[#allocation33_spill] sm:$0xff] }
  0xb2   : > { %v786_v38 = vpop.f32.mrf.mxu3 }
  0xb3   : > { %v5545_v19 = vadd.f32 %v786_v38, %v722_v44  ;;  %v1640_v44 = vsel %vm5106_vm4, %v1635_v51, %v1639_v62  ;;  %v1647_v38 = vrot.slane %v1645_v61, 5  ;;  %v1833_v61 = vshrl.u32 %v5141_v58, 16 }
  0xb4   : > { %v5573_v15 = vunpack.c.l.b16 %v1640_v44  ;;  %v1849_v58 = vrot.slane %v1847_v35, 4 }
  0xb5   : > { %7252 = vst [vmem:[#allocation58_spill] sm:$0xff] %v5545_v19  ;;  %v5565_v50 = vpop.f32.mrf.mxu0  ;;  %v1835_v8 = vrot.slane %v1833_v61, 4 }
  0xb6   : > { %4583 = vmatmul.msk.bf16.vlgmr.msrb.gmra.mxu2 %vm679_vm1, %v5029_v27  ;;  %v5569_v39 = vpop.f32.mrf.mxu1  ;;  %v1706_v44 = vpack.c.b16 %v5573_v15, %v5525_v37 }
  0xb7   : > { %4587 = vmatmul.msk.bf16.vlgmr.msrb.gmra.mxu3 %vm679_vm1, %v7253_v53  ;;  %2329 = vmatpush.bf16.msrb.mxu2 %v4947_v2  ;;  %v1648_v53 = vor.u32 %v1647_v38, %v1644_v45  ;;  %v1850_v45 = vshll.u32 %v5144_v59, 16  ;;  %v1651_v38 = vshll.u32 %v448_v9, 16  ;;  %v1673_v59 = vshll.u32 %v5027_v26, 16 }
  0xb8   : > { %2358 = vmatpush.bf16.msrb.mxu3 %v4950_v3  ;;  %4591 = vmatmul.msk.bf16.vlgmr.msrb.gmra.mxu0 %vm679_vm1, %v5189_v24  ;;  %v1839_v35 = vor.u32 %v1838_v41, %v1835_v8  ;;  %v476_v8 = vld [vmem:[%s5118_s21 + $0x4] sm:$0x1] }
  0xb9   : > { %v5559_v25 = vpop.f32.mrf.mxu2  ;;  %2387 = vmatpush.bf16.msrb.mxu0 %v4960_v5  ;;  %4595 = vmatmul.msk.bf16.vlgmr.msrb.gmra.mxu1 %vm679_vm1, %v5207_v4  ;;  %v1665_v5 = vshll.u32 %v450_v46, 16  ;;  %v1649_v3 = vrot.slane %v1648_v53, 4  ;;  %v1852_v4 = vrot.slane %v1850_v45, 5  ;;  %v1653_v37 = vrot.slane %v1651_v38, 5  ;;  %v7254_v38 = vld [vmem:[#allocation32_spill] sm:$0xff] }
  0xba   : > { %v5561_v27 = vpop.f32.mrf.mxu3  ;;  %2424 = vmatpush.bf16.msrb.mxu1 %v4967_v7  ;;  %v1663_v7 = vrot.slane %v1662_v29, 4  ;;  %v1684_v53 = vshrl.u32 %v5032_v28, 16  ;;  %v1840_v41 = vrot.slane %v1839_v35, 4 }
  0xbb   : > { %v1667_v2 = vrot.slane %v1665_v5, 5  ;;  %v1853_v61 = vor.u32 %v1852_v4, %v1849_v58  ;;  %v1654_v5 = vsel %vm5106_vm4, %v1649_v3, %v1653_v37  ;;  %v478_v3 = vld [vmem:[%s5118_s21 + $0xc] sm:$0x1]  ;;  %v452_v37 = vld [vmem:[%s4979_s26 + $0x34] sm:$0x1] }
  0xbc   : > { %v5616_v60 = vunpack.c.l.b16 %v1654_v5 }
  0xbd   : > { %v5587_v32 = vpop.f32.mrf.mxu0  ;;  %v1668_v26 = vsel %vm5106_vm4, %v1663_v7, %v1667_v2  ;;  %v1854_v58 = vrot.slane %v1853_v61, 4  ;;  %v1842_v2 = vshll.u32 %v476_v8, 16  ;;  %v1856_v7 = vshll.u32 %v478_v3, 16 }
  0xbe   : > { %v5593_v1 = vpop.f32.mrf.mxu1  ;;  %v5618_v4 = vunpack.c.l.b16 %v1668_v26  ;;  %v1679_v61 = vshll.u32 %v452_v37, 16 }
  0xc0   : > { %v1707_v35 = vpack.c.b16 %v5618_v4, %v5616_v60 }
  0xc1   : > { %v5580_v51 = vpop.f32.mrf.mxu2 }
  0xc2   : > { %v5582_v62 = vpop.f32.mrf.mxu3 }
  0xc5   : > { %v5606_v29 = vpop.f32.mrf.mxu0 }
  0xc6   : > { %4584 = vmatmul.msk.bf16.gmra.mxu2 %vm679_vm1, %v5086_v57  ;;  %v1687_v57 = vshll.u32 %v5032_v28, 16  ;;  %v5612_v45 = vpop.f32.mrf.mxu1  ;;  %v1686_v28 = vrot.slane %v1684_v53, 4  ;;  %v1844_v53 = vrot.slane %v1842_v2, 5 }
  0xc7   : > { %4588 = vmatmul.msk.bf16.gmra.mxu3 %vm679_vm1, %v1706_v44  ;;  %v1675_v44 = vrot.slane %v1673_v59, 5  ;;  %v454_v59 = vld [vmem:[%s4979_s26 + $0x3c] sm:$0x1] }
  0xc8   : > { %4592 = vmatmul.msk.bf16.gmra.mxu0 %vm679_vm1, %v7254_v38  ;;  %v1689_v24 = vrot.slane %v1687_v57, 5  ;;  %v1858_v57 = vrot.slane %v1856_v7, 5  ;;  %v1693_v8 = vshll.u32 %v454_v59, 16  ;;  %v1845_v3 = vsel %vm5106_vm4, %v1840_v41, %v1844_v53 }
  0xc9   : > { %v5600_v9 = vpop.f32.mrf.mxu2  ;;  %4596 = vmatmul.msk.bf16.gmra.mxu1 %vm679_vm1, %v7255_v6  ;;  %v1676_v5 = vor.u32 %v1675_v44, %v1672_v13  ;;  %v1944_v11 = vunpack.c.l.b16 %v1845_v3  ;;  %v7257_v13 = vld [vmem:[#allocation10_spill] sm:$0xff]  ;;  %v1681_v7 = vrot.slane %v1679_v61, 5 }
  0xca   : > { %v5602_v46 = vpop.f32.mrf.mxu3  ;;  %v1690_v26 = vor.u32 %v1689_v24, %v1686_v28  ;;  %v1859_v6 = vsel %vm5106_vm4, %v1854_v58, %v1858_v57  ;;  %v1695_v41 = vrot.slane %v1693_v8, 5  ;;  %v7259_v57 = vld [vmem:[#allocation22_spill] sm:$0xff] }
  0xcb   : > { %v5638_v55 = vunpack.c.l.b16 %v1859_v6  ;;  %v1677_v44 = vrot.slane %v1676_v5, 4  ;;  %v1864_v5 = vshll.u32 %v7259_v57, 16 }
  0xcc   : > { %v1691_v28 = vrot.slane %v1690_v26, 4 }
  0xcd   : > { %v5630_v19 = vpop.f32.mrf.mxu0  ;;  %7256 = vst [vmem:[#allocation59_spill] sm:$0xff] %v5638_v55  ;;  %v5646_v24 = vpack.c.b16 %v5638_v55, %v1944_v11  ;;  %v1682_v59 = vsel %vm5106_vm4, %v1677_v44, %v1681_v7  ;;  %v1861_v11 = vshrl.u32 %v7259_v57, 16  ;;  %v480_v44 = vld [vmem:[%s5118_s21 + $0x14] sm:$0x1]  ;;  %v1906_v55 = vshll.u32 %v5298_v17, 16 }
  0xce   : > { %v5640_v2 = vpop.f32.mrf.mxu1  ;;  %v1696_v53 = vsel %vm5106_vm4, %v1691_v28, %v1695_v41  ;;  %v5666_v61 = vunpack.c.l.b16 %v1682_v59  ;;  %v1870_v57 = vshll.u32 %v480_v44, 16  ;;  %v7263_v44 = vld [vmem:[#allocation26_spill] sm:$0xff] }
  0xcf   : > { %7258 = vst [vmem:[#allocation10_spill] sm:$0xff] %v5646_v24  ;;  %v5668_v8 = vunpack.c.l.b16 %v1696_v53  ;;  %v1863_v3 = vrot.slane %v1861_v11, 4 }
  0xd1   : > { %v5626_v10 = vpop.f32.mrf.mxu2  ;;  %7260 = vst [vmem:[#allocation22_spill] sm:$0xff] %v5668_v8  ;;  %v1708_v59 = vpack.c.b16 %v5668_v8, %v5666_v61 }
  0xd2   : > { %v5628_v38 = vpop.f32.mrf.mxu3 }
  0xd5   : > { %v5652_v6 = vpop.f32.mrf.mxu0 }
  0xd6   : > { %4585 = vmatmul.msk.bf16.gmra.mxu2 %vm679_vm1, %v7257_v13  ;;  %v5660_v26 = vpop.f32.mrf.mxu1  ;;  %v1866_v13 = vrot.slane %v1864_v5, 5  ;;  %v7262_v5 = vld [vmem:[#allocation11_spill] sm:$0xff] }
  0xd7   : > { %4589 = vmatmul.msk.bf16.gmra.mxu3 %vm679_vm1, %v1707_v35  ;;  %v4876_v35 = vmov 0  }
  0xd8   : > { %4593 = vmatmul.msk.bf16.gmra.mxu0 %vm679_vm1, %v5340_v21  ;;  %623 = vst.msk [vmem:[#allocation5] sm:$0xf] %vm511_vm5, %v4876_v35  ;;  %v1867_v53 = vor.u32 %v1866_v13, %v1863_v3  ;;  %v1872_v13 = vrot.slane %v1870_v57, 5  ;;  %v1878_v21 = vshll.u32 %v7263_v44, 16  ;;  %v960_v57 = vadd.f32 %v5559_v25, %v5497_v42 }
  0xd9   : > { %v5648_v37 = vpop.f32.mrf.mxu2  ;;  %512 = vst.msk [vmem:[#allocation2] sm:$0xf] %vm511_vm5, %v4876_v35  ;;  %4597 = vmatmul.msk.bf16.gmra.mxu1 %vm679_vm1, %v5356_v56  ;;  %v1875_v56 = vshrl.u32 %v7263_v44, 16 }
  0xda   : > { %v5650_v58 = vpop.f32.mrf.mxu3  ;;  %519 = vst.msk [vmem:[#allocation2 + $0x8] sm:$0xf] %vm511_vm5, %v4876_v35  ;;  %v1868_v3 = vrot.slane %v1867_v53, 4 }
  0xdb   : > { %523 = vst.msk [vmem:[#allocation2 + $0x10] sm:$0xf] %vm511_vm5, %v4876_v35  ;;  %v1877_v44 = vrot.slane %v1875_v56, 4  ;;  %v1032_v56 = vadd.f32 %v5561_v27, %v960_v57  ;;  %v961_v27 = vadd.f32 %v5580_v51, %v5519_v33 }
  0xdc   : > { %527 = vst.msk [vmem:[#allocation2 + $0x18] sm:$0xf] %vm511_vm5, %v4876_v35  ;;  %v1873_v53 = vsel %vm5106_vm4, %v1868_v3, %v1872_v13  ;;  %v482_v3 = vld [vmem:[%s5118_s21 + $0x1c] sm:$0x1] }
  0xdd   : > { %v5685_v41 = vpop.f32.mrf.mxu0  ;;  %531 = vst.msk [vmem:[#allocation2 + $0x20] sm:$0xf] %vm511_vm5, %v4876_v35  ;;  %v5735_v13 = vunpack.c.l.b16 %v1873_v53  ;;  %v1884_v25 = vshll.u32 %v482_v3, 16  ;;  %v1033_v33 = vadd.f32 %v5582_v62, %v961_v27  ;;  %v1892_v62 = vshll.u32 %v5291_v31, 16 }
  0xde   : > { %535 = vst.msk [vmem:[#allocation2 + $0x28] sm:$0xf] %vm511_vm5, %v4876_v35  ;;  %v5695_v11 = vpop.f32.mrf.mxu1  ;;  %v1903_v27 = vshrl.u32 %v5298_v17, 16  ;;  %v486_v17 = vld [vmem:[%s5118_s21 + $0x2c] sm:$0x1] }
  0xdf   : > { %539 = vst.msk [vmem:[#allocation2 + $0x30] sm:$0xf] %vm511_vm5, %v4876_v35  ;;  %v1886_v57 = vrot.slane %v1884_v25, 5 }
  0xe0   : > { %7261 = vst [vmem:[#allocation60_spill] sm:$0xff] %v5695_v11 }
  0xe1   : > { %v5679_v28 = vpop.f32.mrf.mxu2  ;;  %543 = vst.msk [vmem:[#allocation2 + $0x38] sm:$0xf] %vm511_vm5, %v4876_v35 }
  0xe2   : > { %v5681_v7 = vpop.f32.mrf.mxu3  ;;  %547 = vst.msk [vmem:[#allocation2 + $0x40] sm:$0xf] %vm511_vm5, %v4876_v35 }
  0xe3   : > { %551 = vst.msk [vmem:[#allocation3] sm:$0xf] %vm511_vm5, %v4876_v35 }
  0xe4   : > { %555 = vst.msk [vmem:[#allocation3 + $0x8] sm:$0xf] %vm511_vm5, %v4876_v35 }
  0xe5   : > { %559 = vst.msk [vmem:[#allocation3 + $0x10] sm:$0xf] %vm511_vm5, %v4876_v35 }
  0xe6   : > { %4586 = vmatmul.msk.bf16.gmra.mxu2 %vm679_vm1, %v7262_v5  ;;  %563 = vst.msk [vmem:[#allocation3 + $0x18] sm:$0xf] %vm511_vm5, %v4876_v35  ;;  %v5728_v11 = vpop.f32.mrf.mxu1 }
  0xe7   : > { %4590 = vmatmul.msk.bf16.gmra.mxu3 %vm679_vm1, %v1708_v59  ;;  %v5716_v59 = vpop.f32.mrf.mxu0  ;;  %567 = vst.msk [vmem:[#allocation3 + $0x20] sm:$0xf] %vm511_vm5, %v4876_v35 }
  0xe8   : > { %571 = vst.msk [vmem:[#allocation3 + $0x28] sm:$0xf] %vm511_vm5, %v4876_v35  ;;  %4594 = vmatmul.msk.bf16.gmra.mxu0 %vm679_vm1, %v5402_v63 }
  0xe9   : > { %v5710_v8 = vpop.f32.mrf.mxu2  ;;  %7265 = vst [vmem:[#allocation61_spill] sm:$0xff] %v5728_v11  ;;  %4598 = vmatmul.msk.bf16.gmra.mxu1 %vm679_vm1, %v5406_v12 }
  0xea   : > { %v5712_v5 = vpop.f32.mrf.mxu3  ;;  %575 = vst.msk [vmem:[#allocation3 + $0x30] sm:$0xf] %vm511_vm5, %v4876_v35 }
  0xeb   : > { %7264 = vst [vmem:[#allocation11_spill] sm:$0xff] %v5712_v5  ;;  %v1880_v5 = vrot.slane %v1878_v21, 5  ;;  %v1889_v21 = vshrl.u32 %v5291_v31, 16 }
  0xec   : > { %7266 = vst [vmem:[#allocation62_spill] sm:$0xff] %v5735_v13 }
  0xed   : > { %579 = vst.msk [vmem:[#allocation3 + $0x38] sm:$0xf] %vm511_vm5, %v4876_v35  ;;  %v1881_v42 = vor.u32 %v1880_v5, %v1877_v44  ;;  %v1104_v44 = vadd.f32 %v5565_v50, %v1032_v56  ;;  %v7267_v50 = vld [vmem:[#allocation18_spill] sm:$0xff] }
  0xee   : > { %583 = vst.msk [vmem:[#allocation3 + $0x40] sm:$0xf] %vm511_vm5, %v4876_v35  ;;  %v5765_v3 = vpop.f32.mrf.mxu1 }
  0xef   : > { %587 = vst.msk [vmem:[#allocation4] sm:$0xf] %vm511_vm5, %v4876_v35  ;;  %v5754_v11 = vpop.f32.mrf.mxu0  ;;  %v1882_v5 = vrot.slane %v1881_v42, 4  ;;  %v1280_v51 = vadd.f32 %v5569_v39, %v1104_v44  ;;  %v1105_v39 = vadd.f32 %v5587_v32, %v1033_v33  ;;  %v962_v44 = vadd.f32 %v5600_v9, %v5538_v18 }
  0xf0   : > { %591 = vst.msk [vmem:[#allocation4 + $0x8] sm:$0xf] %vm511_vm5, %v4876_v35  ;;  %v1891_v18 = vrot.slane %v1889_v21, 4  ;;  %v1894_v9 = vrot.slane %v1892_v62, 5  ;;  %v1908_v33 = vrot.slane %v1906_v55, 5  ;;  %v963_v21 = vadd.f32 %v5626_v10, %v5547_v48 }
  0xf1   : > { %v5748_v53 = vpop.f32.mrf.mxu2  ;;  %595 = vst.msk [vmem:[#allocation4 + $0x10] sm:$0xf] %vm511_vm5, %v4876_v35  ;;  %v1887_v56 = vsel %vm5106_vm4, %v1882_v5, %v1886_v57  ;;  %v5799_v57 = vld [vmem:[%s7073_s5] ss:$0 sm:$0xff]  ;;  %v1034_v31 = vadd.f32 %v5602_v46, %v962_v44  ;;  %v1912_v10 = vshll.u32 %v486_v17, 16 }
  0xf2   : > { %v5750_v63 = vpop.f32.mrf.mxu3  ;;  %599 = vst.msk [vmem:[#allocation4 + $0x18] sm:$0xf] %vm511_vm5, %v4876_v35 }
  0xf3   : > { %603 = vst.msk [vmem:[#allocation4 + $0x20] sm:$0xf] %vm511_vm5, %v4876_v35  ;;  %v1914_v17 = vrot.slane %v1912_v10, 5 }
  0xf4   : > { %607 = vst.msk [vmem:[#allocation4 + $0x28] sm:$0xf] %vm511_vm5, %v4876_v35 }
  0xf5   : > { %611 = vst.msk [vmem:[#allocation4 + $0x30] sm:$0xf] %vm511_vm5, %v4876_v35 }
  0xf6   : > { %4599 = vmatmul.msk.bf16.vlgmr.msra.gmra.mxu2 %vm679_vm1, %v5646_v24  ;;  %615 = vst.msk [vmem:[#allocation4 + $0x38] sm:$0xf] %vm511_vm5, %v4876_v35  ;;  %v5807_v32 = vpop.f32.mrf.mxu1 }
  0xf7   : > { %4603 = vmatmul.msk.bf16.vlgmr.msra.gmra.mxu3 %vm679_vm1, %v5074_v54  ;;  %2461 = vmatpush.bf16.msra.mxu2 %v7267_v50  ;;  %627 = vst.msk [vmem:[#allocation5 + $0x8] sm:$0xf] %vm511_vm5, %v4876_v35 }
  0xf8   : > { %2498 = vmatpush.bf16.msra.mxu3 %v5159_v34  ;;  %v1447_v34 = vpop.f32.mrf.mxu0  ;;  %631 = vst.msk [vmem:[#allocation5 + $0x10] sm:$0xf] %vm511_vm5, %v4876_v35  ;;  %4607 = vmatmul.msk.bf16.vlgmr.msra.gmra.mxu0 %vm679_vm1, %v5420_v43 }
  0xf9   : > { %v1318_v42 = vpop.f32.mrf.mxu2  ;;  %635 = vst.msk [vmem:[#allocation5 + $0x18] sm:$0xf] %vm511_vm5, %v4876_v35  ;;  %2553 = vmatpush.bf16.msra.mxu0 %v5128_v47  ;;  %4611 = vmatmul.msk.bf16.vlgmr.msra.gmra.mxu1 %vm679_vm1, %v5529_v16  ;;  %v1035_v47 = vadd.f32 %v5628_v38, %v963_v21 }
  0xfa   : > { %v1376_v25 = vpop.f32.mrf.mxu3  ;;  %v1338_v24 = vadd.f32 %v1318_v42, %v1280_v51  ;;  %639 = vst.msk [vmem:[#allocation5 + $0x20] sm:$0xf] %vm511_vm5, %v4876_v35  ;;  %v5803_v51 = vunpack.c.l.b16 %v1887_v56  ;;  %v1281_v56 = vadd.f32 %v5593_v1, %v1105_v39  ;;  %v1895_v1 = vor.u32 %v1894_v9, %v1891_v18  ;;  %2608 = vmatpush.bf16.msra.mxu1 %v5150_v20 }
  0xfb   : > { %643 = vst.msk [vmem:[#allocation5 + $0x28] sm:$0xf] %vm511_vm5, %v4876_v35  ;;  %v1107_v38 = vadd.f32 %v5630_v19, %v1035_v47  ;;  %v1934_v47 = vshll.u32 %v5382_v52, 16  ;;  %v964_v19 = vadd.f32 %v5648_v37, %v5492_v0 }
  0xfc   : > { %v1396_v5 = vadd.f32 %v1376_v25, %v1338_v24  ;;  %7268 = vst [vmem:[#allocation63_spill] sm:$0xff] %v5803_v51  ;;  %v1905_v24 = vrot.slane %v1903_v27, 4  ;;  %v484_v25 = vld [vmem:[%s5118_s21 + $0x24] sm:$0x1]  ;;  %v5827_v27 = vpack.c.b16 %v5803_v51, %v5735_v13  ;;  %v1896_v51 = vrot.slane %v1895_v1, 4 }
  0xfd   : > { %647 = vst.msk [vmem:[#allocation5 + $0x30] sm:$0xf] %vm511_vm5, %v4876_v35  ;;  %v1898_v39 = vshll.u32 %v484_v25, 16 }
  0xfe   : > { %v1467_v42 = vadd.f32 %v1447_v34, %v1396_v5  ;;  %651 = vst.msk [vmem:[#allocation5 + $0x38] sm:$0xf] %vm511_vm5, %v4876_v35  ;;  %v1909_v35 = vor.u32 %v1908_v33, %v1905_v24  ;;  %v1106_v5 = vadd.f32 %v5606_v29, %v1034_v31  ;;  %v5832_v43 = vpop.f32.mrf.mxu1 }
  0xff   : > { %7269 = vst [vmem:[#allocation64_spill] sm:$0xff] %v5827_v27  ;;  %v1900_v18 = vrot.slane %v1898_v39, 5  ;;  %v5854_v39 = vpack.c.b16 %v5616_v60, %v5573_v15  ;;  %v1936_v60 = vrot.slane %v1934_v47, 5  ;;  %v1283_v15 = vadd.f32 %v5640_v2, %v1107_v38 }
 0x100   : > { %v1479_v55 = vadd.f32 %v5799_v57, %v1467_v42  ;;  %v1449_v48 = vpop.f32.mrf.mxu0  ;;  %v1910_v24 = vrot.slane %v1909_v35, 4  ;;  %v1282_v31 = vadd.f32 %v5612_v45, %v1106_v5  ;;  %v1920_v45 = vshll.u32 %v5379_v40, 16 }
 0x101   : > { %v1320_v34 = vpop.f32.mrf.mxu2  ;;  %7270 = vst [vmem:[#allocation65_spill] sm:$0xff] %v5854_v39 }
 0x102   : > { %v1378_v62 = vpop.f32.mrf.mxu3  ;;  %vm1487_vm6 = vcmp.gt.f32.partialorder %v1479_v55, 0.0  ;;  %v1495_v46 = vmul.f32 0.2, %v1479_v55  ;;  %v1339_v44 = vadd.f32 %v1320_v34, %v1281_v56  ;;  %v1915_v34 = vsel %vm5106_vm4, %v1910_v24, %v1914_v17  ;;  %v490_v24 = vld [vmem:[%s5118_s21 + $0x3c] sm:$0x1] }
 0x103   : > { %v5862_v10 = vunpack.c.l.b16 %v1915_v34  ;;  %v1922_v37 = vrot.slane %v1920_v45, 5  ;;  %v965_v17 = vadd.f32 %v5679_v28, %v5505_v49  ;;  %v2080_v49 = vshrl.u32 %v5495_v14, 16 }
 0x104   : > { %v1503_v42 = vsel %vm1487_vm6, %v1479_v55, %v1495_v46  ;;  %v1397_v16 = vadd.f32 %v1378_v62, %v1339_v44  ;;  %v1931_v62 = vshrl.u32 %v5382_v52, 16  ;;  %v2083_v28 = vshll.u32 %v5495_v14, 16 }
 0x105   : > { %v1511_v50 = vpack.c.bf16 %v1503_v42, %v1503_v42  ;;  %7272 = vst [vmem:[#allocation67_spill] sm:$0xff] %v5862_v10  ;;  %v1036_v42 = vadd.f32 %v5650_v58, %v964_v19  ;;  %v1037_v47 = vadd.f32 %v5681_v7, %v965_v17  ;;  %vm2272_vm6 = vsmask.f32 7938 }
 0x106   : > { %v1468_v9 = vadd.f32 %v1449_v48, %v1397_v16  ;;  %4600 = vmatmul.msk.bf16.gmra.mxu2 %vm679_vm1, %v5827_v27  ;;  %v1901_v16 = vsel %vm5106_vm4, %v1896_v51, %v1900_v18  ;;  %v5856_v46 = vpop.f32.mrf.mxu1  ;;  %v1933_v5 = vrot.slane %v1931_v62, 4  ;;  %v2085_v7 = vrot.slane %v2083_v28, 5  ;;  %v7309_v27 = vld [vmem:[#allocation53_spill] sm:$0xff] }
 0x107   : > { %4604 = vmatmul.msk.bf16.gmra.mxu3 %vm679_vm1, %v5438_v30  ;;  %1519 = vst.msk [vmem:[#allocation5] sm:$0xf] %vm511_vm5, %v1511_v50  ;;  %v1917_v50 = vshrl.u32 %v5379_v40, 16  ;;  %v5860_v48 = vunpack.c.l.b16 %v1901_v16 }
 0x108   : > { %v1480_v29 = vadd.f32 %v5799_v57, %v1468_v9  ;;  %v1452_v55 = vpop.f32.mrf.mxu0  ;;  %4608 = vmatmul.msk.bf16.gmra.mxu0 %vm679_vm1, %v5450_v23  ;;  %v488_v9 = vld [vmem:[%s5118_s21 + $0x34] sm:$0x1] }
 0x109   : > { %v1323_v33 = vpop.f32.mrf.mxu2  ;;  %7271 = vst [vmem:[#allocation66_spill] sm:$0xff] %v5860_v48  ;;  %v1919_v0 = vrot.slane %v1917_v50, 4  ;;  %4612 = vmatmul.msk.bf16.gmra.mxu1 %vm679_vm1, %v5854_v39  ;;  %v5876_v2 = vpack.c.b16 %v5862_v10, %v5860_v48  ;;  %v1926_v38 = vshll.u32 %v488_v9, 16  ;;  %v1109_v9 = vadd.f32 %v5685_v41, %v1037_v47  ;;  %v7307_v10 = vld [vmem:[#allocation47_spill] sm:$0xff]  ;;  %v7308_v48 = vld [vmem:[#allocation44_spill] sm:$0xff] }
 0x10a   : > { %v1381_v25 = vpop.f32.mrf.mxu3  ;;  %vm1488_vm7 = vcmp.gt.f32.partialorder %v1480_v29, 0.0  ;;  %v1496_v56 = vmul.f32 0.2, %v1480_v29  ;;  %v1340_v21 = vadd.f32 %v1323_v33, %v1282_v31  ;;  %v556_v39 = vld [vmem:[#allocation3 + $0xc] sm:$0x1] }
 0x10b   : > { %7273 = vst [vmem:[#allocation68_spill] sm:$0xff] %v5876_v2  ;;  %v1923_v58 = vor.u32 %v1922_v37, %v1919_v0  ;;  %v2082_v0 = vrot.slane %v2080_v49, 4  ;;  %v7280_v49 = vld [vmem:[#allocation11_spill] sm:$0xff] }
 0x10c   : > { %v1504_v1 = vsel %vm1488_vm7, %v1480_v29, %v1496_v56  ;;  %v1398_v51 = vadd.f32 %v1381_v25, %v1340_v21  ;;  %v1937_v56 = vor.u32 %v1936_v60, %v1933_v5  ;;  %v1940_v21 = vshll.u32 %v490_v24, 16  ;;  %vm6149_vm7 = vmand %vm511_vm5, %vm2272_vm6 }
 0x10d   : > { %v1512_v35 = vpack.c.bf16 %v1504_v1, %v1504_v1  ;;  %v1928_v1 = vrot.slane %v1926_v38, 5  ;;  %v7276_v38 = vld [vmem:[#allocation52_spill] sm:$0xff]  ;;  %v2086_v41 = vor.u32 %v2085_v7, %v2082_v0 }
 0x10e   : > { %v1469_v44 = vadd.f32 %v1452_v55, %v1398_v51  ;;  %v1108_v55 = vadd.f32 %v5652_v6, %v1036_v42  ;;  %v5881_v62 = vpop.f32.mrf.mxu1  ;;  %v1924_v6 = vrot.slane %v1923_v58, 4  ;;  %v1938_v51 = vrot.slane %v1937_v56, 4 }
 0x10f   : > { %1520 = vst.msk [vmem:[#allocation5 + $0x8] sm:$0xf] %vm511_vm5, %v1512_v35  ;;  %v1942_v35 = vrot.slane %v1940_v21, 5  ;;  %v2087_v47 = vrot.slane %v2086_v41, 4 }
 0x110   : > { %v1481_v18 = vadd.f32 %v5799_v57, %v1469_v44  ;;  %v1454_v16 = vpop.f32.mrf.mxu0  ;;  %v1284_v14 = vadd.f32 %v5660_v26, %v1108_v55  ;;  %v1929_v24 = vsel %vm5106_vm4, %v1924_v6, %v1928_v1  ;;  %v7274_v26 = vld [vmem:[#allocation57_spill] sm:$0xff] }
 0x111   : > { %v1325_v31 = vpop.f32.mrf.mxu2  ;;  %v1943_v17 = vsel %vm5106_vm4, %v1938_v51, %v1942_v35  ;;  %v5907_v55 = vunpack.c.l.b16 %v1929_v24 }
 0x112   : > { %v1383_v29 = vpop.f32.mrf.mxu3  ;;  %vm1489_vm8 = vcmp.gt.f32.partialorder %v1481_v18, 0.0  ;;  %v1497_v33 = vmul.f32 0.2, %v1481_v18  ;;  %v1341_v25 = vadd.f32 %v1325_v31, %v1283_v15  ;;  %v966_v31 = vadd.f32 %v5710_v8, %v7274_v26  ;;  %v7279_v8 = vld [vmem:[#allocation60_spill] sm:$0xff] }
 0x113   : > { %7277 = vst [vmem:[#allocation52_spill] sm:$0xff] %v5907_v55 }
 0x114   : > { %v1505_v34 = vsel %vm1489_vm8, %v1481_v18, %v1497_v33  ;;  %v1399_v50 = vadd.f32 %v1383_v29, %v1341_v25  ;;  %v456_v18 = vld [vmem:[%s4979_s26 + $0x44] sm:$0x1]  ;;  %v5901_v25 = vpack.c.b16 %v5666_v61, %v5618_v4  ;;  %v1038_v4 = vadd.f32 %v7280_v49, %v966_v31 }
 0x115   : > { %v1513_v45 = vpack.c.bf16 %v1505_v34, %v1505_v34  ;;  %v2089_v56 = vshll.u32 %v456_v18, 16  ;;  %v5909_v34 = vunpack.c.l.b16 %v1943_v17  ;;  %v7283_v18 = vld [vmem:[#allocation54_spill] sm:$0xff] }
 0x116   : > { %v1470_v19 = vadd.f32 %v1454_v16, %v1399_v50  ;;  %4601 = vmatmul.msk.bf16.gmra.mxu2 %vm679_vm1, %v5876_v2  ;;  %7275 = vst [vmem:[#allocation57_spill] sm:$0xff] %v5901_v25  ;;  %v5903_v58 = vpop.f32.mrf.mxu1  ;;  %v1285_v50 = vadd.f32 %v7279_v8, %v1109_v9  ;;  %v7285_v8 = vld [vmem:[#allocation22_spill] sm:$0xff]  ;;  %v568_v2 = vld [vmem:[#allocation3 + $0x24] sm:$0x1] }
 0x117   : > { %4605 = vmatmul.msk.bf16.gmra.mxu3 %vm679_vm1, %v5469_v36  ;;  %1521 = vst.msk [vmem:[#allocation5 + $0x10] sm:$0xf] %vm511_vm5, %v1513_v45  ;;  %v5919_v35 = vpack.c.b16 %v5909_v34, %v5907_v55 }
 0x118   : > { %v1482_v44 = vadd.f32 %v5799_v57, %v1470_v19  ;;  %v1457_v42 = vpop.f32.mrf.mxu0  ;;  %4609 = vmatmul.msk.bf16.gmra.mxu0 %vm679_vm1, %v7276_v38  ;;  %7278 = vst [vmem:[#allocation69_spill] sm:$0xff] %v5909_v34  ;;  %v2091_v19 = vrot.slane %v2089_v56, 5 }
 0x119   : > { %v1328_v37 = vpop.f32.mrf.mxu2  ;;  %4613 = vmatmul.msk.bf16.gmra.mxu1 %vm679_vm1, %v5901_v25  ;;  %7281 = vst [vmem:[#allocation60_spill] sm:$0xff] %v5919_v35 }
 0x11a   : > { %v1386_v5 = vpop.f32.mrf.mxu3  ;;  %vm1490_vm9 = vcmp.gt.f32.partialorder %v1482_v44, 0.0  ;;  %v1498_v60 = vmul.f32 0.2, %v1482_v44  ;;  %v1342_v15 = vadd.f32 %v1328_v37, %v1284_v14  ;;  %v1110_v14 = vadd.f32 %v5716_v59, %v1038_v4  ;;  %v7284_v59 = vld [vmem:[#allocation61_spill] sm:$0xff] }
 0x11c   : > { %v1506_v29 = vsel %vm1490_vm9, %v1482_v44, %v1498_v60  ;;  %v1400_v33 = vadd.f32 %v1386_v5, %v1342_v15  ;;  %v7282_v44 = vld [vmem:[#allocation58_spill] sm:$0xff]  ;;  %v2092_v15 = vsel %vm5106_vm4, %v2087_v47, %v2091_v19  ;;  %v1286_v9 = vadd.f32 %v7284_v59, %v1110_v14 }
 0x11d   : > { %v1514_v16 = vpack.c.bf16 %v1506_v29, %v1506_v29  ;;  %v967_v0 = vadd.f32 %v5748_v53, %v7282_v44  ;;  %v2093_v17 = vunpack.c.l.b16 %v2092_v15  ;;  %v7291_v15 = vld [vmem:[#allocation6_spill] sm:$0xff] }
 0x11e   : > { %v1471_v21 = vadd.f32 %v1457_v42, %v1400_v33  ;;  %v5924_v60 = vpop.f32.mrf.mxu1 }
 0x11f   : > { %1522 = vst.msk [vmem:[#allocation5 + $0x18] sm:$0xf] %vm511_vm5, %v1514_v16  ;;  %v1039_v53 = vadd.f32 %v5750_v63, %v967_v0  ;;  %v7287_v63 = vld [vmem:[#allocation56_spill] sm:$0xff] }
 0x120   : > { %v1483_v61 = vadd.f32 %v5799_v57, %v1471_v21  ;;  %v1459_v51 = vpop.f32.mrf.mxu0 }
 0x121   : > { %v1330_v28 = vpop.f32.mrf.mxu2  ;;  %v1111_v41 = vadd.f32 %v5754_v11, %v1039_v53 }
 0x122   : > { %v1388_v45 = vpop.f32.mrf.mxu3  ;;  %vm1491_vm10 = vcmp.gt.f32.partialorder %v1483_v61, 0.0  ;;  %v1499_v6 = vmul.f32 0.2, %v1483_v61  ;;  %v1343_v1 = vadd.f32 %v1330_v28, %v1285_v50  ;;  %v5938_v50 = vpack.c.b16 %v2093_v17, %v7285_v8 }
 0x123   : > { %v1287_v28 = vadd.f32 %v5765_v3, %v1111_v41  ;;  %v7289_v3 = vld [vmem:[#allocation16_spill] sm:$0xff] }
 0x124   : > { %v1507_v7 = vsel %vm1491_vm10, %v1483_v61, %v1499_v6  ;;  %v1401_v37 = vadd.f32 %v1388_v45, %v1343_v1  ;;  %7286 = vst [vmem:[#allocation11_spill] sm:$0xff] %v5938_v50 }
 0x125   : > { %v1515_v5 = vpack.c.bf16 %v1507_v7, %v1507_v7 }
 0x126   : > { %v1472_v42 = vadd.f32 %v1459_v51, %v1401_v37  ;;  %4602 = vmatmul.msk.bf16.gmra.mxu2 %vm679_vm1, %v5919_v35  ;;  %v5940_v4 = vpop.f32.mrf.mxu1  ;;  %v7288_v37 = vld [vmem:[#allocation20_spill] sm:$0xff]  ;;  %v560_v35 = vld [vmem:[#allocation3 + $0x14] sm:$0x1] }
 0x127   : > { %4606 = vmatmul.msk.bf16.gmra.mxu3 %vm679_vm1, %v7283_v18  ;;  %1523 = vst.msk [vmem:[#allocation5 + $0x20] sm:$0xf] %vm511_vm5, %v1515_v5  ;;  %v7290_v5 = vld [vmem:[#allocation39_spill] sm:$0xff] }
 0x128   : > { %v1484_v24 = vadd.f32 %v5799_v57, %v1472_v42  ;;  %v1462_v16 = vpop.f32.mrf.mxu0  ;;  %4610 = vmatmul.msk.bf16.gmra.mxu0 %vm679_vm1, %v7287_v63 }
 0x129   : > { %v1333_v26 = vpop.f32.mrf.mxu2  ;;  %4614 = vmatmul.msk.bf16.gmra.mxu1 %vm679_vm1, %v5938_v50 }
 0x12a   : > { %v1391_v31 = vpop.f32.mrf.mxu3  ;;  %vm1492_vm11 = vcmp.gt.f32.partialorder %v1484_v24, 0.0  ;;  %v1500_v29 = vmul.f32 0.2, %v1484_v24  ;;  %v1344_v33 = vadd.f32 %v1333_v26, %v1286_v9 }
 0x12c   : > { %v1508_v56 = vsel %vm1492_vm11, %v1484_v24, %v1500_v29  ;;  %v1402_v21 = vadd.f32 %v1391_v31, %v1344_v33  ;;  %v7292_v29 = vld [vmem:[#allocation23_spill] sm:$0xff] }
 0x12d   : > { %v1516_v49 = vpack.c.bf16 %v1508_v56, %v1508_v56  ;;  %v7293_v33 = vld [vmem:[#allocation7_spill] sm:$0xff]  ;;  %v7295_v56 = vld [vmem:[#allocation8_spill] sm:$0xff] }
 0x12e   : > { %v1473_v61 = vadd.f32 %v1462_v16, %v1402_v21  ;;  %v5949_v0 = vpop.f32.mrf.mxu1  ;;  %v7294_v16 = vld [vmem:[#allocation13_spill] sm:$0xff] }
 0x12f   : > { %1524 = vst.msk [vmem:[#allocation5 + $0x28] sm:$0xf] %vm511_vm5, %v1516_v49  ;;  %v7296_v49 = vld [vmem:[#allocation32_spill] sm:$0xff] }
 0x130   : > { %v1485_v45 = vadd.f32 %v5799_v57, %v1473_v61  ;;  %v1464_v1 = vpop.f32.mrf.mxu0  ;;  %v7297_v61 = vld [vmem:[#allocation25_spill] sm:$0xff] }
 0x131   : > { %v1335_v11 = vpop.f32.mrf.mxu2 }
 0x132   : > { %v1393_v47 = vpop.f32.mrf.mxu3  ;;  %vm1493_vm12 = vcmp.gt.f32.partialorder %v1485_v45, 0.0  ;;  %v1501_v19 = vmul.f32 0.2, %v1485_v45  ;;  %v1345_v6 = vadd.f32 %v1335_v11, %v1287_v28 }
 0x134   : > { %v1509_v51 = vsel %vm1493_vm12, %v1485_v45, %v1501_v19  ;;  %v1403_v14 = vadd.f32 %v1393_v47, %v1345_v6  ;;  %v7298_v19 = vld [vmem:[#allocation33_spill] sm:$0xff]  ;;  %v7299_v6 = vld [vmem:[#allocation50_spill] sm:$0xff] }
 0x135   : > { %v1517_v44 = vpack.c.bf16 %v1509_v51, %v1509_v51 }
 0x136   : > { %v1474_v7 = vadd.f32 %v1464_v1, %v1403_v14  ;;  %4615 = vmatmul.msk.bf16.vlgmr.msrb.gmra.mxu2 %vm679_vm1, %v7288_v37  ;;  %v5961_v31 = vpop.f32.mrf.mxu1  ;;  %v561_v37 = vsel %vm6016_vm2, 0, %v560_v35 }
 0x137   : > { %4619 = vmatmul.msk.bf16.vlgmr.msrb.gmra.mxu3 %vm679_vm1, %v7289_v3  ;;  %1525 = vst.msk [vmem:[#allocation5 + $0x30] sm:$0xf] %vm511_vm5, %v1517_v44  ;;  %2676 = vmatpush.bf16.msrb.mxu2 %v7290_v5  ;;  %v7301_v3 = vld [vmem:[#allocation37_spill] sm:$0xff]  ;;  %v569_v5 = vsel %vm6016_vm2, 0, %v568_v2 }
 0x138   : > { %2766 = vmatpush.bf16.msrb.mxu3 %v7291_v15  ;;  %v1486_v42 = vadd.f32 %v5799_v57, %v1474_v7  ;;  %v5959_v24 = vpop.f32.mrf.mxu0  ;;  %4623 = vmatmul.msk.bf16.vlgmr.msrb.gmra.mxu0 %vm679_vm1, %v7292_v29  ;;  %v7300_v7 = vld [vmem:[#allocation40_spill] sm:$0xff]  ;;  %562 = vst [vmem:[#allocation3 + $0x14] sm:$0x1] %v561_v37  ;;  %v7310_v2 = vld [vmem:[#allocation49_spill] sm:$0xff] }
 0x139   : > { %v1565_v59 = vpop.f32.mrf.mxu2  ;;  %2795 = vmatpush.bf16.msrb.mxu0 %v7293_v33  ;;  %4627 = vmatmul.msk.bf16.vlgmr.msrb.gmra.mxu1 %vm679_vm1, %v7294_v16  ;;  %v588_v33 = vld [vmem:[#allocation4 + $0x4] sm:$0x1]  ;;  %v7303_v16 = vmov 0  ;;  %570 = vst [vmem:[#allocation3 + $0x24] sm:$0x1] %v569_v5 }
 0x13a   : > { %v1730_v9 = vpop.f32.mrf.mxu3  ;;  %vm1494_vm13 = vcmp.gt.f32.partialorder %v1486_v42, 0.0  ;;  %v1502_v53 = vmul.f32 0.2, %v1486_v42  ;;  %2824 = vmatpush.bf16.msrb.mxu1 %v7295_v56  ;;  %v7304_v16 = vsel %vm6016_vm2, 4294967295, %v7303_v16  ;;  %v7306_v56 = vld [vmem:[#allocation51_spill] sm:$0xff]  ;;  %v1566_v50 = vadd.f32 %v1565_v59, %v5807_v32 }
 0x13b   : > { %7305 = vst [vmem:[#allocation58_spill] sm:$0xff] %v7304_v16 }
 0x13c   : > { %v1510_v17 = vsel %vm1494_vm13, %v1486_v42, %v1502_v53 }
 0x13d   : > { %v1518_v26 = vpack.c.bf16 %v1510_v17, %v1510_v17 }
 0x13e   : > { %v5976_v8 = vpop.f32.mrf.mxu1 }
 0x13f   : > { %1526 = vst.msk [vmem:[#allocation5 + $0x38] sm:$0xf] %vm511_vm5, %v1518_v26  ;;  %v7302_v26 = vld [vmem:[#allocation43_spill] sm:$0xff] }
 0x140   : > { %v5974_v21 = vpop.f32.mrf.mxu0 }
 0x141   : > { %v5969_v57 = vpop.f32.mrf.mxu2 }
 0x142   : > { %v5971_v41 = vpop.f32.mrf.mxu3 }
 0x146   : > { %4616 = vmatmul.msk.bf16.gmra.mxu2 %vm679_vm1, %v7296_v49  ;;  %v5988_v47 = vpop.f32.mrf.mxu1 }
 0x147   : > { %4620 = vmatmul.msk.bf16.gmra.mxu3 %vm679_vm1, %v7297_v61  ;;  %v589_v61 = vsel %vm6016_vm2, 0, %v588_v33 }
 0x148   : > { %v5986_v11 = vpop.f32.mrf.mxu0  ;;  %4624 = vmatmul.msk.bf16.gmra.mxu0 %vm679_vm1, %v7298_v19  ;;  %590 = vst [vmem:[#allocation4 + $0x4] sm:$0x1] %v589_v61  ;;  %v552_v61 = vld [vmem:[#allocation3 + $0x4] sm:$0x1]  ;;  %v557_v19 = vsel %vm6016_vm2, 0, %v556_v39  ;;  %v1568_v39 = vadd.f32 %v5969_v57, %v5832_v43  ;;  %v7311_v57 = vld [vmem:[#allocation9_spill] sm:$0xff] }
 0x149   : > { %v5982_v28 = vpop.f32.mrf.mxu2  ;;  %4628 = vmatmul.msk.bf16.gmra.mxu1 %vm679_vm1, %v7299_v6  ;;  %558 = vst [vmem:[#allocation3 + $0xc] sm:$0x1] %v557_v19  ;;  %v636_v19 = vld [vmem:[#allocation5 + $0x1c] sm:$0x1] }
 0x14a   : > { %v5984_v45 = vpop.f32.mrf.mxu3 }
 0x14e   : > { %v6000_v44 = vpop.f32.mrf.mxu1 }
 0x150   : > { %v5998_v14 = vpop.f32.mrf.mxu0 }
 0x151   : > { %v5994_v1 = vpop.f32.mrf.mxu2 }
 0x152   : > { %v5996_v51 = vpop.f32.mrf.mxu3 }
 0x156   : > { %4617 = vmatmul.msk.bf16.gmra.mxu2 %vm679_vm1, %v7300_v7  ;;  %v6012_v17 = vpop.f32.mrf.mxu1  ;;  %v592_v7 = vld [vmem:[#allocation4 + $0xc] sm:$0x1] }
 0x157   : > { %4621 = vmatmul.msk.bf16.gmra.mxu3 %vm679_vm1, %v7301_v3  ;;  %v593_v32 = vsel %vm6016_vm2, 0, %v592_v7  ;;  %v584_v7 = vld [vmem:[#allocation3 + $0x44] sm:$0x1] }
 0x158   : > { %v6010_v53 = vpop.f32.mrf.mxu0  ;;  %4625 = vmatmul.msk.bf16.gmra.mxu0 %vm679_vm1, %v7302_v26  ;;  %v1750_v26 = vadd.f32 %v1730_v9, %v1566_v50  ;;  %594 = vst [vmem:[#allocation4 + $0xc] sm:$0x1] %v593_v32  ;;  %v580_v50 = vld [vmem:[#allocation3 + $0x3c] sm:$0x1]  ;;  %v624_v32 = vld [vmem:[#allocation5 + $0x4] sm:$0x1] }
 0x159   : > { %v6006_v15 = vpop.f32.mrf.mxu2  ;;  %4629 = vmatmul.msk.bf16.gmra.mxu1 %vm679_vm1, %v7306_v56  ;;  %v581_v43 = vsel %vm6016_vm2, 0, %v580_v50  ;;  %v585_v37 = vsel %vm6016_vm2, 0, %v584_v7  ;;  %v640_v50 = vld [vmem:[#allocation5 + $0x24] sm:$0x1]  ;;  %v625_v7 = vsel %vm6016_vm2, 0, %v624_v32 }
 0x15a   : > { %v6008_v42 = vpop.f32.mrf.mxu3  ;;  %v1787_v20 = vadd.f32 %v5959_v24, %v1750_v26  ;;  %v632_v24 = vld [vmem:[#allocation5 + $0x14] sm:$0x1]  ;;  %582 = vst [vmem:[#allocation3 + $0x3c] sm:$0x1] %v581_v43  ;;  %v656_v43 = vld [vmem:[#allocation5 + $0x44] sm:$0x1] }
 0x15b   : > { %586 = vst [vmem:[#allocation3 + $0x44] sm:$0x1] %v585_v37  ;;  %v7313_v37 = vld [vmem:[#allocation24_spill] sm:$0xff] }
 0x15c   : > { %v1824_v26 = vadd.f32 %v5961_v31, %v1787_v20  ;;  %v648_v20 = vld [vmem:[#allocation5 + $0x34] sm:$0x1]  ;;  %v633_v31 = vsel %vm6016_vm2, 0, %v632_v24  ;;  %626 = vst [vmem:[#allocation5 + $0x4] sm:$0x1] %v625_v7 }
 0x15d   : > { %634 = vst [vmem:[#allocation5 + $0x14] sm:$0x1] %v633_v31  ;;  %v600_v7 = vld [vmem:[#allocation4 + $0x1c] sm:$0x1] }
 0x15e   : > { %v6030_v55 = vpop.f32.mrf.mxu1 }
 0x160   : > { %v6028_v34 = vpop.f32.mrf.mxu0 }
 0x161   : > { %v6024_v6 = vpop.f32.mrf.mxu2 }
 0x162   : > { %v6026_v3 = vpop.f32.mrf.mxu3 }
 0x166   : > { %4618 = vmatmul.msk.bf16.gmra.mxu2 %vm679_vm1, %v7307_v10  ;;  %v6043_v25 = vpop.f32.mrf.mxu1  ;;  %v564_v10 = vld [vmem:[#allocation3 + $0x1c] sm:$0x1] }
 0x167   : > { %4622 = vmatmul.msk.bf16.gmra.mxu3 %vm679_vm1, %v7308_v48  ;;  %v572_v48 = vld [vmem:[#allocation3 + $0x2c] sm:$0x1] }
 0x168   : > { %v6040_v33 = vpop.f32.mrf.mxu0  ;;  %4626 = vmatmul.msk.bf16.gmra.mxu0 %vm679_vm1, %v5406_v12  ;;  %v553_v12 = vsel %vm6016_vm2, 0, %v552_v61  ;;  %v620_v61 = vld [vmem:[#allocation4 + $0x44] sm:$0x1]  ;;  %v573_v35 = vsel %vm6016_vm2, 0, %v572_v48  ;;  %v1751_v48 = vadd.f32 %v5971_v41, %v1568_v39  ;;  %v1571_v39 = vadd.f32 %v5982_v28, %v5856_v46  ;;  %v7314_v28 = vld [vmem:[#allocation19_spill] sm:$0xff] }
 0x169   : > { %v6036_v13 = vpop.f32.mrf.mxu2  ;;  %4630 = vmatmul.msk.bf16.gmra.mxu1 %vm679_vm1, %v7309_v27  ;;  %v565_v27 = vsel %vm6016_vm2, 0, %v564_v10  ;;  %554 = vst [vmem:[#allocation3 + $0x4] sm:$0x1] %v553_v12  ;;  %v577_v12 = vsel %vm6016_vm2, 0, %v576_v22  ;;  %v628_v10 = vld [vmem:[#allocation5 + $0xc] sm:$0x1] }
 0x16a   : > { %v6038_v56 = vpop.f32.mrf.mxu3  ;;  %566 = vst [vmem:[#allocation3 + $0x1c] sm:$0x1] %v565_v27  ;;  %v7312_v22 = vld [vmem:[#allocation18_spill] sm:$0xff]  ;;  %v621_v27 = vsel %vm6016_vm2, 0, %v620_v61  ;;  %v652_v41 = vld [vmem:[#allocation5 + $0x3c] sm:$0x1]  ;;  %v1788_v61 = vadd.f32 %v5974_v21, %v1751_v48 }
 0x16b   : > { %574 = vst [vmem:[#allocation3 + $0x2c] sm:$0x1] %v573_v35  ;;  %v644_v35 = vld [vmem:[#allocation5 + $0x2c] sm:$0x1]  ;;  %v6108_v21 = vld [vmem:[%s7073_s5] ss:$0 sm:$0xff] }
 0x16c   : > { %578 = vst [vmem:[#allocation3 + $0x34] sm:$0x1] %v577_v12  ;;  %v637_v12 = vsel %vm6016_vm2, 0, %v636_v19  ;;  %v645_v46 = vsel %vm6016_vm2, 0, %v644_v35  ;;  %v596_v19 = vld [vmem:[#allocation4 + $0x14] sm:$0x1]  ;;  %v1825_v48 = vadd.f32 %v5976_v8, %v1788_v61  ;;  %v1573_v61 = vadd.f32 %v5994_v1, %v5881_v62 }
 0x16d   : > { %622 = vst [vmem:[#allocation4 + $0x44] sm:$0x1] %v621_v27  ;;  %v657_v35 = vsel %vm6016_vm2, 0, %v656_v43 }
 0x16e   : > { %v6072_v29 = vpop.f32.mrf.mxu1  ;;  %638 = vst [vmem:[#allocation5 + $0x1c] sm:$0x1] %v637_v12  ;;  %v1753_v62 = vadd.f32 %v5996_v51, %v1573_v61  ;;  %v2277_v61 = vld [vmem:[#allocation4 + $0x4] sm:$0x1] }
 0x16f   : > { %646 = vst [vmem:[#allocation5 + $0x2c] sm:$0x1] %v645_v46 }
 0x170   : > { %v6061_v9 = vpop.f32.mrf.mxu0  ;;  %658 = vst [vmem:[#allocation5 + $0x44] sm:$0x1] %v657_v35 }
 0x171   : > { %v6051_v59 = vpop.f32.mrf.mxu2 }
 0x172   : > { %v6053_v49 = vpop.f32.mrf.mxu3 }
 0x176   : > { %4631 = vmatmul.msk.bf16.vlgmr.msra.gmra.mxu2 %vm679_vm1, %v5074_v54 }
 0x177   : > { %4635 = vmatmul.msk.bf16.vlgmr.msra.gmra.mxu3 %vm679_vm1, %v7310_v2  ;;  %2861 = vmatpush.bf16.msra.mxu2 %v7311_v57 }
 0x178   : > { %2898 = vmatpush.bf16.msra.mxu3 %v7312_v22  ;;  %v2051_v54 = vpop.f32.mrf.mxu0  ;;  %v629_v22 = vsel %vm6016_vm2, 0, %v628_v10  ;;  %v641_v10 = vsel %vm6016_vm2, 0, %v640_v50  ;;  %4639 = vmatmul.msk.bf16.vlgmr.msra.gmra.mxu0 %vm679_vm1, %v7313_v37  ;;  %v653_v50 = vsel %vm6016_vm2, 0, %v652_v41  ;;  %v597_v41 = vsel %vm6016_vm2, 0, %v596_v19 }
 0x179   : > { %v1977_v5 = vpop.f32.mrf.mxu2  ;;  %630 = vst [vmem:[#allocation5 + $0xc] sm:$0x1] %v629_v22  ;;  %2935 = vmatpush.bf16.msra.mxu0 %v7314_v28 }
 0x17a   : > { %v2014_v2 = vpop.f32.mrf.mxu3  ;;  %v1997_v57 = vadd.f32 %v1977_v5, %v1824_v26  ;;  %v2119_v26 = vpop.f32.mrf.mxu1  ;;  %642 = vst [vmem:[#allocation5 + $0x24] sm:$0x1] %v641_v10  ;;  %v7315_v5 = vld [vmem:[#allocation27_spill] sm:$0xff] }
 0x17b   : > { %4643 = vmatmul.msk.bf16.vlgmr.msra.gmra.mxu1 %vm679_vm1, %v7315_v5  ;;  %654 = vst [vmem:[#allocation5 + $0x3c] sm:$0x1] %v653_v50  ;;  %v7319_v50 = vld [vmem:[#allocation28_spill] sm:$0xff] }
 0x17c   : > { %v2034_v32 = vadd.f32 %v2014_v2, %v1997_v57  ;;  %v649_v2 = vsel %vm6016_vm2, 0, %v648_v20  ;;  %v7316_v20 = vld [vmem:[#allocation15_spill] sm:$0xff]  ;;  %598 = vst [vmem:[#allocation4 + $0x14] sm:$0x1] %v597_v41  ;;  %v7321_v41 = vmov 0 }
 0x17d   : > { %2972 = vmatpush.bf16.msra.mxu1 %v7316_v20  ;;  %650 = vst [vmem:[#allocation5 + $0x34] sm:$0x1] %v649_v2  ;;  %v1576_v20 = vadd.f32 %v6006_v15, %v5903_v58  ;;  %v7322_v41 = vsel %vm6149_vm7, 4294967295, %v7321_v41 }
 0x17e   : > { %v2071_v24 = vadd.f32 %v2051_v54, %v2034_v32  ;;  %v1752_v54 = vadd.f32 %v5984_v45, %v1571_v39  ;;  %v601_v39 = vsel %vm6016_vm2, 0, %v600_v7  ;;  %v7320_v7 = vunpack.c.l.b16 %v7319_v50  ;;  %7323 = vst [vmem:[#allocation54_spill] sm:$0xff] %v7322_v41 }
 0x17f   : > { %602 = vst [vmem:[#allocation4 + $0x1c] sm:$0x1] %v601_v39 }
 0x180   : > { %v2139_v27 = vadd.f32 %v2119_v26, %v2071_v24  ;;  %v2053_v31 = vpop.f32.mrf.mxu0  ;;  %v1789_v32 = vadd.f32 %v5986_v11, %v1752_v54  ;;  %v604_v24 = vld [vmem:[#allocation4 + $0x24] sm:$0x1]  ;;  %v7317_v54 = vld [vmem:[#allocation21_spill] sm:$0xff] }
 0x181   : > { %v1979_v57 = vpop.f32.mrf.mxu2  ;;  %v605_v28 = vsel %vm6016_vm2, 0, %v604_v24 }
 0x182   : > { %v2016_v22 = vpop.f32.mrf.mxu3  ;;  %v2151_v8 = vadd.f32 %v6108_v21, %v2139_v27  ;;  %v1998_v45 = vadd.f32 %v1979_v57, %v1825_v48  ;;  %v2121_v26 = vpop.f32.mrf.mxu1  ;;  %v1826_v11 = vadd.f32 %v5988_v47, %v1789_v32  ;;  %v7318_v27 = vunpack.c.l.b16 %v7317_v54  ;;  %606 = vst [vmem:[#allocation4 + $0x24] sm:$0x1] %v605_v28  ;;  %v608_v28 = vld [vmem:[#allocation4 + $0x2c] sm:$0x1] }
 0x183   : > { %v1790_v47 = vadd.f32 %v5998_v14, %v1753_v62  ;;  %v609_v54 = vsel %vm6016_vm2, 0, %v608_v28 }
 0x184   : > { %vm2159_vm3 = vcmp.gt.f32.partialorder %v2151_v8, 0.0  ;;  %v2167_v12 = vmul.f32 0.2, %v2151_v8  ;;  %v2035_v43 = vadd.f32 %v2016_v22, %v1998_v45  ;;  %v2531_v35 = vpack.c.b16 %v7320_v7, %v7318_v27  ;;  %610 = vst [vmem:[#allocation4 + $0x2c] sm:$0x1] %v609_v54 }
 0x186   : > { %v2175_v10 = vsel %vm2159_vm3, %v2151_v8, %v2167_v12  ;;  %v2072_v37 = vadd.f32 %v2053_v31, %v2035_v43  ;;  %4632 = vmatmul.msk.bf16.gmra.mxu2 %vm679_vm1, %v5438_v30  ;;  %v2274_v31 = vld [vmem:[#allocation4] sm:$0xf]  ;;  %v7324_v12 = vld [vmem:[#allocation26_spill] sm:$0xff] }
 0x187   : > { %4636 = vmatmul.msk.bf16.gmra.mxu3 %vm679_vm1, %v5450_v23  ;;  %v2183_v1 = vpack.c.bf16 %v2175_v10, %v2175_v10  ;;  %v7325_v43 = vunpack.c.l.b16 %v7324_v12 }
 0x188   : > { %v2140_v46 = vadd.f32 %v2121_v26, %v2072_v37  ;;  %v2056_v22 = vpop.f32.mrf.mxu0  ;;  %v7326_v26 = vld [vmem:[#allocation34_spill] sm:$0xff]  ;;  %4640 = vmatmul.msk.bf16.gmra.mxu0 %vm679_vm1, %v2531_v35 }
 0x189   : > { %v2192_v2 = vshrl.u32 %v2183_v1, 16  ;;  %v1982_v19 = vpop.f32.mrf.mxu2  ;;  %v2195_v45 = vshll.u32 %v2183_v1, 16  ;;  %v7327_v10 = vunpack.c.l.b16 %v7326_v26 }
 0x18a   : > { %v2019_v48 = vpop.f32.mrf.mxu3  ;;  %v2152_v51 = vadd.f32 %v6108_v21, %v2140_v46  ;;  %v1999_v57 = vadd.f32 %v1982_v19, %v1826_v11  ;;  %v2124_v15 = vpop.f32.mrf.mxu1  ;;  %v1754_v19 = vadd.f32 %v6008_v42, %v1576_v20 }
 0x18b   : > { %v2194_v8 = vrot.slane %v2192_v2, 7  ;;  %v6157_v14 = vpack.c.b16 %v7327_v10, %v7325_v43  ;;  %v1827_v2 = vadd.f32 %v6000_v44, %v1790_v47  ;;  %v1578_v44 = vadd.f32 %v6024_v6, %v5924_v60  ;;  %v2280_v47 = vld [vmem:[#allocation4 + $0x8] sm:$0xf]  ;;  %v612_v10 = vld [vmem:[#allocation4 + $0x34] sm:$0x1] }
 0x18c   : > { %vm2160_vm8 = vcmp.gt.f32.partialorder %v2152_v51, 0.0  ;;  %v2168_v39 = vmul.f32 0.2, %v2152_v51  ;;  %v2036_v32 = vadd.f32 %v2019_v48, %v1999_v57  ;;  %v1791_v20 = vadd.f32 %v6010_v53, %v1754_v19 }
 0x18d   : > { %v2197_v37 = vor.u32 %v2195_v45, %v2194_v8  ;;  %v2198_v58 = vrot.slane %v2194_v8, 4  ;;  %4644 = vmatmul.msk.bf16.gmra.mxu1 %vm679_vm1, %v6157_v14  ;;  %v2283_v8 = vld [vmem:[#allocation4 + $0xc] sm:$0x1]  ;;  %v1755_v60 = vadd.f32 %v6026_v3, %v1578_v44 }
 0x18e   : > { %v2176_v62 = vsel %vm2160_vm8, %v2152_v51, %v2168_v39  ;;  %v2073_v1 = vadd.f32 %v2056_v22, %v2036_v32  ;;  %v7328_v3 = vld [vmem:[#allocation29_spill] sm:$0xff] }
 0x18f   : > { %v2275_v24 = vsel %vm6149_vm7, %v2197_v37, %v2274_v31  ;;  %v2278_v11 = vsel %vm6016_vm2, %v2198_v58, %v2277_v61  ;;  %v2184_v46 = vpack.c.bf16 %v2176_v62, %v2176_v62  ;;  %v1828_v37 = vadd.f32 %v6012_v17, %v1791_v20 }
 0x190   : > { %2276 = vst [vmem:[#allocation4] sm:$0xf] %v2275_v24  ;;  %v2141_v48 = vadd.f32 %v2124_v15, %v2073_v1  ;;  %v2058_v57 = vpop.f32.mrf.mxu0  ;;  %v613_v15 = vsel %vm6016_vm2, 0, %v612_v10  ;;  %v1792_v17 = vadd.f32 %v6028_v34, %v1755_v60 }
 0x191   : > { %2279 = vst [vmem:[#allocation4 + $0x4] sm:$0x1] %v2278_v11  ;;  %v2200_v27 = vshrl.u32 %v2184_v46, 16  ;;  %v1984_v50 = vpop.f32.mrf.mxu2  ;;  %v2203_v22 = vshll.u32 %v2184_v46, 16  ;;  %v7329_v11 = vunpack.c.l.b16 %v7328_v3  ;;  %v7330_v46 = vld [vmem:[#allocation36_spill] sm:$0xff] }
 0x192   : > { %v2021_v7 = vpop.f32.mrf.mxu3  ;;  %v2153_v35 = vadd.f32 %v6108_v21, %v2141_v48  ;;  %v2000_v51 = vadd.f32 %v1984_v50, %v1827_v2  ;;  %v2126_v32 = vpop.f32.mrf.mxu1  ;;  %v7331_v28 = vunpack.c.l.b16 %v7330_v46  ;;  %614 = vst [vmem:[#allocation4 + $0x34] sm:$0x1] %v613_v15  ;;  %v2295_v3 = vld [vmem:[#allocation4 + $0x1c] sm:$0x1] }
 0x193   : > { %v2202_v42 = vrot.slane %v2200_v27, 7  ;;  %v1581_v27 = vadd.f32 %v6036_v13, %v5940_v4 }
 0x194   : > { %vm2161_vm9 = vcmp.gt.f32.partialorder %v2153_v35, 0.0  ;;  %v2169_v45 = vmul.f32 0.2, %v2153_v35  ;;  %v2037_v31 = vadd.f32 %v2021_v7, %v2000_v51  ;;  %v2532_v2 = vpack.c.b16 %v7331_v28, %v7329_v11  ;;  %v2289_v51 = vld [vmem:[#allocation4 + $0x14] sm:$0x1] }
 0x195   : > { %v2205_v61 = vor.u32 %v2203_v22, %v2202_v42  ;;  %v2206_v39 = vrot.slane %v2202_v42, 4  ;;  %v7332_v42 = vld [vmem:[#allocation35_spill] sm:$0xff] }
 0x196   : > { %v2177_v12 = vsel %vm2161_vm9, %v2153_v35, %v2169_v45  ;;  %v2074_v43 = vadd.f32 %v2058_v57, %v2037_v31  ;;  %4633 = vmatmul.msk.bf16.gmra.mxu2 %vm679_vm1, %v5469_v36  ;;  %v2286_v35 = vld [vmem:[#allocation4 + $0x10] sm:$0xf]  ;;  %v7333_v22 = vunpack.c.l.b16 %v7332_v42 }
 0x197   : > { %4637 = vmatmul.msk.bf16.gmra.mxu3 %vm679_vm1, %v7276_v38  ;;  %v2281_v53 = vsel %vm6149_vm7, %v2205_v61, %v2280_v47  ;;  %v2284_v6 = vsel %vm6016_vm2, %v2206_v39, %v2283_v8  ;;  %v2185_v26 = vpack.c.bf16 %v2177_v12, %v2177_v12  ;;  %v7334_v47 = vunpack.c.l.b16 %v5379_v40 }
 0x198   : > { %2282 = vst [vmem:[#allocation4 + $0x8] sm:$0xf] %v2281_v53  ;;  %v2142_v58 = vadd.f32 %v2126_v32, %v2074_v43  ;;  %v2061_v54 = vpop.f32.mrf.mxu0  ;;  %4641 = vmatmul.msk.bf16.gmra.mxu0 %vm679_vm1, %v2532_v2  ;;  %v616_v32 = vld [vmem:[#allocation4 + $0x3c] sm:$0x1]  ;;  %v1829_v40 = vadd.f32 %v6030_v55, %v1792_v17  ;;  %v1756_v12 = vadd.f32 %v6038_v56, %v1581_v27  ;;  %v6213_v55 = vld [vmem:[%s5080_s12 + $0x40] sm:$0xf] }
 0x199   : > { %2285 = vst [vmem:[#allocation4 + $0xc] sm:$0x1] %v2284_v6  ;;  %v2208_v62 = vshrl.u32 %v2185_v26, 16  ;;  %v1987_v1 = vpop.f32.mrf.mxu2  ;;  %v2211_v7 = vshll.u32 %v2185_v26, 16  ;;  %v6198_v20 = vpack.c.b16 %v7334_v47, %v7333_v22  ;;  %v617_v60 = vsel %vm6016_vm2, 0, %v616_v32  ;;  %v7335_v22 = vld [vmem:[#allocation38_spill] sm:$0xff] }
 0x19a   : > { %v2024_v24 = vpop.f32.mrf.mxu3  ;;  %v2154_v19 = vadd.f32 %v6108_v21, %v2142_v58  ;;  %v2001_v48 = vadd.f32 %v1987_v1, %v1828_v37  ;;  %v2129_v31 = vpop.f32.mrf.mxu1  ;;  %618 = vst [vmem:[#allocation4 + $0x3c] sm:$0x1] %v617_v60  ;;  %v1583_v56 = vadd.f32 %v6051_v59, %v5949_v0  ;;  %v2292_v1 = vld [vmem:[#allocation4 + $0x18] sm:$0xf]  ;;  %v7336_v47 = vunpack.c.l.b16 %v7335_v22 }
 0x19b   : > { %v2210_v50 = vrot.slane %v2208_v62, 7 }
 0x19c   : > { %vm2162_vm10 = vcmp.gt.f32.partialorder %v2154_v19, 0.0  ;;  %v2170_v57 = vmul.f32 0.2, %v2154_v19  ;;  %v2038_v44 = vadd.f32 %v2024_v24, %v2001_v48  ;;  %v1793_v24 = vadd.f32 %v6040_v33, %v1756_v12 }
 0x19d   : > { %v2213_v8 = vor.u32 %v2211_v7, %v2210_v50  ;;  %v2214_v45 = vrot.slane %v2210_v50, 4  ;;  %4645 = vmatmul.msk.bf16.gmra.mxu1 %vm679_vm1, %v6198_v20  ;;  %v2529_v48 = vunpack.c.l.b16 %v6213_v55  ;;  %v1757_v0 = vadd.f32 %v6053_v49, %v1583_v56 }
 0x19e   : > { %v2178_v34 = vsel %vm2162_vm10, %v2154_v19, %v2170_v57  ;;  %v2075_v13 = vadd.f32 %v2061_v54, %v2038_v44  ;;  %v6220_v54 = vld [vmem:[%s5118_s21 + $0x40] sm:$0xf]  ;;  %v1830_v7 = vadd.f32 %v6043_v25, %v1793_v24  ;;  %v2298_v25 = vld [vmem:[#allocation4 + $0x20] sm:$0xf] }
 0x19f   : > { %v2287_v4 = vsel %vm6149_vm7, %v2213_v8, %v2286_v35  ;;  %v2290_v61 = vsel %vm6016_vm2, %v2214_v45, %v2289_v51  ;;  %v2186_v39 = vpack.c.bf16 %v2178_v34, %v2178_v34  ;;  %v2584_v51 = vunpack.c.l.b16 %v6220_v54 }
 0x1a0   : > { %2288 = vst [vmem:[#allocation4 + $0x10] sm:$0xf] %v2287_v4  ;;  %v2143_v43 = vadd.f32 %v2129_v31, %v2075_v13  ;;  %v2063_v58 = vpop.f32.mrf.mxu0  ;;  %v2533_v49 = vpack.c.b16 %v2529_v48, %v7336_v47  ;;  %v1794_v34 = vadd.f32 %v6061_v9, %v1757_v0 }
 0x1a1   : > { %2291 = vst [vmem:[#allocation4 + $0x14] sm:$0x1] %v2290_v61  ;;  %v2216_v53 = vshrl.u32 %v2186_v39, 16  ;;  %v1989_v6 = vpop.f32.mrf.mxu2  ;;  %v2219_v62 = vshll.u32 %v2186_v39, 16  ;;  %v2301_v61 = vld [vmem:[#allocation4 + $0x24] sm:$0x1] }
 0x1a2   : > { %v2026_v26 = vpop.f32.mrf.mxu3  ;;  %v2155_v10 = vadd.f32 %v6108_v21, %v2143_v43  ;;  %v2002_v37 = vadd.f32 %v1989_v6, %v1829_v40  ;;  %v2131_v19 = vpop.f32.mrf.mxu1  ;;  %v7337_v40 = vunpack.c.l.b16 %v5382_v52 }
 0x1a3   : > { %v2218_v15 = vrot.slane %v2216_v53, 7 }
 0x1a4   : > { %vm2163_vm11 = vcmp.gt.f32.partialorder %v2155_v10, 0.0  ;;  %v2171_v11 = vmul.f32 0.2, %v2155_v10  ;;  %v2039_v46 = vadd.f32 %v2026_v26, %v2002_v37  ;;  %v6239_v12 = vpack.c.b16 %v2584_v51, %v7337_v40 }
 0x1a5   : > { %v2221_v28 = vor.u32 %v2219_v62, %v2218_v15  ;;  %v2222_v2 = vrot.slane %v2218_v15, 4 }
 0x1a6   : > { %v2179_v17 = vsel %vm2163_vm11, %v2155_v10, %v2171_v11  ;;  %v2076_v27 = vadd.f32 %v2063_v58, %v2039_v46  ;;  %4634 = vmatmul.msk.bf16.gmra.mxu2 %vm679_vm1, %v7283_v18  ;;  %v1831_v58 = vadd.f32 %v6072_v29, %v1794_v34 }
 0x1a7   : > { %4638 = vmatmul.msk.bf16.gmra.mxu3 %vm679_vm1, %v7287_v63  ;;  %v2293_v33 = vsel %vm6149_vm7, %v2221_v28, %v2292_v1  ;;  %v2296_v59 = vsel %vm6016_vm2, %v2222_v2, %v2295_v3  ;;  %v2187_v50 = vpack.c.bf16 %v2179_v17, %v2179_v17  ;;  %v2304_v28 = vld [vmem:[#allocation4 + $0x28] sm:$0xf]  ;;  %v2307_v2 = vld [vmem:[#allocation4 + $0x2c] sm:$0x1] }
 0x1a8   : > { %2294 = vst [vmem:[#allocation4 + $0x18] sm:$0xf] %v2293_v33  ;;  %v2144_v35 = vadd.f32 %v2131_v19, %v2076_v27  ;;  %v2066_v31 = vpop.f32.mrf.mxu0  ;;  %4642 = vmatmul.msk.bf16.gmra.mxu0 %vm679_vm1, %v2533_v49 }
 0x1a9   : > { %2297 = vst [vmem:[#allocation4 + $0x1c] sm:$0x1] %v2296_v59  ;;  %v2224_v57 = vshrl.u32 %v2187_v50, 16  ;;  %v1992_v44 = vpop.f32.mrf.mxu2  ;;  %v2227_v4 = vshll.u32 %v2187_v50, 16  ;;  %v7338_v59 = vld [vmem:[#allocation31_spill] sm:$0xff] }
 0x1aa   : > { %v2029_v42 = vpop.f32.mrf.mxu3  ;;  %v2156_v8 = vadd.f32 %v6108_v21, %v2144_v35  ;;  %v2003_v45 = vadd.f32 %v1992_v44, %v1830_v7  ;;  %v2134_v53 = vpop.f32.mrf.mxu1  ;;  %v7339_v50 = vld [vmem:[#allocation23_spill] sm:$0xff] }
 0x1ab   : > { %v2226_v13 = vrot.slane %v2224_v57, 7  ;;  %v7340_v57 = vld [vmem:[#allocation17_spill] sm:$0xff]  ;;  %v7341_v44 = vld [vmem:[#allocation39_spill] sm:$0xff] }
 0x1ac   : > { %vm2164_vm12 = vcmp.gt.f32.partialorder %v2156_v8, 0.0  ;;  %v2172_v39 = vmul.f32 0.2, %v2156_v8  ;;  %v2040_v32 = vadd.f32 %v2029_v42, %v2003_v45 }
 0x1ad   : > { %v2229_v43 = vor.u32 %v2227_v4, %v2226_v13  ;;  %v2230_v60 = vrot.slane %v2226_v13, 4  ;;  %4646 = vmatmul.msk.bf16.gmra.mxu1 %vm679_vm1, %v6239_v12  ;;  %v2310_v4 = vld [vmem:[#allocation4 + $0x30] sm:$0xf] }
 0x1ae   : > { %v2180_v6 = vsel %vm2164_vm12, %v2156_v8, %v2172_v39  ;;  %v2077_v26 = vadd.f32 %v2066_v31, %v2040_v32 }
 0x1af   : > { %v2299_v9 = vsel %vm6149_vm7, %v2229_v43, %v2298_v25  ;;  %v2302_v10 = vsel %vm6016_vm2, %v2230_v60, %v2301_v61  ;;  %v2188_v37 = vpack.c.bf16 %v2180_v6, %v2180_v6  ;;  %v2313_v25 = vld [vmem:[#allocation4 + $0x34] sm:$0x1]  ;;  %v7342_v43 = vld [vmem:[#allocation20_spill] sm:$0xff] }
 0x1b0   : > { %2300 = vst [vmem:[#allocation4 + $0x20] sm:$0xf] %v2299_v9  ;;  %v2145_v52 = vadd.f32 %v2134_v53, %v2077_v26  ;;  %v2068_v3 = vpop.f32.mrf.mxu0  ;;  %v7343_v26 = vld [vmem:[#allocation10_spill] sm:$0xff] }
 0x1b1   : > { %2303 = vst [vmem:[#allocation4 + $0x24] sm:$0x1] %v2302_v10  ;;  %v2232_v56 = vshrl.u32 %v2188_v37, 16  ;;  %v1994_v15 = vpop.f32.mrf.mxu2  ;;  %v2235_v46 = vshll.u32 %v2188_v37, 16 }
 0x1b2   : > { %v2031_v62 = vpop.f32.mrf.mxu3  ;;  %v2157_v1 = vadd.f32 %v6108_v21, %v2145_v52  ;;  %v2004_v24 = vadd.f32 %v1994_v15, %v1831_v58  ;;  %v2136_v27 = vpop.f32.mrf.mxu1  ;;  %v7345_v15 = vld [vmem:[#allocation41_spill] sm:$0xff] }
 0x1b3   : > { %v2234_v11 = vrot.slane %v2232_v56, 7  ;;  %v7344_v56 = vld [vmem:[#allocation30_spill] sm:$0xff] }
 0x1b4   : > { %vm2165_vm13 = vcmp.gt.f32.partialorder %v2157_v1, 0.0  ;;  %v2173_v19 = vmul.f32 0.2, %v2157_v1  ;;  %v2041_v29 = vadd.f32 %v2031_v62, %v2004_v24  ;;  %v6281_v62 = vpack.c.b16 %v7345_v15, %v7344_v56  ;;  %v7353_v15 = vld [vmem:[#allocation40_spill] sm:$0xff] }
 0x1b5   : > { %v2237_v48 = vor.u32 %v2235_v46, %v2234_v11  ;;  %v2238_v17 = vrot.slane %v2234_v11, 4  ;;  %v2319_v11 = vld [vmem:[#allocation4 + $0x3c] sm:$0x1] }
 0x1b6   : > { %v2181_v0 = vsel %vm2165_vm13, %v2157_v1, %v2173_v19  ;;  %v2078_v33 = vadd.f32 %v2068_v3, %v2041_v29  ;;  %4647 = vmatmul.msk.bf16.vlgmr.msrb.gmra.mxu2 %vm679_vm1, %v7338_v59  ;;  %v2316_v3 = vld [vmem:[#allocation4 + $0x38] sm:$0xf]  ;;  %v7346_v19 = vld [vmem:[#allocation33_spill] sm:$0xff] }
 0x1b7   : > { %4651 = vmatmul.msk.bf16.vlgmr.msrb.gmra.mxu3 %vm679_vm1, %v7339_v50  ;;  %v2305_v7 = vsel %vm6149_vm7, %v2237_v48, %v2304_v28  ;;  %v2308_v35 = vsel %vm6016_vm2, %v2238_v17, %v2307_v2  ;;  %v2189_v51 = vpack.c.bf16 %v2181_v0, %v2181_v0  ;;  %3009 = vmatpush.bf16.msrb.mxu2 %v7340_v57  ;;  %v2639_v50 = vshrl.u32 %v6213_v55, 16 }
 0x1b8   : > { %3077 = vmatpush.bf16.msrb.mxu3 %v7341_v44  ;;  %2306 = vst [vmem:[#allocation4 + $0x28] sm:$0xf] %v2305_v7  ;;  %v2146_v42 = vadd.f32 %v2136_v27, %v2078_v33  ;;  %v6263_v31 = vpop.f32.mrf.mxu0  ;;  %4655 = vmatmul.msk.bf16.vlgmr.msrb.gmra.mxu0 %vm679_vm1, %v7342_v43  ;;  %v2642_v7 = vshll.u32 %v6213_v55, 16 }
 0x1b9   : > { %2309 = vst [vmem:[#allocation4 + $0x2c] sm:$0x1] %v2308_v35  ;;  %v2240_v22 = vshrl.u32 %v2189_v51, 16  ;;  %v2331_v47 = vpop.f32.mrf.mxu2  ;;  %v2243_v13 = vshll.u32 %v2189_v51, 16  ;;  %v7347_v51 = vld [vmem:[#allocation32_spill] sm:$0xff]  ;;  %v2641_v57 = vrot.slane %v2639_v50, 4 }
 0x1ba   : > { %v2360_v49 = vpop.f32.mrf.mxu3  ;;  %v2158_v8 = vadd.f32 %v6108_v21, %v2146_v42  ;;  %v6265_v40 = vpop.f32.mrf.mxu1  ;;  %v2644_v44 = vrot.slane %v2642_v7, 5  ;;  %v7348_v42 = vld [vmem:[#allocation64_spill] sm:$0xff] }
 0x1bb   : > { %v6261_v45 = vadd.f32 %v2360_v49, %v2331_v47  ;;  %v2242_v34 = vrot.slane %v2240_v22, 7  ;;  %v474_v22 = vld [vmem:[%s5080_s12 + $0x44] sm:$0x1] }
 0x1bc   : > { %vm2166_vm14 = vcmp.gt.f32.partialorder %v2158_v8, 0.0  ;;  %v2174_v61 = vmul.f32 0.2, %v2158_v8 }
 0x1bd   : > { %v2245_v39 = vor.u32 %v2243_v13, %v2242_v34  ;;  %v2246_v32 = vrot.slane %v2242_v34, 4  ;;  %4659 = vmatmul.msk.bf16.vlgmr.msrb.gmra.mxu1 %vm679_vm1, %v7343_v26  ;;  %v7349_v13 = vld [vmem:[#allocation42_spill] sm:$0xff] }
 0x1be   : > { %v2182_v60 = vsel %vm2166_vm14, %v2158_v8, %v2174_v61  ;;  %v2648_v61 = vshll.u32 %v474_v22, 16  ;;  %v7359_v22 = vld [vmem:[#allocation60_spill] sm:$0xff] }
 0x1bf   : > { %v2311_v21 = vsel %vm6149_vm7, %v2245_v39, %v2310_v4  ;;  %v2314_v53 = vsel %vm6016_vm2, %v2246_v32, %v2313_v25  ;;  %v2190_v6 = vpack.c.bf16 %v2182_v60, %v2182_v60  ;;  %v7350_v4 = vld [vmem:[#allocation45_spill] sm:$0xff]  ;;  %v2645_v25 = vor.u32 %v2644_v44, %v2641_v57  ;;  %v7351_v32 = vld [vmem:[#allocation43_spill] sm:$0xff] }
 0x1c0   : > { %2312 = vst [vmem:[#allocation4 + $0x30] sm:$0xf] %v2311_v21  ;;  %v6277_v52 = vpop.f32.mrf.mxu0  ;;  %v6312_v55 = vpack.c.b16 %v7350_v4, %v7349_v13  ;;  %v2650_v21 = vrot.slane %v2648_v61, 5  ;;  %v7360_v61 = vld [vmem:[#allocation12_spill] sm:$0xff] }
 0x1c1   : > { %2315 = vst [vmem:[#allocation4 + $0x34] sm:$0x1] %v2314_v53  ;;  %v2248_v9 = vshrl.u32 %v2190_v6, 16  ;;  %v2333_v10 = vpop.f32.mrf.mxu2  ;;  %v2251_v24 = vshll.u32 %v2190_v6, 16  ;;  %v2646_v60 = vrot.slane %v2645_v25, 4 }
 0x1c2   : > { %v2362_v37 = vpop.f32.mrf.mxu3  ;;  %v6283_v2 = vpop.f32.mrf.mxu1 }
 0x1c3   : > { %v6275_v58 = vadd.f32 %v2362_v37, %v2333_v10  ;;  %v2250_v1 = vrot.slane %v2248_v9, 7  ;;  %v2651_v37 = vsel %vm5106_vm4, %v2646_v60, %v2650_v21  ;;  %v7377_v10 = vld [vmem:[#allocation20_spill] sm:$0xff] }
 0x1c5   : > { %v2253_v46 = vor.u32 %v2251_v24, %v2250_v1  ;;  %v2254_v28 = vrot.slane %v2250_v1, 4  ;;  %v2652_v1 = vunpack.c.l.b16 %v2651_v37  ;;  %v7354_v24 = vld [vmem:[#allocation68_spill] sm:$0xff]  ;;  %v7362_v37 = vld [vmem:[#allocation55_spill] sm:$0xff] }
 0x1c6   : > { %4648 = vmatmul.msk.bf16.gmra.mxu2 %vm679_vm1, %v6281_v62 }
 0x1c7   : > { %4652 = vmatmul.msk.bf16.gmra.mxu3 %vm679_vm1, %v7346_v19  ;;  %v2317_v29 = vsel %vm6149_vm7, %v2253_v46, %v2316_v3  ;;  %v2320_v48 = vsel %vm6016_vm2, %v2254_v28, %v2319_v11  ;;  %v7355_v19 = vld [vmem:[#allocation46_spill] sm:$0xff] }
 0x1c8   : > { %2318 = vst [vmem:[#allocation4 + $0x38] sm:$0xf] %v2317_v29  ;;  %v6295_v33 = vpop.f32.mrf.mxu0  ;;  %4656 = vmatmul.msk.bf16.gmra.mxu0 %vm679_vm1, %v7347_v51  ;;  %v6337_v29 = vpack.c.b16 %v2652_v1, %v7355_v19 }
 0x1c9   : > { %2321 = vst [vmem:[#allocation4 + $0x3c] sm:$0x1] %v2320_v48  ;;  %v2336_v17 = vpop.f32.mrf.mxu2 }
 0x1ca   : > { %v2365_v27 = vpop.f32.mrf.mxu3  ;;  %v6299_v35 = vpop.f32.mrf.mxu1  ;;  %7356 = vst [vmem:[#allocation61_spill] sm:$0xff] %v6337_v29 }
 0x1cb   : > { %v6293_v0 = vadd.f32 %v2365_v27, %v2336_v17  ;;  %v7357_v17 = vld [vmem:[#allocation48_spill] sm:$0xff] }
 0x1cd   : > { %4660 = vmatmul.msk.bf16.gmra.mxu1 %vm679_vm1, %v7348_v42  ;;  %v7358_v42 = vld [vmem:[#allocation47_spill] sm:$0xff] }
 0x1d0   : > { %v6308_v34 = vpop.f32.mrf.mxu0 }
 0x1d1   : > { %v2338_v47 = vpop.f32.mrf.mxu2 }
 0x1d2   : > { %v2367_v49 = vpop.f32.mrf.mxu3  ;;  %v6314_v39 = vpop.f32.mrf.mxu1 }
 0x1d3   : > { %v6306_v8 = vadd.f32 %v2367_v49, %v2338_v47 }
 0x1d6   : > { %4649 = vmatmul.msk.bf16.gmra.mxu2 %vm679_vm1, %v6312_v55 }
 0x1d7   : > { %4653 = vmatmul.msk.bf16.gmra.mxu3 %vm679_vm1, %v7351_v32  ;;  %v7361_v32 = vld [vmem:[#allocation49_spill] sm:$0xff] }
 0x1d8   : > { %v6322_v9 = vpop.f32.mrf.mxu0  ;;  %4657 = vmatmul.msk.bf16.gmra.mxu0 %vm679_vm1, %v7353_v15 }
 0x1d9   : > { %v2341_v53 = vpop.f32.mrf.mxu2 }
 0x1da   : > { %v2370_v6 = vpop.f32.mrf.mxu3  ;;  %v6326_v56 = vpop.f32.mrf.mxu1 }
 0x1db   : > { %v6320_v26 = vadd.f32 %v2370_v6, %v2341_v53 }
 0x1dd   : > { %4661 = vmatmul.msk.bf16.gmra.mxu1 %vm679_vm1, %v7354_v24 }
 0x1e0   : > { %v6334_v28 = vpop.f32.mrf.mxu0 }
 0x1e1   : > { %v2343_v3 = vpop.f32.mrf.mxu2 }
 0x1e2   : > { %v2372_v11 = vpop.f32.mrf.mxu3  ;;  %v6339_v48 = vpop.f32.mrf.mxu1 }
 0x1e3   : > { %v6332_v46 = vadd.f32 %v2372_v11, %v2343_v3 }
 0x1e6   : > { %4650 = vmatmul.msk.bf16.gmra.mxu2 %vm679_vm1, %v6337_v29 }
 0x1e7   : > { %4654 = vmatmul.msk.bf16.gmra.mxu3 %vm679_vm1, %v7357_v17 }
 0x1e8   : > { %v6347_v57 = vpop.f32.mrf.mxu0  ;;  %4658 = vmatmul.msk.bf16.gmra.mxu0 %vm679_vm1, %v7358_v42 }
 0x1e9   : > { %v2346_v27 = vpop.f32.mrf.mxu2 }
 0x1ea   : > { %v2375_v50 = vpop.f32.mrf.mxu3  ;;  %v6349_v44 = vpop.f32.mrf.mxu1 }
 0x1eb   : > { %v6345_v7 = vadd.f32 %v2375_v50, %v2346_v27 }
 0x1ed   : > { %4662 = vmatmul.msk.bf16.gmra.mxu1 %vm679_vm1, %v7359_v22  ;;  %v7363_v22 = vld [vmem:[#allocation65_spill] sm:$0xff] }
 0x1f0   : > { %v6357_v4 = vpop.f32.mrf.mxu0 }
 0x1f1   : > { %v2348_v47 = vpop.f32.mrf.mxu2 }
 0x1f2   : > { %v2377_v49 = vpop.f32.mrf.mxu3  ;;  %v6359_v25 = vpop.f32.mrf.mxu1 }
 0x1f3   : > { %v6355_v13 = vadd.f32 %v2377_v49, %v2348_v47 }
 0x1f6   : > { %4663 = vmatmul.msk.bf16.vlgmr.msra.gmra.mxu2 %vm679_vm1, %v7360_v61 }
 0x1f7   : > { %4667 = vmatmul.msk.bf16.vlgmr.msra.gmra.mxu3 %vm679_vm1, %v7361_v32 }
 0x1f8   : > { %v2555_v53 = vpop.f32.mrf.mxu0  ;;  %4671 = vmatmul.msk.bf16.vlgmr.msra.gmra.mxu0 %vm679_vm1, %v7362_v37  ;;  %v7364_v37 = vld [vmem:[#allocation57_spill] sm:$0xff] }
 0x1f9   : > { %v2463_v60 = vpop.f32.mrf.mxu2 }
 0x1fa   : > { %v2500_v21 = vpop.f32.mrf.mxu3  ;;  %v2610_v6 = vpop.f32.mrf.mxu1 }
 0x1fd   : > { %4675 = vmatmul.msk.bf16.vlgmr.msra.gmra.mxu1 %vm679_vm1, %v7315_v5 }
 0x200   : > { %v2557_v3 = vpop.f32.mrf.mxu0 }
 0x201   : > { %v2465_v1 = vpop.f32.mrf.mxu2 }
 0x202   : > { %v2502_v24 = vpop.f32.mrf.mxu3  ;;  %v6369_v11 = vpop.f32.mrf.mxu1 }
 0x206   : > { %4664 = vmatmul.msk.bf16.gmra.mxu2 %vm679_vm1, %v5438_v30 }
 0x207   : > { %4668 = vmatmul.msk.bf16.gmra.mxu3 %vm679_vm1, %v5450_v23 }
 0x208   : > { %v6375_v27 = vpop.f32.mrf.mxu0  ;;  %4672 = vmatmul.msk.bf16.gmra.mxu0 %vm679_vm1, %v7363_v22 }
 0x209   : > { %v2468_v19 = vpop.f32.mrf.mxu2 }
 0x20a   : > { %v2505_v17 = vpop.f32.mrf.mxu3  ;;  %v6377_v50 = vpop.f32.mrf.mxu1 }
 0x20d   : > { %4676 = vmatmul.msk.bf16.gmra.mxu1 %vm679_vm1, %v6157_v14 }
 0x210   : > { %v6387_v30 = vpop.f32.mrf.mxu0 }
 0x211   : > { %v6383_v5 = vpop.f32.mrf.mxu2 }
 0x212   : > { %v6385_v47 = vpop.f32.mrf.mxu3  ;;  %v6389_v49 = vpop.f32.mrf.mxu1 }
 0x216   : > { %4665 = vmatmul.msk.bf16.gmra.mxu2 %vm679_vm1, %v5469_v36 }
 0x217   : > { %4669 = vmatmul.msk.bf16.gmra.mxu3 %vm679_vm1, %v7276_v38  ;;  %v2409_v38 = vadd.f32 %v6263_v31, %v6261_v45  ;;  %v503_v45 = vld [vmem:[%s7074_s6 + $0x4] sm:$0xf] }
 0x218   : > { %v6399_v32 = vpop.f32.mrf.mxu0  ;;  %4673 = vmatmul.msk.bf16.gmra.mxu0 %vm679_vm1, %v7364_v37  ;;  %v3329_v31 = vsel %vm692_vm0, %v503_v45, 0 }
 0x219   : > { %v6395_v23 = vpop.f32.mrf.mxu2  ;;  %v2446_v51 = vadd.f32 %v6265_v40, %v2409_v38  ;;  %3338 = vmatpush.bf16.msrb.mxu0 %v3329_v31 }
 0x21a   : > { %v6397_v61 = vpop.f32.mrf.mxu3  ;;  %v6401_v14 = vpop.f32.mrf.mxu1 }
 0x21b   : > { %v2483_v41 = vadd.f32 %v2463_v60, %v2446_v51 }
 0x21d   : > { %4677 = vmatmul.msk.bf16.gmra.mxu1 %vm679_vm1, %v6198_v20  ;;  %v2520_v16 = vadd.f32 %v2500_v21, %v2483_v41  ;;  %v7366_v41 = vld [vmem:[#allocation62_spill] sm:$0xff] }
 0x21f   : > { %v2575_v51 = vadd.f32 %v2555_v53, %v2520_v16  ;;  %v6458_v16 = vld [vmem:[%s7073_s5] ss:$0 sm:$0xff] }
 0x220   : > { %v6411_v42 = vpop.f32.mrf.mxu0 }
 0x221   : > { %v6407_v22 = vpop.f32.mrf.mxu2 }
 0x222   : > { %v6409_v36 = vpop.f32.mrf.mxu3  ;;  %v6415_v15 = vpop.f32.mrf.mxu1 }
 0x226   : > { %4666 = vmatmul.msk.bf16.gmra.mxu2 %vm679_vm1, %v7283_v18  ;;  %v7365_v18 = vld [vmem:[#allocation11_spill] sm:$0xff] }
 0x227   : > { %4670 = vmatmul.msk.bf16.gmra.mxu3 %vm679_vm1, %v7287_v63  ;;  %v2410_v63 = vadd.f32 %v6277_v52, %v6275_v58  ;;  %v7367_v58 = vld [vmem:[#allocation59_spill] sm:$0xff] }
 0x228   : > { %v6426_v43 = vpop.f32.mrf.mxu0  ;;  %4674 = vmatmul.msk.bf16.gmra.mxu0 %vm679_vm1, %v7365_v18  ;;  %v2411_v18 = vadd.f32 %v6295_v33, %v6293_v0  ;;  %v7368_v52 = vpack.c.b16 %v7366_v41, %v7367_v58 }
 0x229   : > { %v6421_v37 = vpop.f32.mrf.mxu2  ;;  %v2447_v45 = vadd.f32 %v6283_v2, %v2410_v63 }
 0x22a   : > { %v6423_v20 = vpop.f32.mrf.mxu3  ;;  %v6436_v29 = vpop.f32.mrf.mxu1  ;;  %v2448_v0 = vadd.f32 %v6299_v35, %v2411_v18 }
 0x22b   : > { %v2484_v60 = vadd.f32 %v2465_v1, %v2447_v45 }
 0x22c   : > { %v2485_v63 = vadd.f32 %v2468_v19, %v2448_v0 }
 0x22d   : > { %4678 = vmatmul.msk.bf16.gmra.mxu1 %vm679_vm1, %v6239_v12  ;;  %v2630_v12 = vadd.f32 %v2610_v6, %v2575_v51  ;;  %v2521_v21 = vadd.f32 %v2502_v24, %v2484_v60  ;;  %v2412_v6 = vadd.f32 %v6308_v34, %v6306_v8 }
 0x22e   : > { %v2522_v41 = vadd.f32 %v2505_v17, %v2485_v63  ;;  %v2413_v17 = vadd.f32 %v6322_v9, %v6320_v26  ;;  %v4689_v63 = vld [vmem:[#allocation3] sm:$0xf] }
 0x22f   : > { %v2576_v1 = vadd.f32 %v2557_v3, %v2521_v21  ;;  %v2449_v3 = vadd.f32 %v6314_v39, %v2412_v6  ;;  %v7370_v21 = vld [vmem:[#allocation66_spill] sm:$0xff] }
 0x230   : > { %v6445_v31 = vpop.f32.mrf.mxu0  ;;  %v2577_v8 = vadd.f32 %v6375_v27, %v2522_v41  ;;  %v2450_v26 = vadd.f32 %v6326_v56, %v2413_v17  ;;  %v3043_v41 = vshll.u32 %v6220_v54, 16  ;;  %v2414_v56 = vadd.f32 %v6334_v28, %v6332_v46  ;;  %v7371_v28 = vld [vmem:[#allocation67_spill] sm:$0xff] }
 0x231   : > { %v6440_v40 = vpop.f32.mrf.mxu2  ;;  %v2631_v60 = vadd.f32 %v6369_v11, %v2576_v1  ;;  %v2486_v34 = vadd.f32 %v6383_v5, %v2449_v3 }
 0x232   : > { %v6442_v38 = vpop.f32.mrf.mxu3  ;;  %v6463_v33 = vpop.f32.mrf.mxu1  ;;  %v2632_v39 = vadd.f32 %v6377_v50, %v2577_v8 }
 0x233   : > { %v2523_v27 = vadd.f32 %v6385_v47, %v2486_v34 }
 0x235   : > { %v2578_v47 = vadd.f32 %v6387_v30, %v2523_v27 }
 0x236   : > { %4679 = vmatmul.msk.bf16.vlgmr.msrb.gmra.mxu2 %vm679_vm1, %v7338_v59 }
 0x237   : > { %4683 = vmatmul.msk.bf16.vlgmr.msrb.gmra.mxu3 %vm679_vm1, %v7368_v52 }
 0x238   : > { %v6468_v51 = vpop.f32.mrf.mxu0 }
 0x239   : > { %v2678_v2 = vpop.f32.mrf.mxu2 }
 0x23a   : > { %v6460_v53 = vpop.f32.mrf.mxu3  ;;  %v2698_v59 = vadd.f32 %v2678_v2, %v2630_v12  ;;  %v7369_v12 = vld [vmem:[#allocation63_spill] sm:$0xff]  ;;  %v6479_v0 = vpop.f32.mrf.mxu1 }
 0x23b   : > { %v3055_v2 = vpack.c.b16 %v7370_v21, %v7369_v12  ;;  %v2633_v12 = vadd.f32 %v6389_v49, %v2578_v47 }
 0x23c   : > { %v2710_v45 = vadd.f32 %v6458_v16, %v2698_v59 }
 0x23e   : > { %vm2718_vm15 = vcmp.gt.f32.partialorder %v2710_v45, 0.0  ;;  %v2726_v24 = vmul.f32 0.2, %v2710_v45 }
 0x240   : > { %v2734_v58 = vsel %vm2718_vm15, %v2710_v45, %v2726_v24  ;;  %v6489_v5 = vpop.f32.mrf.mxu0 }
 0x241   : > { %v2742_v52 = vpack.c.bf16 %v2734_v58, %v2734_v58  ;;  %v2680_v35 = vpop.f32.mrf.mxu2  ;;  %v2487_v58 = vadd.f32 %v6395_v23, %v2450_v26 }
 0x242   : > { %v6471_v18 = vpop.f32.mrf.mxu3  ;;  %v2699_v19 = vadd.f32 %v2680_v35, %v2631_v60  ;;  %v6503_v35 = vpop.f32.mrf.mxu1 }
 0x243   : > { %2751 = vst.msk [vmem:[#allocation3 + $0x8] sm:$0xf] %vm511_vm5, %v2742_v52  ;;  %v2524_v21 = vadd.f32 %v6397_v61, %v2487_v58  ;;  %v505_v61 = vld [vmem:[%s7074_s6 + $0xc] sm:$0xf] }
 0x244   : > { %v2711_v11 = vadd.f32 %v6458_v16, %v2699_v19  ;;  %v3045_v19 = vrot.slane %v3043_v41, 5 }
 0x246   : > { %vm2719_vm3 = vcmp.gt.f32.partialorder %v2711_v11, 0.0  ;;  %v2727_v59 = vmul.f32 0.2, %v2711_v11  ;;  %4680 = vmatmul.msk.bf16.gmra.mxu2 %vm679_vm1, %v6281_v62  ;;  %v3040_v62 = vshrl.u32 %v6220_v54, 16 }
 0x247   : > { %4684 = vmatmul.msk.bf16.gmra.mxu3 %vm679_vm1, %v3055_v2  ;;  %v492_v2 = vld [vmem:[%s5118_s21 + $0x44] sm:$0x1] }
 0x248   : > { %v2735_v1 = vsel %vm2719_vm3, %v2711_v11, %v2727_v59  ;;  %v3042_v54 = vrot.slane %v3040_v62, 4  ;;  %v2451_v11 = vadd.f32 %v6339_v48, %v2414_v56  ;;  %v6511_v17 = vpop.f32.mrf.mxu0  ;;  %v7372_v59 = vld [vmem:[#allocation52_spill] sm:$0xff]  ;;  %v3049_v49 = vshll.u32 %v492_v2, 16 }
 0x249   : > { %v2743_v45 = vpack.c.bf16 %v2735_v1, %v2735_v1  ;;  %v2683_v6 = vpop.f32.mrf.mxu2  ;;  %v2579_v1 = vadd.f32 %v6399_v32, %v2524_v21 }
 0x24a   : > { %v6491_v24 = vpop.f32.mrf.mxu3  ;;  %v2700_v9 = vadd.f32 %v2683_v6, %v2632_v39  ;;  %v4830_v60 = vld [vmem:[#allocation3 + $0x4] sm:$0xf0]  ;;  %v3056_v39 = vpack.c.b16 %v7372_v59, %v7371_v28  ;;  %v3046_v27 = vor.u32 %v3045_v19, %v3042_v54  ;;  %v2415_v6 = vadd.f32 %v6347_v57, %v6345_v7  ;;  %v6530_v62 = vpop.f32.mrf.mxu1  ;;  %v7373_v59 = vld [vmem:[#allocation69_spill] sm:$0xff] }
 0x24b   : > { %2752 = vst.msk [vmem:[#allocation3 + $0x10] sm:$0xf] %vm511_vm5, %v2743_v45  ;;  %v4690_v50 = vor.u32 %v4830_v60, %v4689_v63  ;;  %v2488_v63 = vadd.f32 %v6407_v22, %v2451_v11  ;;  %v3657_v45 = vsel %vm692_vm0, %v505_v61, 0  ;;  %v3051_v60 = vrot.slane %v3049_v49, 5  ;;  %v7374_v49 = vld [vmem:[#allocation61_spill] sm:$0xff] }
 0x24c   : > { %v2712_v52 = vadd.f32 %v6458_v16, %v2700_v9  ;;  %3666 = vmatpush.bf16.msra.mxu3 %v3657_v45  ;;  %v3047_v9 = vrot.slane %v3046_v27, 4  ;;  %v2634_v32 = vadd.f32 %v6401_v14, %v2579_v1  ;;  %v2452_v7 = vadd.f32 %v6349_v44, %v2415_v6 }
 0x24d   : > { %4703 = vmatmul.msk.bf16.vlgmr.msrb.gmra.mxu0 %vm679_vm1, %v4690_v50  ;;  %v2525_v22 = vadd.f32 %v6409_v36, %v2488_v63  ;;  %v2416_v44 = vadd.f32 %v6357_v4, %v6355_v13 }
 0x24e   : > { %vm2720_vm6 = vcmp.gt.f32.partialorder %v2712_v52, 0.0  ;;  %v2728_v3 = vmul.f32 0.2, %v2712_v52  ;;  %v3052_v14 = vsel %vm5106_vm4, %v3047_v9, %v3051_v60 }
 0x24f   : > { %v2580_v36 = vadd.f32 %v6411_v42, %v2525_v22  ;;  %v3053_v21 = vunpack.c.l.b16 %v3052_v14  ;;  %v2453_v11 = vadd.f32 %v6359_v25, %v2416_v44 }
 0x250   : > { %v2736_v30 = vsel %vm2720_vm6, %v2712_v52, %v2728_v3  ;;  %v2489_v3 = vadd.f32 %v6421_v37, %v2452_v7  ;;  %v6540_v54 = vpop.f32.mrf.mxu0 }
 0x251   : > { %v2744_v23 = vpack.c.bf16 %v2736_v30, %v2736_v30  ;;  %v2685_v8 = vpop.f32.mrf.mxu2  ;;  %v2635_v30 = vadd.f32 %v6415_v15, %v2580_v36  ;;  %v2490_v15 = vadd.f32 %v6440_v40, %v2453_v11 }
 0x252   : > { %v6508_v34 = vpop.f32.mrf.mxu3  ;;  %v2701_v46 = vadd.f32 %v2685_v8, %v2633_v12  ;;  %v4693_v52 = vld [vmem:[#allocation3 + $0x10] sm:$0xf]  ;;  %v2526_v2 = vadd.f32 %v6423_v20, %v2489_v3 }
 0x253   : > { %2753 = vst.msk [vmem:[#allocation3 + $0x18] sm:$0xf] %vm511_vm5, %v2744_v23  ;;  %v2527_v61 = vadd.f32 %v6442_v38, %v2490_v15 }
 0x254   : > { %v2713_v48 = vadd.f32 %v6458_v16, %v2701_v46  ;;  %v6551_v46 = vpop.f32.mrf.mxu1  ;;  %v2581_v13 = vadd.f32 %v6426_v43, %v2526_v2 }
 0x256   : > { %vm2721_vm8 = vcmp.gt.f32.partialorder %v2713_v48, 0.0  ;;  %v2729_v26 = vmul.f32 0.2, %v2713_v48  ;;  %4681 = vmatmul.msk.bf16.gmra.mxu2 %vm679_vm1, %v6312_v55  ;;  %v2636_v25 = vadd.f32 %v6436_v29, %v2581_v13  ;;  %v2582_v29 = vadd.f32 %v6445_v31, %v2527_v61  ;;  %v4737_v13 = vld [vmem:[#allocation4 + $0x10] sm:$0xf] }
 0x257   : > { %4685 = vmatmul.msk.bf16.gmra.mxu3 %vm679_vm1, %v3056_v39  ;;  %v3057_v39 = vpack.c.b16 %v3053_v21, %v7373_v59 }
 0x258   : > { %v2737_v41 = vsel %vm2721_vm8, %v2713_v48, %v2729_v26  ;;  %v6558_v20 = vpop.f32.mrf.mxu0  ;;  %v506_v26 = vld [vmem:[%s7074_s6 + $0x10] sm:$0xf] }
 0x259   : > { %v2745_v50 = vpack.c.bf16 %v2737_v41, %v2737_v41  ;;  %v2688_v47 = vpop.f32.mrf.mxu2  ;;  %v3737_v60 = vsel %vm692_vm0, %v506_v26, 0  ;;  %v2637_v41 = vadd.f32 %v6463_v33, %v2582_v29  ;;  %v502_v33 = vld [vmem:[%s7074_s6] sm:$0xf] }
 0x25a   : > { %v6532_v58 = vpop.f32.mrf.mxu3  ;;  %v2702_v57 = vadd.f32 %v2688_v47, %v2634_v32  ;;  %v4831_v55 = vld [vmem:[#allocation3 + $0x14] sm:$0xf0]  ;;  %3746 = vmatpush.bf16.msra.mxu0 %v3737_v60  ;;  %v3393_v44 = vsel %vm692_vm0, %v502_v33, 0  ;;  %v509_v60 = vld [vmem:[%s7074_s6 + $0x1c] sm:$0xf] }
 0x25b   : > { %2754 = vst.msk [vmem:[#allocation3 + $0x20] sm:$0xf] %vm511_vm5, %v2745_v50  ;;  %v4694_v56 = vor.u32 %v4831_v55, %v4693_v52  ;;  %v4834_v55 = vld [vmem:[#allocation4 + $0x4] sm:$0xf0]  ;;  %3402 = vmatpush.bf16.msrb.mxu1 %v3393_v44 }
 0x25c   : > { %v2714_v19 = vadd.f32 %v6458_v16, %v2702_v57  ;;  %v6573_v38 = vpop.f32.mrf.mxu1 }
 0x25d   : > { %4704 = vmatmul.msk.bf16.gmra.mxu0 %vm679_vm1, %v4694_v56  ;;  %v4733_v56 = vld [vmem:[#allocation4] sm:$0xf] }
 0x25e   : > { %vm2722_vm9 = vcmp.gt.f32.partialorder %v2714_v19, 0.0  ;;  %v2730_v12 = vmul.f32 0.2, %v2714_v19  ;;  %v4734_v36 = vor.u32 %v4834_v55, %v4733_v56  ;;  %v520_v55 = vld [vmem:[#allocation2 + $0xc] sm:$0x1] }
 0x260   : > { %v2738_v23 = vsel %vm2722_vm9, %v2714_v19, %v2730_v12  ;;  %v6578_v50 = vpop.f32.mrf.mxu0 }
 0x261   : > { %v2746_v42 = vpack.c.bf16 %v2738_v23, %v2738_v23  ;;  %v2690_v8 = vpop.f32.mrf.mxu2 }
 0x262   : > { %v6548_v37 = vpop.f32.mrf.mxu3  ;;  %v2703_v28 = vadd.f32 %v2690_v8, %v2635_v30  ;;  %v4697_v45 = vld [vmem:[#allocation3 + $0x20] sm:$0xf] }
 0x263   : > { %2755 = vst.msk [vmem:[#allocation3 + $0x28] sm:$0xf] %vm511_vm5, %v2746_v42 }
 0x264   : > { %v2715_v4 = vadd.f32 %v6458_v16, %v2703_v28  ;;  %v6584_v3 = vpop.f32.mrf.mxu1 }
 0x266   : > { %vm2723_vm10 = vcmp.gt.f32.partialorder %v2715_v4, 0.0  ;;  %v2731_v27 = vmul.f32 0.2, %v2715_v4  ;;  %4682 = vmatmul.msk.bf16.gmra.mxu2 %vm679_vm1, %v7374_v49 }
 0x267   : > { %4686 = vmatmul.msk.bf16.gmra.mxu3 %vm679_vm1, %v3057_v39  ;;  %v4835_v39 = vld [vmem:[#allocation4 + $0x14] sm:$0xf0] }
 0x268   : > { %v2739_v1 = vsel %vm2723_vm10, %v2715_v4, %v2731_v27  ;;  %v4738_v4 = vor.u32 %v4835_v39, %v4737_v13  ;;  %v4838_v27 = vld [vmem:[#allocation5 + $0x4] sm:$0xf0] }
 0x269   : > { %v2747_v63 = vpack.c.bf16 %v2739_v1, %v2739_v1  ;;  %v2693_v43 = vpop.f32.mrf.mxu2  ;;  %v4753_v1 = vld [vmem:[#allocation5] sm:$0xf]  ;;  %v4840_v39 = vld [vmem:[#allocation5 + $0x24] sm:$0xf0] }
 0x26a   : > { %v6565_v48 = vpop.f32.mrf.mxu3  ;;  %v2704_v40 = vadd.f32 %v2693_v43, %v2636_v25  ;;  %v4832_v6 = vld [vmem:[#allocation3 + $0x24] sm:$0xf0] }
 0x26b   : > { %2756 = vst.msk [vmem:[#allocation3 + $0x30] sm:$0xf] %vm511_vm5, %v2747_v63  ;;  %v4698_v9 = vor.u32 %v4832_v6, %v4697_v45  ;;  %v4754_v63 = vor.u32 %v4838_v27, %v4753_v1  ;;  %v4836_v6 = vld [vmem:[#allocation4 + $0x24] sm:$0xf0] }
 0x26c   : > { %v2716_v32 = vadd.f32 %v6458_v16, %v2704_v40  ;;  %v6599_v11 = vpop.f32.mrf.mxu1 }
 0x26d   : > { %4705 = vmatmul.msk.bf16.gmra.mxu0 %vm679_vm1, %v4698_v9  ;;  %v4741_v9 = vld [vmem:[#allocation4 + $0x20] sm:$0xf] }
 0x26e   : > { %vm2724_vm11 = vcmp.gt.f32.partialorder %v2716_v32, 0.0  ;;  %v2732_v22 = vmul.f32 0.2, %v2716_v32  ;;  %v4742_v29 = vor.u32 %v4836_v6, %v4741_v9  ;;  %v524_v9 = vld [vmem:[#allocation2 + $0x14] sm:$0x1] }
 0x270   : > { %v2740_v47 = vsel %vm2724_vm11, %v2716_v32, %v2732_v22  ;;  %v4089_v32 = vsel %vm692_vm0, %v509_v60, 0  ;;  %v3776_v60 = vld [vmem:[#allocation4] sm:$0xf] }
 0x271   : > { %v2748_v7 = vpack.c.bf16 %v2740_v47, %v2740_v47  ;;  %v2695_v57 = vpop.f32.mrf.mxu2  ;;  %4098 = vmatpush.bf16.msrb.mxu3 %v4089_v32  ;;  %v3793_v32 = vshrl.u32 %v3776_v60, 16 }
 0x272   : > { %v6580_v52 = vpop.f32.mrf.mxu3  ;;  %v2705_v31 = vadd.f32 %v2695_v57, %v2637_v41  ;;  %v4701_v23 = vld [vmem:[#allocation3 + $0x30] sm:$0xf]  ;;  %v4839_v41 = vld [vmem:[#allocation5 + $0x14] sm:$0xf0]  ;;  %v4757_v57 = vld [vmem:[#allocation5 + $0x10] sm:$0xf] }
 0x273   : > { %2757 = vst.msk [vmem:[#allocation3 + $0x38] sm:$0xf] %vm511_vm5, %v2748_v7 }
 0x274   : > { %v2717_v14 = vadd.f32 %v6458_v16, %v2705_v31  ;;  %v6595_v16 = vpop.f32.mrf.mxu0  ;;  %v6612_v61 = vpop.f32.mrf.mxu1  ;;  %v4758_v31 = vor.u32 %v4839_v41, %v4757_v57  ;;  %v3796_v41 = vshll.u32 %v3776_v60, 16  ;;  %v2803_v60 = vadd.f32 %v6511_v17, %v6491_v24  ;;  %v6687_v24 = vld [vmem:[%s7073_s5] ss:$0 sm:$0xff]  ;;  %v4765_v17 = vld [vmem:[#allocation5 + $0x30] sm:$0xf] }
 0x276   : > { %vm2725_vm12 = vcmp.gt.f32.partialorder %v2717_v14, 0.0  ;;  %v2733_v19 = vmul.f32 0.2, %v2717_v14 }
 0x277   : > { %4747 = vmatmul.msk.bf16.vlgmr.msra.gmra.mxu3 %vm679_vm1, %v4734_v36 }
 0x278   : > { %v2741_v12 = vsel %vm2725_vm12, %v2717_v14, %v2733_v19  ;;  %v521_v14 = vsel %vm6016_vm2, 0, %v520_v55  ;;  %v516_v55 = vld [vmem:[#allocation2 + $0x4] sm:$0x1] }
 0x279   : > { %v2749_v21 = vpack.c.bf16 %v2741_v12, %v2741_v12  ;;  %v6591_v30 = vpop.f32.mrf.mxu2  ;;  %522 = vst [vmem:[#allocation2 + $0xc] sm:$0x1] %v521_v14  ;;  %v4837_v12 = vld [vmem:[#allocation4 + $0x34] sm:$0xf0] }
 0x27a   : > { %v6593_v2 = vpop.f32.mrf.mxu3  ;;  %v4833_v42 = vld [vmem:[#allocation3 + $0x34] sm:$0xf0] }
 0x27b   : > { %2758 = vst.msk [vmem:[#allocation3 + $0x40] sm:$0xf] %vm511_vm5, %v2749_v21  ;;  %v4702_v8 = vor.u32 %v4833_v42, %v4701_v23  ;;  %v4745_v21 = vld [vmem:[#allocation4 + $0x30] sm:$0xf]  ;;  %v2798_v42 = vadd.f32 %v6468_v51, %v6460_v53  ;;  %v525_v53 = vsel %vm6016_vm2, 0, %v524_v9  ;;  %v2800_v51 = vadd.f32 %v6489_v5, %v6471_v18 }
 0x27c   : > { %v6605_v15 = vpop.f32.mrf.mxu0  ;;  %v6619_v26 = vpop.f32.mrf.mxu1  ;;  %v4746_v23 = vor.u32 %v4837_v12, %v4745_v21  ;;  %526 = vst [vmem:[#allocation2 + $0x14] sm:$0x1] %v525_v53  ;;  %v517_v12 = vsel %vm6016_vm2, 0, %v516_v55  ;;  %v3798_v18 = vrot.slane %v3796_v41, 5  ;;  %v4797_v5 = vld [vmem:[#allocation3 + $0x8] sm:$0xf]  ;;  %v2848_v41 = vadd.f32 %v6530_v62, %v2803_v60 }
 0x27d   : > { %4706 = vmatmul.msk.bf16.gmra.mxu0 %vm679_vm1, %v4702_v8  ;;  %v2846_v27 = vadd.f32 %v6479_v0, %v2798_v42  ;;  %v2847_v21 = vadd.f32 %v6503_v35, %v2800_v51  ;;  %518 = vst [vmem:[#allocation2 + $0x4] sm:$0x1] %v517_v12  ;;  %v528_v42 = vld [vmem:[#allocation2 + $0x1c] sm:$0x1]  ;;  %v3777_v9 = vld [vmem:[#allocation4 + $0x4] sm:$0x1] }
 0x281   : > { %v6601_v28 = vpop.f32.mrf.mxu2 }
 0x282   : > { %v6603_v59 = vpop.f32.mrf.mxu3 }
 0x284   : > { %v2937_v43 = vpop.f32.mrf.mxu0  ;;  %v6634_v36 = vpop.f32.mrf.mxu1 }
 0x287   : > { %4748 = vmatmul.msk.bf16.gmra.mxu3 %vm679_vm1, %v4738_v4 }
 0x289   : > { %v6608_v49 = vpop.f32.mrf.mxu2 }
 0x28a   : > { %v6610_v25 = vpop.f32.mrf.mxu3 }
 0x28c   : > { %v6625_v22 = vpop.f32.mrf.mxu0  ;;  %v6645_v8 = vpop.f32.mrf.mxu1 }
 0x28d   : > { %4767 = vmatmul.msk.bf16.vlgmr.msra.gmra.mxu0 %vm679_vm1, %v4754_v63  ;;  %v4761_v63 = vld [vmem:[#allocation5 + $0x20] sm:$0xf] }
 0x28e   : > { %v4762_v6 = vor.u32 %v4840_v39, %v4761_v63 }
 0x291   : > { %v6615_v40 = vpop.f32.mrf.mxu2 }
 0x292   : > { %v6617_v45 = vpop.f32.mrf.mxu3 }
 0x294   : > { %v6637_v19 = vpop.f32.mrf.mxu0  ;;  %v6662_v57 = vpop.f32.mrf.mxu1 }
 0x297   : > { %4749 = vmatmul.msk.bf16.gmra.mxu3 %vm679_vm1, %v4742_v29  ;;  %v2883_v29 = vadd.f32 %v6591_v30, %v2846_v27  ;;  %v4846_v30 = vld [vmem:[#allocation3 + $0xc] sm:$0xf0] }
 0x298   : > { %v4798_v63 = vor.u32 %v4846_v30, %v4797_v5  ;;  %v6697_v5 = vld [vmem:[#allocation4 + $0x8] sm:$0xf] }
 0x299   : > { %v6628_v47 = vpop.f32.mrf.mxu2  ;;  %v2920_v0 = vadd.f32 %v6593_v2, %v2883_v29  ;;  %v2884_v2 = vadd.f32 %v6601_v28, %v2847_v21  ;;  %v3802_v29 = vshll.u32 %v3777_v9, 16  ;;  %v4841_v28 = vld [vmem:[#allocation5 + $0x34] sm:$0xf0]  ;;  %v3807_v9 = vshrl.u32 %v6697_v5, 16 }
 0x29a   : > { %v6630_v7 = vpop.f32.mrf.mxu3  ;;  %v4766_v12 = vor.u32 %v4841_v28, %v4765_v17  ;;  %v3810_v60 = vshll.u32 %v6697_v5, 16 }
 0x29b   : > { %v2957_v39 = vadd.f32 %v2937_v43, %v2920_v0  ;;  %v2921_v43 = vadd.f32 %v6603_v59, %v2884_v2  ;;  %v6691_v21 = vrot.slane %v3802_v29, 5 }
 0x29c   : > { %v6653_v1 = vpop.f32.mrf.mxu0  ;;  %v6682_v0 = vpop.f32.mrf.mxu1 }
 0x29d   : > { %4768 = vmatmul.msk.bf16.gmra.mxu0 %vm679_vm1, %v4758_v31  ;;  %v2994_v53 = vadd.f32 %v6619_v26, %v2957_v39  ;;  %v532_v26 = vld [vmem:[#allocation2 + $0x24] sm:$0x1]  ;;  %v2958_v59 = vadd.f32 %v6625_v22, %v2921_v43  ;;  %v2808_v39 = vadd.f32 %v6558_v20, %v6532_v58  ;;  %v504_v22 = vld [vmem:[%s7074_s6 + $0x8] sm:$0xf]  ;;  %v2810_v58 = vadd.f32 %v6578_v50, %v6548_v37  ;;  %v3424_v20 = vld [vmem:[#allocation2] sm:$0xf] }
 0x29e   : > { %v4847_v43 = vld [vmem:[#allocation3 + $0x1c] sm:$0xf0]  ;;  %v3444_v17 = vshll.u32 %v3424_v20, 16 }
 0x29f   : > { %v2850_v37 = vadd.f32 %v6573_v38, %v2808_v39  ;;  %v507_v39 = vld [vmem:[%s7074_s6 + $0x14] sm:$0xf] }
 0x2a1   : > { %v6639_v33 = vpop.f32.mrf.mxu2 }
 0x2a2   : > { %v6641_v44 = vpop.f32.mrf.mxu3 }
 0x2a4   : > { %v6672_v27 = vpop.f32.mrf.mxu0 }
 0x2a7   : > { %4750 = vmatmul.msk.bf16.gmra.mxu3 %vm679_vm1, %v4746_v23  ;;  %v3795_v23 = vrot.slane %v3793_v32, 4 }
 0x2a9   : > { %v6648_v13 = vpop.f32.mrf.mxu2  ;;  %v3799_v35 = vor.u32 %v3798_v18, %v3795_v23  ;;  %v2885_v23 = vadd.f32 %v6608_v49, %v2848_v41  ;;  %v533_v18 = vsel %vm6016_vm2, 0, %v532_v26 }
 0x2aa   : > { %v6650_v4 = vpop.f32.mrf.mxu3  ;;  %534 = vst [vmem:[#allocation2 + $0x24] sm:$0x1] %v533_v18 }
 0x2ab   : > { %v6689_v30 = vrot.slane %v3799_v35, 4  ;;  %v2995_v35 = vadd.f32 %v6634_v36, %v2958_v59  ;;  %v2922_v29 = vadd.f32 %v6610_v25, %v2885_v23  ;;  %v3441_v36 = vshrl.u32 %v3424_v20, 16  ;;  %v536_v59 = vld [vmem:[#allocation2 + $0x2c] sm:$0x1] }
 0x2ac   : > { %v6707_v49 = vpop.f32.mrf.mxu0  ;;  %v2851_v25 = vadd.f32 %v6584_v3, %v2810_v58 }
 0x2ad   : > { %4769 = vmatmul.msk.bf16.gmra.mxu0 %vm679_vm1, %v4762_v6  ;;  %v529_v6 = vsel %vm6016_vm2, 0, %v528_v42  ;;  %v2805_v42 = vadd.f32 %v6540_v54, %v6508_v34  ;;  %v3805_v34 = vsel %vm5106_vm4, %v6689_v30, %v6691_v21  ;;  %v2813_v54 = vadd.f32 %v6595_v16, %v6565_v48  ;;  %v3781_v30 = vld [vmem:[#allocation4 + $0x14] sm:$0x1] }
 0x2ae   : > { %530 = vst [vmem:[#allocation2 + $0x1c] sm:$0x1] %v529_v6  ;;  %v6711_v6 = vld [vmem:[#allocation4 + $0xc] sm:$0x1]  ;;  %v2815_v48 = vadd.f32 %v6605_v15, %v6580_v52  ;;  %v2959_v38 = vadd.f32 %v6637_v19, %v2922_v29  ;;  %v6734_v15 = vpop.f32.mrf.mxu1  ;;  %v2888_v3 = vadd.f32 %v6639_v33, %v2851_v25  ;;  %v3232_v19 = vld [vmem:[#allocation2 + $0x8] sm:$0xf] }
 0x2af   : > { %v2849_v28 = vadd.f32 %v6551_v46, %v2805_v42  ;;  %v2887_v42 = vadd.f32 %v6628_v47, %v2850_v37 }
 0x2b0   : > { %v2853_v18 = vadd.f32 %v6612_v61, %v2815_v48  ;;  %v510_v61 = vld [vmem:[%s7074_s6 + $0x20] sm:$0xf]  ;;  %v2925_v48 = vadd.f32 %v6641_v44, %v2888_v3 }
 0x2b1   : > { %v6664_v31 = vpop.f32.mrf.mxu2  ;;  %v2886_v52 = vadd.f32 %v6615_v40, %v2849_v28  ;;  %v4281_v20 = vsel %vm692_vm0, %v510_v61, 0  ;;  %v2924_v37 = vadd.f32 %v6630_v7, %v2887_v42  ;;  %v540_v7 = vld [vmem:[#allocation2 + $0x34] sm:$0x1]  ;;  %v6770_v42 = vld [vmem:[#allocation3 + $0x3c] sm:$0xf0] }
 0x2b2   : > { %v6666_v14 = vpop.f32.mrf.mxu3  ;;  %4290 = vmatpush.bf16.msrb.mxu0 %v4281_v20  ;;  %v2962_v3 = vadd.f32 %v6707_v49, %v2925_v48 }
 0x2b3   : > { %v2923_v29 = vadd.f32 %v6617_v45, %v2886_v52  ;;  %v6766_v52 = vrot.slane %v3807_v9, 4  ;;  %v4356_v45 = vld [vmem:[%s7076_s8] sm:$0xf] }
 0x2b5   : > { %v2960_v44 = vadd.f32 %v6653_v1, %v2923_v29  ;;  %v6774_v1 = vrot.slane %v3810_v60, 5  ;;  %v3241_v60 = vld [vmem:[#allocation2 + $0x14] sm:$0x1]  ;;  %v4709_v29 = vld [vmem:[#allocation2] sm:$0xf] }
 0x2b7   : > { %4811 = vmatmul.msk.bf16.vlgmr.msrb.gmra.mxu3 %vm679_vm1, %v4798_v63  ;;  %v3577_v63 = vsel %vm692_vm0, %v504_v22, 0  ;;  %v3929_v22 = vsel %vm692_vm0, %v507_v39, 0  ;;  %v2997_v5 = vadd.f32 %v6662_v57, %v2960_v44  ;;  %v3247_v44 = vld [vmem:[#allocation2 + $0x1c] sm:$0x1] }
 0x2b8   : > { %3586 = vmatpush.bf16.msra.mxu2 %v3577_v63  ;;  %v3446_v63 = vrot.slane %v3444_v17, 5  ;;  %3938 = vmatpush.bf16.msra.mxu1 %v3929_v22 }
 0x2b9   : > { %v3011_v51 = vpop.f32.mrf.mxu2 }
 0x2ba   : > { %v3079_v32 = vpop.f32.mrf.mxu3  ;;  %v3031_v55 = vadd.f32 %v3011_v51, %v2994_v53  ;;  %v3816_v51 = vshll.u32 %v6711_v6, 16 }
 0x2bc   : > { %v3099_v62 = vadd.f32 %v3079_v32, %v3031_v55  ;;  %v4801_v55 = vld [vmem:[#allocation3 + $0x18] sm:$0xf] }
 0x2bd   : > { %4770 = vmatmul.msk.bf16.gmra.mxu0 %vm679_vm1, %v4766_v12  ;;  %v2852_v12 = vadd.f32 %v6599_v11, %v2813_v54  ;;  %v4802_v46 = vor.u32 %v4847_v43, %v4801_v55  ;;  %v3425_v54 = vld [vmem:[#allocation2 + $0x4] sm:$0x1]  ;;  %v3235_v43 = vld [vmem:[#allocation2 + $0xc] sm:$0x1] }
 0x2be   : > { %v3111_v2 = vadd.f32 %v6687_v24, %v3099_v62  ;;  %v537_v62 = vsel %vm6016_vm2, 0, %v536_v59  ;;  %v3450_v17 = vshll.u32 %v3425_v54, 16  ;;  %v4848_v59 = vld [vmem:[#allocation3 + $0x2c] sm:$0xf0] }
 0x2bf   : > { %538 = vst [vmem:[#allocation2 + $0x2c] sm:$0x1] %v537_v62  ;;  %v2889_v47 = vadd.f32 %v6648_v13, %v2852_v12 }
 0x2c0   : > { %vm3119_vm5 = vcmp.gt.f32.partialorder %v3111_v2, 0.0  ;;  %v3127_v53 = vmul.f32 0.2, %v3111_v2 }
 0x2c1   : > { %v3013_v50 = vpop.f32.mrf.mxu2 }
 0x2c2   : > { %v3081_v16 = vpop.f32.mrf.mxu3  ;;  %v3135_v32 = vsel %vm3119_vm5, %v3111_v2, %v3127_v53  ;;  %v3032_v41 = vadd.f32 %v3013_v50, %v2995_v35  ;;  %v3443_v2 = vrot.slane %v3441_v36, 4  ;;  %v2996_v35 = vadd.f32 %v6645_v8, %v2959_v38  ;;  %v2952_v53 = vpop.f32.mrf.mxu0 }
 0x2c3   : > { %v3143_v26 = vpack.c.bf16 %v3135_v32, %v3135_v32  ;;  %v2926_v8 = vadd.f32 %v6650_v4, %v2889_v47  ;;  %v541_v38 = vsel %vm6016_vm2, 0, %v540_v7  ;;  %v2961_v4 = vadd.f32 %v6672_v27, %v2924_v37  ;;  %v3244_v7 = vld [vmem:[#allocation2 + $0x18] sm:$0xf] }
 0x2c4   : > { %v3100_v23 = vadd.f32 %v3081_v16, %v3032_v41  ;;  %v3447_v36 = vor.u32 %v3446_v63, %v3443_v2  ;;  %542 = vst [vmem:[#allocation2 + $0x34] sm:$0x1] %v541_v38  ;;  %v6778_v63 = vld [vmem:[#allocation3 + $0x38] sm:$0xf] }
 0x2c5   : > { %v3152_v11 = vshrl.u32 %v3143_v26, 16  ;;  %v3155_v58 = vshll.u32 %v3143_v26, 16  ;;  %v2963_v27 = vadd.f32 %v2952_v53, %v2926_v8  ;;  %v4810_v49 = vor.u32 %v6770_v42, %v6778_v63 }
 0x2c6   : > { %v3112_v40 = vadd.f32 %v6687_v24, %v3100_v23  ;;  %v2890_v23 = vadd.f32 %v6664_v31, %v2853_v18  ;;  %v3448_v9 = vrot.slane %v3447_v36, 4  ;;  %v3238_v18 = vld [vmem:[#allocation2 + $0x10] sm:$0xf]  ;;  %v2998_v47 = vadd.f32 %v6682_v0, %v2961_v4 }
 0x2c7   : > { %4812 = vmatmul.msk.bf16.gmra.mxu3 %vm679_vm1, %v4802_v46  ;;  %v3154_v33 = vrot.slane %v3152_v11, 7  ;;  %v2989_v11 = vpop.f32.mrf.mxu1  ;;  %v6786_v53 = vadd.f32 %v6734_v15, %v2962_v3 }
 0x2c8   : > { %vm3120_vm13 = vcmp.gt.f32.partialorder %v3112_v40, 0.0  ;;  %v3128_v28 = vmul.f32 0.2, %v3112_v40  ;;  %v6790_v48 = vadd.f32 %v2989_v11, %v2963_v27 }
 0x2c9   : > { %v3157_v13 = vor.u32 %v3155_v58, %v3154_v33  ;;  %v3158_v50 = vrot.slane %v3154_v33, 4  ;;  %v3016_v16 = vpop.f32.mrf.mxu2  ;;  %v2927_v33 = vadd.f32 %v6666_v14, %v2890_v23 }
 0x2ca   : > { %v3084_v32 = vpop.f32.mrf.mxu3  ;;  %v3136_v41 = vsel %vm3120_vm13, %v3112_v40, %v3128_v28  ;;  %v3033_v55 = vadd.f32 %v3016_v16, %v2996_v35  ;;  %v3452_v40 = vrot.slane %v3450_v17, 5 }
 0x2cb   : > { %v3233_v25 = vsel %vm6149_vm7, %v3157_v13, %v3232_v19  ;;  %v3236_v12 = vsel %vm6016_vm2, %v3158_v50, %v3235_v43  ;;  %v3144_v26 = vpack.c.bf16 %v3136_v41, %v3136_v41  ;;  %v4805_v19 = vld [vmem:[#allocation3 + $0x28] sm:$0xf]  ;;  %v2954_v43 = vpop.f32.mrf.mxu0 }
 0x2cc   : > { %3234 = vst [vmem:[#allocation2 + $0x8] sm:$0xf] %v3233_v25  ;;  %v3101_v46 = vadd.f32 %v3084_v32, %v3033_v55  ;;  %v4806_v2 = vor.u32 %v4848_v59, %v4805_v19  ;;  %v3453_v37 = vsel %vm5106_vm4, %v3448_v9, %v3452_v40  ;;  %v544_v32 = vld [vmem:[#allocation2 + $0x3c] sm:$0x1]  ;;  %v2964_v8 = vadd.f32 %v2954_v43, %v2927_v33 }
 0x2cd   : > { %3237 = vst [vmem:[#allocation2 + $0xc] sm:$0x1] %v3236_v12  ;;  %v3160_v62 = vshrl.u32 %v3144_v26, 16  ;;  %v3163_v31 = vshll.u32 %v3144_v26, 16  ;;  %v6796_v26 = vunpack.c.l.b16 %v3453_v37  ;;  %v545_v3 = vsel %vm6016_vm2, 0, %v544_v32 }
 0x2ce   : > { %v3113_v39 = vadd.f32 %v6687_v24, %v3101_v46  ;;  %546 = vst [vmem:[#allocation2 + $0x3c] sm:$0x1] %v545_v3 }
 0x2cf   : > { %v3162_v22 = vrot.slane %v3160_v62, 7  ;;  %v2991_v9 = vpop.f32.mrf.mxu1 }
 0x2d0   : > { %vm3121_vm14 = vcmp.gt.f32.partialorder %v3113_v39, 0.0  ;;  %v3129_v61 = vmul.f32 0.2, %v3113_v39  ;;  %v6807_v37 = vadd.f32 %v2991_v9, %v2964_v8  ;;  %v548_v8 = vld [vmem:[#allocation2 + $0x44] sm:$0x1] }
 0x2d1   : > { %v3165_v58 = vor.u32 %v3163_v31, %v3162_v22  ;;  %v3166_v54 = vrot.slane %v3162_v22, 4  ;;  %v3018_v20 = vpop.f32.mrf.mxu2 }
 0x2d2   : > { %v3086_v35 = vpop.f32.mrf.mxu3  ;;  %v3137_v57 = vsel %vm3121_vm14, %v3113_v39, %v3129_v61  ;;  %v3034_v28 = vadd.f32 %v3018_v20, %v2997_v5 }
 0x2d3   : > { %v3239_v0 = vsel %vm6149_vm7, %v3165_v58, %v3238_v18  ;;  %v3242_v14 = vsel %vm6016_vm2, %v3166_v54, %v3241_v60  ;;  %v3145_v13 = vpack.c.bf16 %v3137_v57, %v3137_v57  ;;  %v4826_v50 = vld [vmem:[#allocation2 + $0x4] sm:$0xf0] }
 0x2d4   : > { %v3426_v16 = vld [vmem:[#allocation2 + $0x8] sm:$0xf]  ;;  %3240 = vst [vmem:[#allocation2 + $0x10] sm:$0xf] %v3239_v0  ;;  %v3102_v15 = vadd.f32 %v3086_v35, %v3034_v28  ;;  %v4710_v41 = vor.u32 %v4826_v50, %v4709_v29  ;;  %v3427_v55 = vld [vmem:[#allocation2 + $0xc] sm:$0x1] }
 0x2d5   : > { %v3455_v36 = vshrl.u32 %v3426_v16, 16  ;;  %v3458_v17 = vshll.u32 %v3426_v16, 16  ;;  %3243 = vst [vmem:[#allocation2 + $0x14] sm:$0x1] %v3242_v14  ;;  %v3168_v25 = vshrl.u32 %v3145_v13, 16  ;;  %v3171_v12 = vshll.u32 %v3145_v13, 16 }
 0x2d6   : > { %v3114_v46 = vadd.f32 %v6687_v24, %v3102_v15  ;;  %4723 = vmatmul.msk.bf16.vlgmr.msrb.gmra.mxu1 %vm679_vm1, %v4710_v41  ;;  %v3464_v4 = vshll.u32 %v3427_v55, 16  ;;  %v4128_v23 = vld [vmem:[#allocation2 + $0x8] sm:$0xf]  ;;  %v4129_v11 = vld [vmem:[#allocation2 + $0xc] sm:$0x1] }
 0x2d7   : > { %4813 = vmatmul.msk.bf16.gmra.mxu3 %vm679_vm1, %v4806_v2  ;;  %v3457_v59 = vrot.slane %v3455_v36, 4  ;;  %v3460_v38 = vrot.slane %v3458_v17, 5  ;;  %v3170_v62 = vrot.slane %v3168_v25, 7  ;;  %v4145_v39 = vshrl.u32 %v4128_v23, 16 }
 0x2d8   : > { %v4148_v19 = vshll.u32 %v4128_v23, 16  ;;  %vm3122_vm15 = vcmp.gt.f32.partialorder %v3114_v46, 0.0  ;;  %v3130_v40 = vmul.f32 0.2, %v3114_v46  ;;  %v3466_v22 = vrot.slane %v3464_v4, 5 }
 0x2d9   : > { %v3461_v27 = vor.u32 %v3460_v38, %v3457_v59  ;;  %v3173_v31 = vor.u32 %v3171_v12, %v3170_v62  ;;  %v3174_v18 = vrot.slane %v3170_v62, 4  ;;  %v3021_v2 = vpop.f32.mrf.mxu2  ;;  %v4147_v60 = vrot.slane %v4145_v39, 4  ;;  %v3253_v38 = vld [vmem:[#allocation2 + $0x24] sm:$0x1] }
 0x2da   : > { %v3089_v5 = vpop.f32.mrf.mxu3  ;;  %v4150_v61 = vrot.slane %v4148_v19, 5  ;;  %v3138_v33 = vsel %vm3122_vm15, %v3114_v46, %v3130_v40  ;;  %v3035_v58 = vadd.f32 %v3021_v2, %v2998_v47  ;;  %v4154_v20 = vshll.u32 %v4129_v11, 16 }
 0x2db   : > { %v3462_v54 = vrot.slane %v3461_v27, 4  ;;  %v3245_v35 = vsel %vm6149_vm7, %v3173_v31, %v3244_v7  ;;  %v3248_v29 = vsel %vm6016_vm2, %v3174_v18, %v3247_v44  ;;  %v3146_v43 = vpack.c.bf16 %v3138_v33, %v3138_v33  ;;  %v4130_v57 = vld [vmem:[#allocation2 + $0x10] sm:$0xf]  ;;  %v3250_v44 = vld [vmem:[#allocation2 + $0x20] sm:$0xf] }
 0x2dc   : > { %v4151_v28 = vor.u32 %v4150_v61, %v4147_v60  ;;  %3246 = vst [vmem:[#allocation2 + $0x18] sm:$0xf] %v3245_v35  ;;  %v3103_v0 = vadd.f32 %v3089_v5, %v3035_v58  ;;  %v4131_v13 = vld [vmem:[#allocation2 + $0x14] sm:$0x1]  ;;  %v4159_v47 = vshrl.u32 %v4130_v57, 16  ;;  %v4156_v41 = vrot.slane %v4154_v20, 5 }
 0x2dd   : > { %v3467_v14 = vsel %vm5106_vm4, %v3462_v54, %v3466_v22  ;;  %v3428_v50 = vld [vmem:[#allocation2 + $0x10] sm:$0xf]  ;;  %3249 = vst [vmem:[#allocation2 + $0x1c] sm:$0x1] %v3248_v29  ;;  %v3176_v16 = vshrl.u32 %v3146_v43, 16  ;;  %v4162_v17 = vshll.u32 %v4130_v57, 16 }
 0x2de   : > { %v3553_v32 = vunpack.c.l.b16 %v3467_v14  ;;  %v4152_v15 = vrot.slane %v4151_v28, 4  ;;  %v3115_v55 = vadd.f32 %v6687_v24, %v3103_v0  ;;  %v4161_v36 = vrot.slane %v4159_v47, 4  ;;  %v4713_v22 = vld [vmem:[#allocation2 + $0x10] sm:$0xf]  ;;  %v3429_v18 = vld [vmem:[#allocation2 + $0x14] sm:$0x1] }
 0x2df   : > { %v4168_v25 = vshll.u32 %v4131_v13, 16  ;;  %v3178_v12 = vrot.slane %v3176_v16, 7  ;;  %v3179_v7 = vshll.u32 %v3146_v43, 16  ;;  %v549_v59 = vsel %vm6016_vm2, 0, %v548_v8  ;;  %v3256_v14 = vld [vmem:[#allocation2 + $0x28] sm:$0xf] }
 0x2e0   : > { %v3560_v46 = vpack.c.b16 %v3553_v32, %v6796_v26  ;;  %vm3123_vm3 = vcmp.gt.f32.partialorder %v3115_v55, 0.0  ;;  %v3131_v4 = vmul.f32 0.2, %v3115_v55  ;;  %v4157_v23 = vsel %vm5106_vm4, %v4152_v15, %v4156_v41  ;;  %550 = vst [vmem:[#allocation2 + $0x44] sm:$0x1] %v549_v59 }
 0x2e1   : > { %v4164_v62 = vrot.slane %v4162_v17, 5  ;;  %v3181_v3 = vor.u32 %v3179_v7, %v3178_v12  ;;  %v3182_v11 = vrot.slane %v3178_v12, 4  ;;  %v3023_v39 = vpop.f32.mrf.mxu2  ;;  %v4170_v9 = vrot.slane %v4168_v25, 5  ;;  %v3259_v13 = vld [vmem:[#allocation2 + $0x2c] sm:$0x1] }
 0x2e2   : > { %v3091_v19 = vpop.f32.mrf.mxu3  ;;  %4727 = vmatmul.msk.bf16.vlgmr.msra.gmra.mxu2 %vm679_vm1, %v3560_v46  ;;  %v3469_v40 = vshrl.u32 %v3428_v50, 16  ;;  %v3139_v26 = vsel %vm3123_vm3, %v3115_v55, %v3131_v4  ;;  %v3036_v27 = vadd.f32 %v3023_v39, %v6786_v53  ;;  %v3472_v2 = vshll.u32 %v3428_v50, 16 }
 0x2e3   : > { %v4165_v31 = vor.u32 %v4164_v62, %v4161_v36  ;;  %v3251_v5 = vsel %vm6149_vm7, %v3181_v3, %v3250_v44  ;;  %v3254_v60 = vsel %vm6016_vm2, %v3182_v11, %v3253_v38  ;;  %v3147_v61 = vpack.c.bf16 %v3139_v26, %v3139_v26  ;;  %v4827_v33 = vld [vmem:[#allocation2 + $0x14] sm:$0xf0] }
 0x2e4   : > { %v3430_v58 = vld [vmem:[#allocation2 + $0x18] sm:$0xf]  ;;  %v3471_v54 = vrot.slane %v3469_v40, 4  ;;  %3252 = vst [vmem:[#allocation2 + $0x20] sm:$0xf] %v3251_v5  ;;  %v3104_v20 = vadd.f32 %v3091_v19, %v3036_v27  ;;  %v4714_v35 = vor.u32 %v4827_v33, %v4713_v22  ;;  %v3474_v43 = vrot.slane %v3472_v2, 5 }
 0x2e5   : > { %v4166_v29 = vrot.slane %v4165_v31, 4  ;;  %3255 = vst [vmem:[#allocation2 + $0x24] sm:$0x1] %v3254_v60  ;;  %v3184_v53 = vshrl.u32 %v3147_v61, 16  ;;  %v4256_v57 = vunpack.c.l.b16 %v4157_v23  ;;  %v3478_v28 = vshll.u32 %v3429_v18, 16 }
 0x2e6   : > { %v3483_v0 = vshrl.u32 %v3430_v58, 16  ;;  %v3116_v47 = vadd.f32 %v6687_v24, %v3104_v20  ;;  %4724 = vmatmul.msk.bf16.gmra.mxu1 %vm679_vm1, %v4714_v35  ;;  %v3475_v16 = vor.u32 %v3474_v43, %v3471_v54  ;;  %v3486_v32 = vshll.u32 %v3430_v58, 16  ;;  %v3431_v36 = vld [vmem:[#allocation2 + $0x1c] sm:$0x1]  ;;  %v4132_v59 = vld [vmem:[#allocation2 + $0x18] sm:$0xf] }
 0x2e7   : > { %4814 = vmatmul.msk.bf16.gmra.mxu3 %vm679_vm1, %v4810_v49  ;;  %v4171_v50 = vsel %vm5106_vm4, %v4166_v29, %v4170_v9  ;;  %v3186_v15 = vrot.slane %v3184_v53, 7  ;;  %v3187_v41 = vshll.u32 %v3147_v61, 16  ;;  %v3480_v12 = vrot.slane %v3478_v28, 5  ;;  %v4133_v9 = vld [vmem:[#allocation2 + $0x1c] sm:$0x1] }
 0x2e8   : > { %v4257_v55 = vunpack.c.l.b16 %v4171_v50  ;;  %v3485_v17 = vrot.slane %v3483_v0, 4  ;;  %vm3124_vm6 = vcmp.gt.f32.partialorder %v3116_v47, 0.0  ;;  %v3132_v25 = vmul.f32 0.2, %v3116_v47  ;;  %v3262_v20 = vld [vmem:[#allocation2 + $0x30] sm:$0xf] }
 0x2e9   : > { %v3476_v8 = vrot.slane %v3475_v16, 4  ;;  %v3189_v7 = vor.u32 %v3187_v41, %v3186_v15  ;;  %v3190_v44 = vrot.slane %v3186_v15, 4  ;;  %v3026_v46 = vpop.f32.mrf.mxu2  ;;  %v3488_v49 = vrot.slane %v3486_v32, 5  ;;  %v3265_v53 = vld [vmem:[#allocation2 + $0x34] sm:$0x1] }
 0x2ea   : > { %v3094_v42 = vpop.f32.mrf.mxu3  ;;  %v4264_v63 = vpack.c.b16 %v4257_v55, %v4256_v57  ;;  %v3140_v38 = vsel %vm3124_vm6, %v3116_v47, %v3132_v25  ;;  %v3037_v4 = vadd.f32 %v3026_v46, %v6790_v48  ;;  %v3492_v62 = vshll.u32 %v3431_v36, 16 }
 0x2eb   : > { %v3481_v23 = vsel %vm5106_vm4, %v3476_v8, %v3480_v12  ;;  %v3257_v3 = vsel %vm6149_vm7, %v3189_v7, %v3256_v14  ;;  %v3260_v11 = vsel %vm6016_vm2, %v3190_v44, %v3259_v13  ;;  %v3148_v39 = vpack.c.bf16 %v3140_v38, %v3140_v38  ;;  %v4134_v40 = vld [vmem:[#allocation2 + $0x20] sm:$0xf] }
 0x2ec   : > { %4815 = vmatmul.msk.bf16.vlgmr.msrb.gmra.mxu0 %vm679_vm1, %v4264_v63  ;;  %v3489_v19 = vor.u32 %v3488_v49, %v3485_v17  ;;  %3258 = vst [vmem:[#allocation2 + $0x28] sm:$0xf] %v3257_v3  ;;  %v3105_v26 = vadd.f32 %v3094_v42, %v3037_v4  ;;  %v3494_v27 = vrot.slane %v3492_v62, 5  ;;  %v3554_v48 = vunpack.c.l.b16 %v3481_v23  ;;  %v4135_v50 = vld [vmem:[#allocation2 + $0x24] sm:$0x1] }
 0x2ed   : > { %v4173_v22 = vshrl.u32 %v4132_v59, 16  ;;  %3261 = vst [vmem:[#allocation2 + $0x2c] sm:$0x1] %v3260_v11  ;;  %v3192_v31 = vshrl.u32 %v3148_v39, 16  ;;  %v3195_v18 = vshll.u32 %v3148_v39, 16  ;;  %v4176_v5 = vshll.u32 %v4132_v59, 16 }
 0x2ee   : > { %v3490_v2 = vrot.slane %v3489_v19, 4  ;;  %v3117_v60 = vadd.f32 %v6687_v24, %v3105_v26  ;;  %v4182_v33 = vshll.u32 %v4133_v9, 16  ;;  %v4187_v58 = vshrl.u32 %v4134_v40, 16  ;;  %v4717_v36 = vld [vmem:[#allocation2 + $0x20] sm:$0xf] }
 0x2ef   : > { %v4175_v61 = vrot.slane %v4173_v22, 4  ;;  %v3194_v54 = vrot.slane %v3192_v31, 7  ;;  %v4178_v29 = vrot.slane %v4176_v5, 5  ;;  %v4190_v43 = vshll.u32 %v4134_v40, 16  ;;  %v3432_v25 = vld [vmem:[#allocation2 + $0x20] sm:$0xf] }
 0x2f0   : > { %v3495_v35 = vsel %vm5106_vm4, %v3490_v2, %v3494_v27  ;;  %vm3125_vm8 = vcmp.gt.f32.partialorder %v3117_v60, 0.0  ;;  %v3133_v57 = vmul.f32 0.2, %v3117_v60  ;;  %v4184_v0 = vrot.slane %v4182_v33, 5  ;;  %v3433_v63 = vld [vmem:[#allocation2 + $0x24] sm:$0x1] }
 0x2f1   : > { %v3555_v28 = vunpack.c.l.b16 %v3495_v35  ;;  %v3197_v14 = vor.u32 %v3195_v18, %v3194_v54  ;;  %v3198_v13 = vrot.slane %v3194_v54, 4  ;;  %v3028_v47 = vpop.f32.mrf.mxu2  ;;  %v4179_v16 = vor.u32 %v4178_v29, %v4175_v61  ;;  %v3268_v27 = vld [vmem:[#allocation2 + $0x38] sm:$0xf]  ;;  %v3271_v18 = vld [vmem:[#allocation2 + $0x3c] sm:$0x1] }
 0x2f2   : > { %v4189_v32 = vrot.slane %v4187_v58, 4  ;;  %v3141_v15 = vsel %vm3125_vm8, %v3117_v60, %v3133_v57  ;;  %v3038_v41 = vadd.f32 %v3028_v47, %v6807_v37  ;;  %v4192_v17 = vrot.slane %v4190_v43, 5  ;;  %v3096_v44 = vpop.f32.mrf.mxu3 }
 0x2f3   : > { %v3561_v55 = vpack.c.b16 %v3555_v28, %v3554_v48  ;;  %v3263_v8 = vsel %vm6149_vm7, %v3197_v14, %v3262_v20  ;;  %v3266_v12 = vsel %vm6016_vm2, %v3198_v13, %v3265_v53  ;;  %v3149_v7 = vpack.c.bf16 %v3141_v15, %v3141_v15  ;;  %v4828_v46 = vld [vmem:[#allocation2 + $0x24] sm:$0xf0] }
 0x2f4   : > { %v4180_v42 = vrot.slane %v4179_v16, 4  ;;  %3264 = vst [vmem:[#allocation2 + $0x30] sm:$0xf] %v3263_v8  ;;  %v3106_v49 = vadd.f32 %v3096_v44, %v3038_v41  ;;  %v4718_v37 = vor.u32 %v4828_v46, %v4717_v36  ;;  %v4193_v59 = vor.u32 %v4192_v17, %v4189_v32  ;;  %v3434_v4 = vld [vmem:[#allocation2 + $0x28] sm:$0xf] }
 0x2f5   : > { %4728 = vmatmul.msk.bf16.gmra.mxu2 %vm679_vm1, %v3561_v55  ;;  %v4196_v38 = vshll.u32 %v4135_v50, 16  ;;  %3267 = vst [vmem:[#allocation2 + $0x34] sm:$0x1] %v3266_v12  ;;  %v3200_v23 = vshrl.u32 %v3149_v7, 16  ;;  %v3203_v62 = vshll.u32 %v3149_v7, 16  ;;  %v3497_v11 = vshrl.u32 %v3432_v25, 16 }
 0x2f6   : > { %v4185_v3 = vsel %vm5106_vm4, %v4180_v42, %v4184_v0  ;;  %v3118_v39 = vadd.f32 %v6687_v24, %v3106_v49  ;;  %4725 = vmatmul.msk.bf16.gmra.mxu1 %vm679_vm1, %v4718_v37  ;;  %v4194_v19 = vrot.slane %v4193_v59, 4  ;;  %v3500_v22 = vshll.u32 %v3432_v25, 16  ;;  %v3435_v58 = vld [vmem:[#allocation2 + $0x2c] sm:$0x1]  ;;  %v4136_v53 = vld [vmem:[#allocation2 + $0x28] sm:$0xf] }
 0x2f7   : > { %v4198_v9 = vrot.slane %v4196_v38, 5  ;;  %v4258_v40 = vunpack.c.l.b16 %v4185_v3  ;;  %v3202_v26 = vrot.slane %v3200_v23, 7  ;;  %v3499_v48 = vrot.slane %v3497_v11, 4  ;;  %v4137_v13 = vld [vmem:[#allocation2 + $0x2c] sm:$0x1] }
 0x2f8   : > { %v3506_v31 = vshll.u32 %v3433_v63, 16  ;;  %vm3126_vm9 = vcmp.gt.f32.partialorder %v3118_v39, 0.0  ;;  %v3134_v2 = vmul.f32 0.2, %v3118_v39  ;;  %v3511_v60 = vshrl.u32 %v3434_v4, 16 }
 0x2f9   : > { %v4199_v5 = vsel %vm5106_vm4, %v4194_v19, %v4198_v9  ;;  %v3205_v61 = vor.u32 %v3203_v62, %v3202_v26  ;;  %v3206_v33 = vrot.slane %v3202_v26, 4  ;;  %v3502_v54 = vrot.slane %v3500_v22, 5  ;;  %v3274_v25 = vld [vmem:[#allocation2 + $0x40] sm:$0xf]  ;;  %v3277_v59 = vld [vmem:[#allocation2 + $0x44] sm:$0x1] }
 0x2fa   : > { %v4259_v24 = vunpack.c.l.b16 %v4199_v5  ;;  %v3142_v20 = vsel %vm3126_vm9, %v3118_v39, %v3134_v2  ;;  %v3508_v35 = vrot.slane %v3506_v31, 5  ;;  %v3513_v29 = vrot.slane %v3511_v60, 4  ;;  %v508_v19 = vld [vmem:[%s7074_s6 + $0x18] sm:$0xf] }
 0x2fb   : > { %v3514_v43 = vshll.u32 %v3434_v4, 16  ;;  %v3269_v57 = vsel %vm6149_vm7, %v3205_v61, %v3268_v27  ;;  %v3272_v28 = vsel %vm6016_vm2, %v3206_v33, %v3271_v18  ;;  %v3150_v0 = vpack.c.bf16 %v3142_v20, %v3142_v20  ;;  %v4138_v32 = vld [vmem:[#allocation2 + $0x30] sm:$0xf] }
 0x2fc   : > { %v4265_v14 = vpack.c.b16 %v4259_v24, %v4258_v40  ;;  %3270 = vst [vmem:[#allocation2 + $0x38] sm:$0xf] %v3269_v57  ;;  %v3503_v47 = vor.u32 %v3502_v54, %v3499_v48  ;;  %v3520_v16 = vshll.u32 %v3435_v58, 16  ;;  %v3813_v15 = vor.u32 %v6774_v1, %v6766_v52  ;;  %v4139_v42 = vld [vmem:[#allocation2 + $0x34] sm:$0x1] }
 0x2fd   : > { %v3516_v50 = vrot.slane %v3514_v43, 5  ;;  %3273 = vst [vmem:[#allocation2 + $0x3c] sm:$0x1] %v3272_v28  ;;  %v3208_v41 = vshrl.u32 %v3150_v0, 16  ;;  %v3211_v55 = vshll.u32 %v3150_v0, 16  ;;  %v4201_v36 = vshrl.u32 %v4136_v53, 16 }
 0x2fe   : > { %4816 = vmatmul.msk.bf16.gmra.mxu0 %vm679_vm1, %v4265_v14  ;;  %v4204_v17 = vshll.u32 %v4136_v53, 16  ;;  %v3504_v8 = vrot.slane %v3503_v47, 4  ;;  %v3522_v7 = vrot.slane %v3520_v16, 5  ;;  %v4210_v44 = vshll.u32 %v4137_v13, 16  ;;  %v4721_v11 = vld [vmem:[#allocation2 + $0x30] sm:$0xf] }
 0x2ff   : > { %v3517_v12 = vor.u32 %v3516_v50, %v3513_v29  ;;  %v3210_v46 = vrot.slane %v3208_v41, 7  ;;  %v4203_v63 = vrot.slane %v4201_v36, 4  ;;  %v4215_v37 = vshrl.u32 %v4138_v32, 16  ;;  %v3436_v48 = vld [vmem:[#allocation2 + $0x30] sm:$0xf] }
 0x300   : > { %v4206_v49 = vrot.slane %v4204_v17, 5  ;;  %v3509_v52 = vsel %vm5106_vm4, %v3504_v8, %v3508_v35  ;;  %v4212_v38 = vrot.slane %v4210_v44, 5  ;;  %v4218_v4 = vshll.u32 %v4138_v32, 16  ;;  %v3437_v20 = vld [vmem:[#allocation2 + $0x34] sm:$0x1] }
 0x301   : > { %v3518_v1 = vrot.slane %v3517_v12, 4  ;;  %v3213_v23 = vor.u32 %v3211_v55, %v3210_v46  ;;  %v3214_v62 = vrot.slane %v3210_v46, 4  ;;  %v3556_v3 = vunpack.c.l.b16 %v3509_v52  ;;  %v6880_v43 = vld [vmem:[#allocation4 + $0x10] sm:$0xf]  ;;  %v3782_v36 = vld [vmem:[#allocation4 + $0x18] sm:$0xf] }
 0x302   : > { %v4207_v39 = vor.u32 %v4206_v49, %v4203_v63  ;;  %v4217_v40 = vrot.slane %v4215_v37, 4  ;;  %v4220_v26 = vrot.slane %v4218_v4, 5  ;;  %v4224_v27 = vshll.u32 %v4139_v42, 16 }
 0x303   : > { %v3523_v9 = vsel %vm5106_vm4, %v3518_v1, %v3522_v7  ;;  %v3275_v22 = vsel %vm6149_vm7, %v3213_v23, %v3274_v25  ;;  %v3278_v31 = vsel %vm6016_vm2, %v3214_v62, %v3277_v59  ;;  %v4829_v2 = vld [vmem:[#allocation2 + $0x34] sm:$0xf0]  ;;  %v4009_v24 = vsel %vm692_vm0, %v508_v19, 0 }
 0x304   : > { %v3557_v18 = vunpack.c.l.b16 %v3523_v9  ;;  %v4208_v5 = vrot.slane %v4207_v39, 4  ;;  %v3438_v60 = vld [vmem:[#allocation2 + $0x38] sm:$0xf]  ;;  %3276 = vst [vmem:[#allocation2 + $0x40] sm:$0xf] %v3275_v22  ;;  %v4722_v61 = vor.u32 %v4829_v2, %v4721_v11  ;;  %v4221_v33 = vor.u32 %v4220_v26, %v4217_v40  ;;  %4018 = vmatpush.bf16.msrb.mxu2 %v4009_v24 }
 0x305   : > { %v3818_v58 = vrot.slane %v3816_v51, 5  ;;  %3279 = vst [vmem:[#allocation2 + $0x44] sm:$0x1] %v3278_v31  ;;  %v3525_v35 = vshrl.u32 %v3436_v48, 16  ;;  %v3528_v29 = vshll.u32 %v3436_v48, 16  ;;  %v4226_v6 = vrot.slane %v4224_v27, 5 }
 0x306   : > { %v3562_v54 = vpack.c.b16 %v3557_v18, %v3556_v3  ;;  %v4213_v56 = vsel %vm5106_vm4, %v4208_v5, %v4212_v38  ;;  %4726 = vmatmul.msk.bf16.gmra.mxu1 %vm679_vm1, %v4722_v61  ;;  %v4222_v53 = vrot.slane %v4221_v33, 4  ;;  %v3439_v51 = vld [vmem:[#allocation2 + $0x3c] sm:$0x1]  ;;  %v3539_v57 = vshrl.u32 %v3438_v60, 16  ;;  %v4140_v50 = vld [vmem:[#allocation2 + $0x38] sm:$0xf] }
 0x307   : > { %v3814_v28 = vrot.slane %v3813_v15, 4  ;;  %v4260_v0 = vunpack.c.l.b16 %v4213_v56  ;;  %v3527_v14 = vrot.slane %v3525_v35, 4  ;;  %v3530_v13 = vrot.slane %v3528_v29, 5  ;;  %v4141_v37 = vld [vmem:[#allocation2 + $0x3c] sm:$0x1] }
 0x308   : > { %4729 = vmatmul.msk.bf16.gmra.mxu2 %vm679_vm1, %v3562_v54  ;;  %v3542_v47 = vshll.u32 %v3438_v60, 16  ;;  %v4227_v16 = vsel %vm5106_vm4, %v4222_v53, %v4226_v6  ;;  %v3534_v32 = vshll.u32 %v3437_v20, 16  ;;  %v3541_v41 = vrot.slane %v3539_v57, 4 }
 0x309   : > { %v4362_v55 = vsel %vm692_vm0, %v4356_v45, 0  ;;  %v4261_v17 = vunpack.c.l.b16 %v4227_v16  ;;  %v3531_v25 = vor.u32 %v3530_v13, %v3527_v14  ;;  %v3548_v12 = vshll.u32 %v3439_v51, 16  ;;  %v3783_v51 = vld [vmem:[#allocation4 + $0x1c] sm:$0x1]  ;;  %v3786_v16 = vld [vmem:[#allocation4 + $0x28] sm:$0xf] }
 0x30a   : > { %v3544_v8 = vrot.slane %v3542_v47, 5  ;;  %4371 = vmatpush.bf16.msrb.mxu1 %v4362_v55  ;;  %v3819_v15 = vsel %vm5106_vm4, %v3814_v28, %v3818_v58  ;;  %v4229_v7 = vshrl.u32 %v4140_v50, 16  ;;  %v4232_v44 = vshll.u32 %v4140_v50, 16  ;;  %v3784_v55 = vld [vmem:[#allocation4 + $0x20] sm:$0xf] }
 0x30b   : > { %v3821_v46 = vshrl.u32 %v6880_v43, 16  ;;  %v4266_v42 = vpack.c.b16 %v4261_v17, %v4260_v0  ;;  %v3532_v63 = vrot.slane %v3531_v25, 4  ;;  %v4142_v59 = vld [vmem:[#allocation2 + $0x40] sm:$0xf]  ;;  %v3835_v52 = vshrl.u32 %v3782_v36, 16 }
 0x30c   : > { %v3545_v49 = vor.u32 %v3544_v8, %v3541_v41  ;;  %v3536_v1 = vrot.slane %v3534_v32, 5  ;;  %v4143_v38 = vld [vmem:[#allocation2 + $0x44] sm:$0x1]  ;;  %v4231_v4 = vrot.slane %v4229_v7, 4  ;;  %v4234_v23 = vrot.slane %v4232_v44, 5 }
 0x30d   : > { %v4243_v62 = vshrl.u32 %v4142_v59, 16  ;;  %v3550_v11 = vrot.slane %v3548_v12, 5  ;;  %v4246_v39 = vshll.u32 %v4142_v59, 16  ;;  %v3838_v19 = vshll.u32 %v3782_v36, 16  ;;  %v6910_v12 = vpop.f32.mrf.mxu0 }
 0x30e   : > { %4817 = vmatmul.msk.bf16.gmra.mxu0 %vm679_vm1, %v4266_v42  ;;  %v3546_v3 = vrot.slane %v3545_v49, 4  ;;  %v3537_v9 = vsel %vm5106_vm4, %v3532_v63, %v3536_v1  ;;  %v4235_v40 = vor.u32 %v4234_v23, %v4231_v4  ;;  %v4238_v26 = vshll.u32 %v4141_v37, 16  ;;  %v4842_v49 = vld [vmem:[#allocation2 + $0xc] sm:$0xf0]  ;;  %v4777_v1 = vld [vmem:[#allocation2 + $0x8] sm:$0xf] }
 0x30f   : > { %v4245_v27 = vrot.slane %v4243_v62, 4  ;;  %v4248_v22 = vrot.slane %v4246_v39, 5  ;;  %v4252_v31 = vshll.u32 %v4143_v38, 16  ;;  %v3824_v18 = vshll.u32 %v6880_v43, 16  ;;  %v3787_v4 = vld [vmem:[#allocation4 + $0x2c] sm:$0x1] }
 0x310   : > { %v3551_v48 = vsel %vm5106_vm4, %v3546_v3, %v3550_v11  ;;  %v3905_v5 = vunpack.c.l.b16 %v3819_v15  ;;  %v4236_v60 = vrot.slane %v4235_v40, 4  ;;  %v3558_v61 = vunpack.c.l.b16 %v3537_v9  ;;  %v3785_v3 = vld [vmem:[#allocation4 + $0x24] sm:$0x1] }
 0x311   : > { %v3559_v2 = vunpack.c.l.b16 %v3551_v48  ;;  %v4249_v33 = vor.u32 %v4248_v22, %v4245_v27  ;;  %v3837_v24 = vrot.slane %v3835_v52, 4  ;;  %v3840_v58 = vrot.slane %v3838_v19, 5  ;;  %v3788_v22 = vld [vmem:[#allocation4 + $0x30] sm:$0xf] }
 0x312   : > { %v3904_v45 = vunpack.c.l.b16 %v3805_v34  ;;  %v4240_v54 = vrot.slane %v4238_v26, 5  ;;  %v3823_v56 = vrot.slane %v3821_v46, 4  ;;  %v4254_v29 = vrot.slane %v4252_v31, 5  ;;  %v3790_v26 = vld [vmem:[#allocation4 + $0x38] sm:$0xf] }
 0x313   : > { %v3563_v20 = vpack.c.b16 %v3559_v2, %v3558_v61  ;;  %v4250_v35 = vrot.slane %v4249_v33, 4  ;;  %v3826_v53 = vrot.slane %v3824_v18, 5  ;;  %v3841_v28 = vor.u32 %v3840_v58, %v3837_v24 }
 0x314   : > { %v3912_v43 = vpack.c.b16 %v3905_v5, %v3904_v45  ;;  %v4241_v6 = vsel %vm5106_vm4, %v4236_v60, %v4240_v54  ;;  %v3844_v14 = vshll.u32 %v3783_v51, 16  ;;  %v3830_v47 = vshll.u32 %v3781_v30, 16 }
 0x315   : > { %v4255_v57 = vsel %vm5106_vm4, %v4250_v35, %v4254_v29  ;;  %v4262_v21 = vunpack.c.l.b16 %v4241_v6  ;;  %v3827_v34 = vor.u32 %v3826_v53, %v3823_v56  ;;  %v3842_v50 = vrot.slane %v3841_v28, 4  ;;  %v6916_v19 = vpop.f32.mrf.mxu0  ;;  %v4843_v56 = vld [vmem:[#allocation2 + $0x1c] sm:$0xf0]  ;;  %v4781_v53 = vld [vmem:[#allocation2 + $0x18] sm:$0xf] }
 0x316   : > { %4771 = vmatmul.msk.bf16.vlgmr.msra.gmra.mxu1 %vm679_vm1, %v3912_v43  ;;  %v4263_v0 = vunpack.c.l.b16 %v4255_v57  ;;  %v3846_v41 = vrot.slane %v3844_v14, 5  ;;  %v3832_v36 = vrot.slane %v3830_v47, 5  ;;  %v3863_v25 = vshrl.u32 %v3786_v16, 16  ;;  %v3791_v6 = vld [vmem:[#allocation4 + $0x3c] sm:$0x1] }
 0x317   : > { %v3828_v32 = vrot.slane %v3827_v34, 4  ;;  %v3866_v8 = vshll.u32 %v3786_v16, 16  ;;  %v3849_v7 = vshrl.u32 %v3784_v55, 16  ;;  %v3852_v44 = vshll.u32 %v3784_v55, 16  ;;  %v3789_v28 = vld [vmem:[#allocation4 + $0x34] sm:$0x1] }
 0x318   : > { %4730 = vmatmul.msk.bf16.gmra.mxu2 %vm679_vm1, %v3563_v20  ;;  %v4267_v13 = vpack.c.b16 %v4263_v0, %v4262_v21  ;;  %v3847_v17 = vsel %vm5106_vm4, %v3842_v50, %v3846_v41  ;;  %v3865_v42 = vrot.slane %v3863_v25, 4  ;;  %v4778_v23 = vor.u32 %v4842_v49, %v4777_v1  ;;  %v4844_v55 = vld [vmem:[#allocation2 + $0x2c] sm:$0xf0] }
 0x319   : > { %v3833_v15 = vsel %vm5106_vm4, %v3828_v32, %v3832_v36  ;;  %v3907_v46 = vunpack.c.l.b16 %v3847_v17  ;;  %v3868_v63 = vrot.slane %v3866_v8, 5  ;;  %v3851_v59 = vrot.slane %v3849_v7, 4  ;;  %v4785_v17 = vld [vmem:[#allocation2 + $0x28] sm:$0xf] }
 0x31a   : > { %v3906_v37 = vunpack.c.l.b16 %v3833_v15  ;;  %v3854_v52 = vrot.slane %v3852_v44, 5  ;;  %v3872_v39 = vshll.u32 %v3787_v4, 16  ;;  %v3858_v9 = vshll.u32 %v3785_v3, 16  ;;  %v4845_v44 = vld [vmem:[#allocation2 + $0x3c] sm:$0xf0]  ;;  %v3668_v4 = vpop.f32.mrf.mxu3 }
 0x31b   : > { %v3869_v62 = vor.u32 %v3868_v63, %v3865_v42  ;;  %v3891_v2 = vshrl.u32 %v3790_v26, 16  ;;  %v3894_v5 = vshll.u32 %v3790_v26, 16  ;;  %v3877_v61 = vshrl.u32 %v3788_v22, 16  ;;  %v4789_v42 = vld [vmem:[#allocation2 + $0x38] sm:$0xf] }
 0x31c   : > { %v3913_v38 = vpack.c.b16 %v3907_v46, %v3906_v37  ;;  %v3855_v11 = vor.u32 %v3854_v52, %v3851_v59  ;;  %v3874_v48 = vrot.slane %v3872_v39, 5  ;;  %v3860_v31 = vrot.slane %v3858_v9, 5  ;;  %v7379_v9 = vld [vmem:[#allocation40_spill] sm:$0xff] }
 0x31d   : > { %v3870_v40 = vrot.slane %v3869_v62, 4  ;;  %v3880_v33 = vshll.u32 %v3788_v22, 16  ;;  %v3893_v58 = vrot.slane %v3891_v2, 4  ;;  %v3896_v45 = vrot.slane %v3894_v5, 5  ;;  %v6922_v54 = vpop.f32.mrf.mxu0  ;;  %v7380_v2 = vld [vmem:[#allocation47_spill] sm:$0xff] }
 0x31e   : > { %4818 = vmatmul.msk.bf16.gmra.mxu0 %vm679_vm1, %v4267_v13  ;;  %v3856_v27 = vrot.slane %v3855_v11, 4  ;;  %v3879_v35 = vrot.slane %v3877_v61, 4  ;;  %v4782_v51 = vor.u32 %v4843_v56, %v4781_v53  ;;  %v3900_v30 = vshll.u32 %v3791_v6, 16 }
 0x31f   : > { %v3875_v18 = vsel %vm5106_vm4, %v3870_v40, %v3874_v48  ;;  %v3882_v29 = vrot.slane %v3880_v33, 5  ;;  %v3897_v57 = vor.u32 %v3896_v45, %v3893_v58  ;;  %v3886_v21 = vshll.u32 %v3789_v28, 16 }
 0x320   : > { %v3861_v60 = vsel %vm5106_vm4, %v3856_v27, %v3860_v31  ;;  %v3909_v24 = vunpack.c.l.b16 %v3875_v18  ;;  %v3902_v13 = vrot.slane %v3900_v30, 5  ;;  %v4786_v8 = vor.u32 %v4844_v55, %v4785_v17 }
 0x321   : > { %v3908_v20 = vunpack.c.l.b16 %v3861_v60  ;;  %v3883_v0 = vor.u32 %v3882_v29, %v3879_v35  ;;  %v3898_v34 = vrot.slane %v3897_v57, 4  ;;  %v3888_v50 = vrot.slane %v3886_v21, 5 }
 0x322   : > { %v4790_v63 = vor.u32 %v4845_v44, %v4789_v42  ;;  %v3670_v11 = vpop.f32.mrf.mxu3 }
 0x323   : > { %v3914_v43 = vpack.c.b16 %v3909_v24, %v3908_v20  ;;  %v3884_v14 = vrot.slane %v3883_v0, 4  ;;  %v3903_v16 = vsel %vm5106_vm4, %v3898_v34, %v3902_v13 }
 0x324   : > { %v3911_v41 = vunpack.c.l.b16 %v3903_v16 }
 0x325   : > { %v6926_v47 = vpop.f32.mrf.mxu0  ;;  %v3889_v32 = vsel %vm5106_vm4, %v3884_v14, %v3888_v50 }
 0x326   : > { %4772 = vmatmul.msk.bf16.gmra.mxu1 %vm679_vm1, %v3913_v38  ;;  %v3910_v36 = vunpack.c.l.b16 %v3889_v32  ;;  %v7378_v38 = vld [vmem:[#allocation32_spill] sm:$0xff] }
 0x328   : > { %4791 = vmatmul.msk.bf16.vlgmr.msrb.gmra.mxu2 %vm679_vm1, %v4778_v23  ;;  %v3915_v25 = vpack.c.b16 %v3911_v41, %v3910_v36 }
 0x32a   : > { %v3673_v48 = vpop.f32.mrf.mxu3 }
 0x32d   : > { %v6932_v15 = vpop.f32.mrf.mxu0 }
 0x332   : > { %v3675_v5 = vpop.f32.mrf.mxu3 }
 0x335   : > { %v6936_v7 = vpop.f32.mrf.mxu0 }
 0x336   : > { %4773 = vmatmul.msk.bf16.gmra.mxu1 %vm679_vm1, %v3914_v43 }
 0x338   : > { %4792 = vmatmul.msk.bf16.gmra.mxu2 %vm679_vm1, %v4782_v51 }
 0x33a   : > { %v6965_v24 = vpop.f32.mrf.mxu3 }
 0x33d   : > { %v6941_v49 = vpop.f32.mrf.mxu0 }
 0x342   : > { %v6971_v20 = vpop.f32.mrf.mxu3 }
 0x345   : > { %v6943_v52 = vpop.f32.mrf.mxu0 }
 0x346   : > { %4774 = vmatmul.msk.bf16.gmra.mxu1 %vm679_vm1, %v3915_v25 }
 0x348   : > { %4793 = vmatmul.msk.bf16.gmra.mxu2 %vm679_vm1, %v4786_v8 }
 0x34a   : > { %v6977_v6 = vpop.f32.mrf.mxu3 }
 0x34d   : > { %v3748_v3 = vpop.f32.mrf.mxu0 }
 0x352   : > { %v6983_v0 = vpop.f32.mrf.mxu3 }
 0x353   : > { %v3404_v46 = vpop.f32.mrf.mxu1 }
 0x354   : > { %v3405_v14 = vadd.f32 %v3404_v46, %v6910_v12 }
 0x355   : > { %v3750_v26 = vpop.f32.mrf.mxu0 }
 0x356   : > { %4819 = vmatmul.msk.bf16.vlgmr.msrb.gmra.mxu1 %vm679_vm1, %v7377_v10 }
 0x358   : > { %4794 = vmatmul.msk.bf16.gmra.mxu2 %vm679_vm1, %v4790_v63 }
 0x35a   : > { %v4100_v50 = vpop.f32.mrf.mxu3 }
 0x35b   : > { %v3406_v37 = vpop.f32.mrf.mxu1 }
 0x35c   : > { %v3407_v36 = vadd.f32 %v3406_v37, %v6916_v19  ;;  %v7001_v37 = vld [vmem:[%s7075_s7] ss:$0 sm:$0xff] }
 0x35d   : > { %v3753_v31 = vpop.f32.mrf.mxu0 }
 0x362   : > { %v4102_v44 = vpop.f32.mrf.mxu3 }
 0x363   : > { %v3409_v59 = vpop.f32.mrf.mxu1 }
 0x365   : > { %v3588_v1 = vpop.f32.mrf.mxu2  ;;  %v6963_v33 = vpop.f32.mrf.mxu0 }
 0x366   : > { %4820 = vmatmul.msk.bf16.gmra.mxu1 %vm679_vm1, %v7378_v38  ;;  %v3608_v13 = vadd.f32 %v3588_v1, %v3405_v14  ;;  %v3410_v38 = vadd.f32 %v3409_v59, %v6922_v54 }
 0x368   : > { %v3688_v32 = vadd.f32 %v3668_v4, %v3608_v13 }
 0x36a   : > { %v3768_v25 = vadd.f32 %v3748_v3, %v3688_v32  ;;  %v4105_v3 = vpop.f32.mrf.mxu3 }
 0x36b   : > { %v6947_v23 = vpop.f32.mrf.mxu1 }
 0x36c   : > { %v3412_v54 = vadd.f32 %v6947_v23, %v6926_v47 }
 0x36d   : > { %v3590_v62 = vpop.f32.mrf.mxu2  ;;  %v6969_v56 = vpop.f32.mrf.mxu0 }
 0x36e   : > { %v3609_v17 = vadd.f32 %v3590_v62, %v3407_v36 }
 0x370   : > { %v3689_v63 = vadd.f32 %v3670_v11, %v3609_v17 }
 0x373   : > { %v6949_v39 = vpop.f32.mrf.mxu1 }
 0x374   : > { %v3415_v23 = vadd.f32 %v6949_v39, %v6932_v15 }
 0x375   : > { %v6975_v53 = vpop.f32.mrf.mxu0 }
 0x376   : > { %4821 = vmatmul.msk.bf16.gmra.mxu1 %vm679_vm1, %v7379_v9  ;;  %v3769_v9 = vadd.f32 %v3750_v26, %v3689_v63 }
 0x378   : > { %v3593_v40 = vpop.f32.mrf.mxu2 }
 0x379   : > { %v3610_v1 = vadd.f32 %v3593_v40, %v3410_v38 }
 0x37b   : > { %v6953_v27 = vpop.f32.mrf.mxu1  ;;  %v3690_v13 = vadd.f32 %v3673_v48, %v3610_v1  ;;  %v7009_v48 = vld [vmem:[%s7077_s9] ss:$0 sm:$0xff] }
 0x37d   : > { %v6981_v57 = vpop.f32.mrf.mxu0  ;;  %v3770_v40 = vadd.f32 %v3753_v31, %v3690_v13  ;;  %v4107_v31 = vpop.f32.mrf.mxu3 }
 0x380   : > { %v3595_v22 = vpop.f32.mrf.mxu2 }
 0x381   : > { %v3611_v59 = vadd.f32 %v3595_v22, %v3412_v54 }
 0x383   : > { %v6955_v18 = vpop.f32.mrf.mxu1 }
 0x385   : > { %v6987_v34 = vpop.f32.mrf.mxu0  ;;  %v4110_v54 = vpop.f32.mrf.mxu3 }
 0x386   : > { %4822 = vmatmul.msk.bf16.gmra.mxu1 %vm679_vm1, %v7380_v2 }
 0x38b   : > { %v6959_v60 = vpop.f32.mrf.mxu2  ;;  %v6961_v61 = vpop.f32.mrf.mxu1 }
 0x38c   : > { %v3612_v17 = vadd.f32 %v6959_v60, %v3415_v23 }
 0x38d   : > { %v4292_v41 = vpop.f32.mrf.mxu0 }
 0x38e   : > { %v3692_v15 = vadd.f32 %v6965_v24, %v3612_v17 }
 0x390   : > { %v3772_v13 = vadd.f32 %v6969_v56, %v3692_v15  ;;  %v3420_v56 = vadd.f32 %v6955_v18, %v6941_v49  ;;  %v4112_v49 = vpop.f32.mrf.mxu3 }
 0x393   : > { %v3940_v58 = vpop.f32.mrf.mxu1  ;;  %v6967_v45 = vpop.f32.mrf.mxu2 }
 0x394   : > { %v3960_v8 = vadd.f32 %v3940_v58, %v3768_v25 }
 0x395   : > { %v4294_v12 = vpop.f32.mrf.mxu0 }
 0x39b   : > { %v3942_v35 = vpop.f32.mrf.mxu1  ;;  %v6973_v29 = vpop.f32.mrf.mxu2 }
 0x39c   : > { %v3961_v4 = vadd.f32 %v3942_v35, %v3769_v9 }
 0x39d   : > { %v4297_v11 = vpop.f32.mrf.mxu0 }
 0x3a3   : > { %v3945_v43 = vpop.f32.mrf.mxu1  ;;  %v6979_v51 = vpop.f32.mrf.mxu2 }
 0x3ab   : > { %v3947_v28 = vpop.f32.mrf.mxu1  ;;  %v4020_v30 = vpop.f32.mrf.mxu2 }
 0x3ac   : > { %v4040_v10 = vadd.f32 %v4020_v30, %v3960_v8  ;;  %v3962_v30 = vadd.f32 %v3945_v43, %v3770_v40 }
 0x3ae   : > { %v4120_v2 = vadd.f32 %v4100_v50, %v4040_v10  ;;  %v3691_v50 = vadd.f32 %v3675_v5, %v3611_v59  ;;  %v4299_v10 = vpop.f32.mrf.mxu0 }
 0x3b0   : > { %v4312_v19 = vadd.f32 %v4292_v41, %v4120_v2  ;;  %v3771_v25 = vadd.f32 %v6963_v33, %v3691_v50  ;;  %v3417_v2 = vadd.f32 %v6953_v27, %v6936_v7 }
 0x3b2   : > { %v4324_v26 = vadd.f32 %v7001_v37, %v4312_v19  ;;  %v3963_v38 = vadd.f32 %v3947_v28, %v3771_v25 }
 0x3b3   : > { %v6985_v21 = vpop.f32.mrf.mxu1  ;;  %v4022_v55 = vpop.f32.mrf.mxu2 }
 0x3b4   : > { %v4041_v62 = vadd.f32 %v4022_v55, %v3961_v4  ;;  %v4340_v41 = vmul.f32 0.2, %v4324_v26  ;;  %vm4332_vm0 = vcmp.gt.f32.partialorder %v4324_v26, 0.0  ;;  %v3613_v4 = vadd.f32 %v6967_v45, %v3417_v2 }
 0x3b6   : > { %v4121_v58 = vadd.f32 %v4102_v44, %v4041_v62  ;;  %v4348_v8 = vsel %vm4332_vm0, %v4324_v26, %v4340_v41  ;;  %v3693_v7 = vadd.f32 %v6971_v20, %v3613_v4 }
 0x3b8   : > { %v4313_v55 = vadd.f32 %v4294_v12, %v4121_v58  ;;  %v3773_v20 = vadd.f32 %v6975_v53, %v3693_v7  ;;  %v3422_v53 = vadd.f32 %v6961_v61, %v6943_v52 }
 0x3ba   : > { %v4325_v5 = vadd.f32 %v7001_v37, %v4313_v55 }
 0x3bb   : > { %v6990_v16 = vpop.f32.mrf.mxu1  ;;  %v4025_v46 = vpop.f32.mrf.mxu2 }
 0x3bc   : > { %v4042_v36 = vadd.f32 %v4025_v46, %v3962_v30  ;;  %v4341_v12 = vmul.f32 0.2, %v4325_v5  ;;  %vm4333_vm4 = vcmp.gt.f32.partialorder %v4325_v5, 0.0  ;;  %v4302_v30 = vpop.f32.mrf.mxu0 }
 0x3be   : > { %v4122_v43 = vadd.f32 %v4105_v3, %v4042_v36  ;;  %v4349_v62 = vsel %vm4333_vm4, %v4325_v5, %v4341_v12 }
 0x3c0   : > { %v4314_v46 = vadd.f32 %v4297_v11, %v4122_v43  ;;  %v3964_v11 = vadd.f32 %v6985_v21, %v3772_v13  ;;  %v3614_v21 = vadd.f32 %v6973_v29, %v3420_v56 }
 0x3c2   : > { %v4326_v24 = vadd.f32 %v7001_v37, %v4314_v46  ;;  %v3694_v18 = vadd.f32 %v6977_v6, %v3614_v21 }
 0x3c3   : > { %v6993_v42 = vpop.f32.mrf.mxu1  ;;  %v4027_v35 = vpop.f32.mrf.mxu2 }
 0x3c4   : > { %v4043_v1 = vadd.f32 %v4027_v35, %v3963_v38  ;;  %v4342_v26 = vmul.f32 0.2, %v4326_v24  ;;  %vm4334_vm7 = vcmp.gt.f32.partialorder %v4326_v24, 0.0 }
 0x3c6   : > { %v4123_v19 = vadd.f32 %v4107_v31, %v4043_v1  ;;  %v4350_v36 = vsel %vm4334_vm7, %v4326_v24, %v4342_v26 }
 0x3c8   : > { %v4315_v58 = vadd.f32 %v4299_v10, %v4123_v19 }
 0x3ca   : > { %v4327_v41 = vadd.f32 %v7001_v37, %v4315_v58 }
 0x3cb   : > { %v6996_v14 = vpop.f32.mrf.mxu1  ;;  %v4030_v39 = vpop.f32.mrf.mxu2 }
 0x3cc   : > { %v4044_v35 = vadd.f32 %v4030_v39, %v3964_v11  ;;  %v4343_v25 = vmul.f32 0.2, %v4327_v41  ;;  %vm4335_vm11 = vcmp.gt.f32.partialorder %v4327_v41, 0.0 }
 0x3ce   : > { %v4124_v55 = vadd.f32 %v4110_v54, %v4044_v35  ;;  %v4351_v15 = vsel %vm4335_vm11, %v4327_v41, %v4343_v25 }
 0x3d0   : > { %v4316_v5 = vadd.f32 %v4302_v30, %v4124_v55 }
 0x3d2   : > { %v4328_v10 = vadd.f32 %v7001_v37, %v4316_v5 }
 0x3d3   : > { %v4373_v32 = vpop.f32.mrf.mxu1  ;;  %v4032_v50 = vpop.f32.mrf.mxu2 }
 0x3d4   : > { %v4374_v47 = vadd.f32 %v7009_v48, %v4373_v32  ;;  %v4344_v46 = vmul.f32 0.2, %v4328_v10  ;;  %vm4336_vm5 = vcmp.gt.f32.partialorder %v4328_v10, 0.0 }
 0x3d6   : > { %vm4393_vm1 = vcmp.gt.f32.partialorder %v4374_v47, 0.0  ;;  %v4401_v22 = vmul.f32 0.2, %v4374_v47  ;;  %v4352_v13 = vsel %vm4336_vm5, %v4328_v10, %v4344_v46 }
 0x3d8   : > { %v4409_v44 = vsel %vm4393_vm1, %v4374_v47, %v4401_v22  ;;  %v3965_v22 = vadd.f32 %v6990_v16, %v3773_v20  ;;  %v3615_v16 = vadd.f32 %v6979_v51, %v3422_v53 }
 0x3d9   : > { %v4417_v63 = vadd.f32 %v4409_v44, %v4348_v8  ;;  %v4304_v44 = vpop.f32.mrf.mxu0 }
 0x3da   : > { %v4045_v43 = vadd.f32 %v4032_v50, %v3965_v22  ;;  %v3695_v52 = vadd.f32 %v6983_v0, %v3615_v16 }
 0x3db   : > { %v4425_v60 = vmul.f32 0.70710677, %v4417_v63  ;;  %v4375_v33 = vpop.f32.mrf.mxu1  ;;  %v3774_v63 = vadd.f32 %v6981_v57, %v3694_v18  ;;  %v4035_v6 = vpop.f32.mrf.mxu2 }
 0x3dc   : > { %v4376_v9 = vadd.f32 %v7009_v48, %v4375_v33  ;;  %v4125_v38 = vadd.f32 %v4112_v49, %v4045_v43  ;;  %v4115_v57 = vpop.f32.mrf.mxu3 }
 0x3dd   : > { %4433 = vst [vmem:[%s7021_s28] sm:$0xff] %v4425_v60  ;;  %v3966_v33 = vadd.f32 %v6993_v42, %v3774_v63 }
 0x3de   : > { %vm4394_vm2 = vcmp.gt.f32.partialorder %v4376_v9, 0.0  ;;  %v4402_v28 = vmul.f32 0.2, %v4376_v9  ;;  %v4317_v1 = vadd.f32 %v4304_v44, %v4125_v38 }
 0x3e0   : > { %v4410_v3 = vsel %vm4394_vm2, %v4376_v9, %v4402_v28  ;;  %v4046_v9 = vadd.f32 %v4035_v6, %v3966_v33  ;;  %v3775_v28 = vadd.f32 %v6987_v34, %v3695_v52  ;;  %v4329_v4 = vadd.f32 %v7001_v37, %v4317_v1 }
 0x3e1   : > { %v4418_v59 = vadd.f32 %v4410_v3, %v4349_v62  ;;  %v4307_v24 = vpop.f32.mrf.mxu0 }
 0x3e2   : > { %v4126_v42 = vadd.f32 %v4115_v57, %v4046_v9  ;;  %v3967_v3 = vadd.f32 %v6996_v14, %v3775_v28  ;;  %v4345_v11 = vmul.f32 0.2, %v4329_v4  ;;  %vm4337_vm14 = vcmp.gt.f32.partialorder %v4329_v4, 0.0 }
 0x3e3   : > { %v4426_v27 = vmul.f32 0.70710677, %v4418_v59  ;;  %v4378_v40 = vpop.f32.mrf.mxu1  ;;  %v4037_v19 = vpop.f32.mrf.mxu2 }
 0x3e4   : > { %v4379_v45 = vadd.f32 %v7009_v48, %v4378_v40  ;;  %v4318_v7 = vadd.f32 %v4307_v24, %v4126_v42  ;;  %v4117_v26 = vpop.f32.mrf.mxu3 }
 0x3e5   : > { %4434 = vst [vmem:[%s7021_s28 + $0x8] sm:$0xff] %v4426_v27  ;;  %v4047_v27 = vadd.f32 %v4037_v19, %v3967_v3 }
 0x3e6   : > { %vm4395_vm10 = vcmp.gt.f32.partialorder %v4379_v45, 0.0  ;;  %v4403_v32 = vmul.f32 0.2, %v4379_v45  ;;  %v4330_v58 = vadd.f32 %v7001_v37, %v4318_v7 }
 0x3e7   : > { %v4127_v35 = vadd.f32 %v4117_v26, %v4047_v27 }
 0x3e8   : > { %v4411_v47 = vsel %vm4395_vm10, %v4379_v45, %v4403_v32  ;;  %v4353_v45 = vsel %vm4337_vm14, %v4329_v4, %v4345_v11  ;;  %v4346_v21 = vmul.f32 0.2, %v4330_v58  ;;  %vm4338_vm3 = vcmp.gt.f32.partialorder %v4330_v58, 0.0 }
 0x3e9   : > { %v4419_v23 = vadd.f32 %v4411_v47, %v4350_v36  ;;  %v4309_v14 = vpop.f32.mrf.mxu0 }
 0x3ea   : > { %v4319_v20 = vadd.f32 %v4309_v14, %v4127_v35  ;;  %v4354_v47 = vsel %vm4338_vm3, %v4330_v58, %v4346_v21 }
 0x3eb   : > { %v4427_v31 = vmul.f32 0.70710677, %v4419_v23  ;;  %v4380_v17 = vpop.f32.mrf.mxu1 }
 0x3ec   : > { %v4381_v29 = vadd.f32 %v7009_v48, %v4380_v17  ;;  %v4331_v36 = vadd.f32 %v7001_v37, %v4319_v20 }
 0x3ed   : > { %4435 = vst [vmem:[%s7021_s28 + $0x10] sm:$0xff] %v4427_v31 }
 0x3ee   : > { %vm4396_vm12 = vcmp.gt.f32.partialorder %v4381_v29, 0.0  ;;  %v4404_v8 = vmul.f32 0.2, %v4381_v29  ;;  %v4347_v31 = vmul.f32 0.2, %v4331_v36  ;;  %vm4339_vm8 = vcmp.gt.f32.partialorder %v4331_v36, 0.0 }
 0x3f0   : > { %v4412_v39 = vsel %vm4396_vm12, %v4381_v29, %v4404_v8  ;;  %v4355_v5 = vsel %vm4339_vm8, %v4331_v36, %v4347_v31 }
 0x3f1   : > { %v4420_v60 = vadd.f32 %v4412_v39, %v4351_v15 }
 0x3f3   : > { %v4428_v61 = vmul.f32 0.70710677, %v4420_v60  ;;  %v4383_v12 = vpop.f32.mrf.mxu1 }
 0x3f4   : > { %v4384_v51 = vadd.f32 %v7009_v48, %v4383_v12 }
 0x3f5   : > { %4436 = vst [vmem:[%s7021_s28 + $0x18] sm:$0xff] %v4428_v61 }
 0x3f6   : > { %vm4397_vm13 = vcmp.gt.f32.partialorder %v4384_v51, 0.0  ;;  %v4405_v2 = vmul.f32 0.2, %v4384_v51 }
 0x3f8   : > { %v4413_v0 = vsel %vm4397_vm13, %v4384_v51, %v4405_v2 }
 0x3f9   : > { %v4421_v62 = vadd.f32 %v4413_v0, %v4352_v13 }
 0x3fb   : > { %v4429_v54 = vmul.f32 0.70710677, %v4421_v62  ;;  %v4385_v59 = vpop.f32.mrf.mxu1 }
 0x3fc   : > { %v4386_v40 = vadd.f32 %v7009_v48, %v4385_v59 }
 0x3fd   : > { %4437 = vst [vmem:[%s7021_s28 + $0x20] sm:$0xff] %v4429_v54 }
 0x3fe   : > { %vm4398_vm15 = vcmp.gt.f32.partialorder %v4386_v40, 0.0  ;;  %v4406_v34 = vmul.f32 0.2, %v4386_v40 }
 0x400   : > { %v4414_v56 = vsel %vm4398_vm15, %v4386_v40, %v4406_v34 }
 0x401   : > { %v4422_v30 = vadd.f32 %v4414_v56, %v4353_v45 }
 0x403   : > { %v4430_v50 = vmul.f32 0.70710677, %v4422_v30  ;;  %v4388_v32 = vpop.f32.mrf.mxu1 }
 0x404   : > { %v4389_v41 = vadd.f32 %v7009_v48, %v4388_v32 }
 0x405   : > { %4438 = vst [vmem:[%s7021_s28 + $0x28] sm:$0xff] %v4430_v50 }
 0x406   : > { %vm4399_vm6 = vcmp.gt.f32.partialorder %v4389_v41, 0.0  ;;  %v4407_v55 = vmul.f32 0.2, %v4389_v41 }
 0x408   : > { %v4415_v23 = vsel %vm4399_vm6, %v4389_v41, %v4407_v55 }
 0x409   : > { %v4423_v22 = vadd.f32 %v4415_v23, %v4354_v47 }
 0x40b   : > { %v4431_v49 = vmul.f32 0.70710677, %v4423_v22  ;;  %v4390_v18 = vpop.f32.mrf.mxu1 }
 0x40c   : > { %v4391_v17 = vadd.f32 %v7009_v48, %v4390_v18 }
 0x40d   : > { %4439 = vst [vmem:[%s7021_s28 + $0x30] sm:$0xff] %v4431_v49 }
 0x40e   : > { %vm4400_vm9 = vcmp.gt.f32.partialorder %v4391_v17, 0.0  ;;  %v4408_v25 = vmul.f32 0.2, %v4391_v17 }
 0x410   : > { %v4416_v43 = vsel %vm4400_vm9, %v4391_v17, %v4408_v25 }
 0x411   : > { %v4424_v29 = vadd.f32 %v4416_v43, %v4355_v5 }
 0x413   : > { %v4432_v53 = vmul.f32 0.70710677, %v4424_v29 }
 0x415   : > { %4440 = vst [vmem:[%s7021_s28 + $0x38] sm:$0xff] %v4432_v53 }
 0x416 PF: > { %s20_s13 = sadd.s32 1, %s4874_s13  }
 0x417   : > { %p17_p4 = scmp.ge.s32.totalorder %s20_s13, 4  }
 0x419   :  { %19 = sbr.rel (!%p17_p4) target bundleno = 1 (0x1), region = 101 }

</bundles_post_ra>
